<compile_context>
chip_gen: v6e
topology: v6e:2x2x1
jax: 0.10.0
libtpu: 0.0.40
codegen_flags: <defaults>
</compile_context>

<pallas_src>
import functools

import numpy as np
import jax
import jax.numpy as jnp
from jax import lax
from jax.experimental import pallas as pl
from jax.experimental.pallas import tpu as pltpu


# ---------------------------------------------------------------------------
# Kernel
# ---------------------------------------------------------------------------
def _attention_gated_kernel(is_norm, fused_softmax, d,
                            n_ref,         # SMEM (1,) int32  (scalar prefetch)
                            x_ref,         # (TN, L)   bf16
                            wcat_ref,      # (L, 2D)   bf16   [Wv | Wu]
                            bcat_ref,      # (1, 2D)   f32    [bv | bu]
                            wa_ref,        # (K, D)    bf16   (row form of Wa)
                            out_ref):      # fused: (T,1,TN) resident; split: (1,1,TN)
    i = pl.program_id(0)

    # ---- one fused (TN, L) x (L, 2D) bf16 GEMM on the MXU, f32 accumulation --
    h = jnp.dot(x_ref[...], wcat_ref[...],
                preferred_element_type=jnp.float32) + bcat_ref[...]   # (TN, 2D)

    # ---- activations stay f32 on the VPU/EUP (v5e has no bf16 VPU/EUP) ------
    a_v = jnp.tanh(h[:, :d])                 # static 128-lane-aligned slices
    a_u = jax.nn.sigmoid(h[:, d:])
    gated = (a_v * a_u).astype(jnp.bfloat16)                          # (TN, D)

    # ---- lane-dense logits row: (K, TN) = Wa (K,D) . gated (TN,D) over D ----
    logits = lax.dot_general(
        wa_ref[...], gated, (((1,), (1,)), ((), ())),
        preferred_element_type=jnp.float32)                           # (1, TN)

    if fused_softmax:
        # one row of the resident output per grid step (leading-axis index)
        out_ref[i] = logits

        if is_norm:
            # ---- fused global masked softmax on the last grid step ----------
            @pl.when(i == pl.num_programs(0) - 1)
            def _finalize():
                raw = out_ref[...]                                    # (T,1,TN)
                tn = raw.shape[2]
                pos = (lax.broadcasted_iota(jnp.int32, raw.shape, 0) * tn
                       + lax.broadcasted_iota(jnp.int32, raw.shape, 2))
                masked = jnp.where(pos < n_ref[0], raw, -jnp.inf)
                m = jnp.max(jnp.max(masked, axis=2, keepdims=True),
                            axis=0, keepdims=True)                    # (1,1,1)
                p = jnp.exp(masked - m)          # padded lanes -> exactly 0
                denom = jnp.sum(jnp.sum(p, axis=2, keepdims=True),
                                axis=0, keepdims=True)                # (1,1,1)
                # exact division: denom is a single scalar, approx buys nothing
                out_ref[...] = p / denom
    else:
        out_ref[0] = logits


# ---------------------------------------------------------------------------
# Wrapper
# ---------------------------------------------------------------------------
def attention_gated(x, wv, bv, wu, bu, wa, ba, *, is_norm=True,
                    block_n=512, fuse_softmax=True):
    """x: (N, L) f32. wv/wu: (L, D). bv/bu: (D,). wa: (D, K). ba: (K,).
    Returns A with shape (K, N), softmaxed over N when is_norm.

    fuse_softmax=True  -> softmax fused into the last grid step (v5e/v6e).
    fuse_softmax=False -> "parallel" grid (shards across v7x's 2 TensorCores),
                          tiny (K, N) softmax done in XLA afterwards.
    """
    n, l = x.shape
    d = wv.shape[1]
    k = wa.shape[1]
    # TODO(synk): K > 1 attention heads would need a (K, T, TN) output layout;
    # the module default (and this kernel) is K == 1.
    assert k == 1, "kernel implements the module default K=1"
    assert n >= 1  # masked softmax needs at least one valid instance

    n_pad = ((n + block_n - 1) // block_n) * block_n
    num_tiles = n_pad // block_n
    if n_pad != n:
        x = jnp.pad(x, ((0, n_pad - n), (0, 0)))   # zero rows; masked/sliced

    # bf16 MXU operands (accumulation stays f32); biases stay f32.
    # NOTE: intentional bf16 matmul precision (~1e-2 relative floor) - fine
    # for MIL attention weights.
    x_b = x.astype(jnp.bfloat16)                                    # (Npad, L)
    wcat = jnp.concatenate([wv, wu], axis=1).astype(jnp.bfloat16)   # (L, 2D)
    bcat = jnp.concatenate([bv, bu]).reshape(1, 2 * d).astype(jnp.float32)
    wa_row = wa.T.astype(jnp.bfloat16)                              # (K, D)
    n_arr = jnp.asarray([n], jnp.int32)                             # scalar prefetch

    kernel = functools.partial(_attention_gated_kernel, is_norm, fuse_softmax, d)

    if fuse_softmax:
        # constant block index -> output stays resident in VMEM across the grid
        out_spec = pl.BlockSpec((num_tiles, 1, block_n), lambda i, n_s: (0, 0, 0))
        semantics = ("arbitrary",)
    else:
        out_spec = pl.BlockSpec((1, 1, block_n), lambda i, n_s: (i, 0, 0))
        semantics = ("parallel",)

    flops = 2 * n_pad * l * (2 * d) + 2 * n_pad * d * k
    transcendentals = 2 * n_pad * d + (n_pad if (is_norm and fuse_softmax) else 0)
    bytes_accessed = (x_b.size * 2 + wcat.size * 2 + bcat.size * 4
                      + wa_row.size * 2 + num_tiles * block_n * 4)

    out = pl.pallas_call(
        kernel,
        out_shape=jax.ShapeDtypeStruct((num_tiles, 1, block_n), jnp.float32),
        grid_spec=pltpu.PrefetchScalarGridSpec(
            num_scalar_prefetch=1,
            grid=(num_tiles,),
            in_specs=[
                pl.BlockSpec((block_n, l), lambda i, n_s: (i, 0)),   # x tile (streamed)
                pl.BlockSpec((l, 2 * d), lambda i, n_s: (0, 0)),     # [Wv|Wu] resident
                pl.BlockSpec((1, 2 * d), lambda i, n_s: (0, 0)),     # [bv|bu]
                pl.BlockSpec((k, d), lambda i, n_s: (0, 0)),         # Wa row
            ],
            out_specs=out_spec,
        ),
        compiler_params=pltpu.CompilerParams(dimension_semantics=semantics),
        cost_estimate=pl.CostEstimate(
            flops=flops,
            transcendentals=transcendentals,
            bytes_accessed=bytes_accessed),
    )(n_arr, x_b, wcat, bcat, wa_row)

    # (T, 1, TN) row-major == flat instance order; free reshape + slice.
    a = out.reshape(k, n_pad)[:, :n]

    if is_norm and fuse_softmax:
        # softmax already applied in-kernel; adding the constant ba before a
        # softmax over N is a no-op (shift invariance), so skip it.
        return a

    a = a + ba.reshape(k, 1).astype(jnp.float32)
    if is_norm:
        a = jax.nn.softmax(a, axis=1)   # tiny (K, N) softmax; padding sliced off
    return a


# ---------------------------------------------------------------------------
# Pure-JAX f32 reference
# ---------------------------------------------------------------------------
def attention_gated_reference(x, wv, bv, wu, bu, wa, ba, is_norm=True):
    hi = lax.Precision.HIGHEST
    a_v = jnp.tanh(jnp.dot(x, wv, precision=hi) + bv)
    a_u = jax.nn.sigmoid(jnp.dot(x, wu, precision=hi) + bu)
    a = jnp.dot(a_v * a_u, wa, precision=hi) + ba        # (N, K)
    a = a.T                                              # (K, N)
    if is_norm:
        a = jax.nn.softmax(a, axis=1)
    return a


if __name__ == "__main__":
    key = jax.random.PRNGKey(0)
    ks = jax.random.split(key, 7)

    # module defaults L=768, D=128, K=1; N=1000 is deliberately ragged so the
    # kernel sees 2 grid tiles (block_n=512) plus 24 masked padding rows.
    N, L, D, K = 1000, 768, 128, 1
    s = 0.02
    x = jax.random.normal(ks[0], (N, L), jnp.float32)
    wv = s * jax.random.normal(ks[1], (L, D), jnp.float32)
    bv = s * jax.random.normal(ks[2], (D,), jnp.float32)
    wu = s * jax.random.normal(ks[3], (L, D), jnp.float32)
    bu = s * jax.random.normal(ks[4], (D,), jnp.float32)
    wa = s * jax.random.normal(ks[5], (D, K), jnp.float32)
    ba = s * jax.random.normal(ks[6], (K,), jnp.float32)

    ref_norm = jax.block_until_ready(
        attention_gated_reference(x, wv, bv, wu, bu, wa, ba, is_norm=True))
    ref_raw = jax.block_until_ready(
        attention_gated_reference(x, wv, bv, wu, bu, wa, ba, is_norm=False))

    # 1) default path: fused in-kernel masked softmax (v5e / v6e)
    out = jax.block_until_ready(
        attention_gated(x, wv, bv, wu, bu, wa, ba, is_norm=True))
    assert out.shape == (K, N), out.shape
    np.testing.assert_allclose(np.asarray(out), np.asarray(ref_norm),
                               rtol=2e-2, atol=1e-4)

    # 2) split path: parallel grid + XLA softmax (v7x / 2-TC friendly)
    out_split = jax.block_until_ready(
        attention_gated(x, wv, bv, wu, bu, wa, ba, is_norm=True,
                        fuse_softmax=False))
    assert out_split.shape == (K, N), out_split.shape
    np.testing.assert_allclose(np.asarray(out_split), np.asarray(ref_norm),
                               rtol=2e-2, atol=1e-4)

    # 3) un-normalized path: raw transposed logits (ba added in wrapper)
    raw = jax.block_until_ready(
        attention_gated(x, wv, bv, wu, bu, wa, ba, is_norm=False))
    assert raw.shape == (K, N), raw.shape
    np.testing.assert_allclose(np.asarray(raw), np.asarray(ref_raw),
                               rtol=2e-2, atol=3e-3)

    print("KERNEL_OK")
</pallas_src>

<mosaic_0001>
module attributes {stable_mosaic.version = 11 : i64} {
  func.func @_attention_gated_kernel(%arg0: i32, %arg1: memref<1xi32, #tpu.memory_space<smem>>, %arg2: memref<512x768xbf16, #tpu.memory_space<vmem>>, %arg3: memref<768x256xbf16, #tpu.memory_space<vmem>>, %arg4: memref<1x256xf32, #tpu.memory_space<vmem>>, %arg5: memref<1x128xbf16, #tpu.memory_space<vmem>>, %arg6: memref<2x1x512xf32, #tpu.memory_space<vmem>>) attributes {dimension_semantics = [#tpu.dimension_semantics<arbitrary>], iteration_bounds = array<i64: 2>, scalar_prefetch = 1 : i64, scratch_operands = 0 : i64, tpu.core_type = #tpu.core_type<tc>, window_params = [{transform_indices = @transform_0, window_bounds = array<i64: 512, 768>}, {pipeline_mode = #tpu.pipeline_mode<synchronous>, transform_indices = @transform_1, window_bounds = array<i64: 768, 256>}, {pipeline_mode = #tpu.pipeline_mode<synchronous>, transform_indices = @transform_2, window_bounds = array<i64: 1, 256>}, {pipeline_mode = #tpu.pipeline_mode<synchronous>, transform_indices = @transform_3, window_bounds = array<i64: 1, 128>}, {pipeline_mode = #tpu.pipeline_mode<synchronous>, transform_indices = @transform_4, window_bounds = array<i64: 2, 1, 512>}]} {
    %c0 = arith.constant 0 : index
    %c0_0 = arith.constant 0 : index
    %0 = vector.load %arg2[%c0, %c0_0] : memref<512x768xbf16, #tpu.memory_space<vmem>>, vector<512x768xbf16>
    %c0_1 = arith.constant 0 : index
    %c0_2 = arith.constant 0 : index
    %1 = vector.load %arg3[%c0_1, %c0_2] : memref<768x256xbf16, #tpu.memory_space<vmem>>, vector<768x256xbf16>
    %cst = arith.constant dense<0.000000e+00> : vector<512x256xf32>
    %2 = tpu.matmul %0, %1, %cst {dimension_numbers = #tpu.dot_dimension_numbers<[1], [0], [0], [1], [0, 0, 1, 1], [], []>} : vector<512x768xbf16>, vector<768x256xbf16>, vector<512x256xf32> -> vector<512x256xf32>
    %c0_3 = arith.constant 0 : index
    %c0_4 = arith.constant 0 : index
    %3 = vector.load %arg4[%c0_3, %c0_4] : memref<1x256xf32, #tpu.memory_space<vmem>>, vector<1x256xf32>
    %4 = vector.broadcast %3 : vector<1x256xf32> to vector<512x256xf32>
    %5 = arith.addf %2, %4 : vector<512x256xf32>
    %6 = vector.extract_strided_slice %5 {offsets = [0, 0], sizes = [512, 128], strides = [1, 1]} : vector<512x256xf32> to vector<512x128xf32>
    %7 = math.tanh %6 : vector<512x128xf32>
    %8 = vector.extract_strided_slice %5 {offsets = [0, 128], sizes = [512, 128], strides = [1, 1]} : vector<512x256xf32> to vector<512x128xf32>
    %9 = arith.negf %8 : vector<512x128xf32>
    %10 = math.exp %9 : vector<512x128xf32>
    %cst_5 = arith.constant 1.000000e+00 : f32
    %11 = vector.broadcast %cst_5 : f32 to vector<512x128xf32>
    %12 = arith.addf %11, %10 : vector<512x128xf32>
    %13 = arith.divf %11, %12 : vector<512x128xf32>
    %14 = arith.mulf %7, %13 : vector<512x128xf32>
    %15 = arith.truncf %14 : vector<512x128xf32> to vector<512x128xbf16>
    %c0_6 = arith.constant 0 : index
    %c0_7 = arith.constant 0 : index
    %16 = vector.load %arg5[%c0_6, %c0_7] : memref<1x128xbf16, #tpu.memory_space<vmem>>, vector<1x128xbf16>
    %cst_8 = arith.constant dense<0.000000e+00> : vector<1x512xf32>
    %17 = tpu.matmul %16, %15, %cst_8 {dimension_numbers = #tpu.dot_dimension_numbers<[1], [1], [0], [0], [0, 0, 1, 0], [], []>} : vector<1x128xbf16>, vector<512x128xbf16>, vector<1x512xf32> -> vector<1x512xf32>
    %18 = arith.index_cast %arg0 : i32 to index
    %c0_9 = arith.constant 0 : index
    %c0_10 = arith.constant 0 : index
    %19 = vector.load %arg6[%18, %c0_9, %c0_10] : memref<2x1x512xf32, #tpu.memory_space<vmem>>, vector<1x1x512xf32>
    %20 = vector.shape_cast %19 : vector<1x1x512xf32> to vector<1x512xf32>
    %21 = vector.shape_cast %17 : vector<1x512xf32> to vector<1x1x512xf32>
    tpu.vector_store %arg6[%18, %c0_9, %c0_10], %21 {strides = array<i32>} : memref<2x1x512xf32, #tpu.memory_space<vmem>>, vector<1x1x512xf32>,
    %c1_i32 = arith.constant 1 : i32
    %22 = arith.cmpi eq, %arg0, %c1_i32 : i32
    %23 = arith.extui %22 : i1 to i32
    %c0_i32 = arith.constant 0 : i32
    %24 = arith.cmpi ne, %23, %c0_i32 : i32
    scf.if %24 {
      %c0_11 = arith.constant 0 : index
      %c0_12 = arith.constant 0 : index
      %c0_13 = arith.constant 0 : index
      %25 = vector.load %arg6[%c0_11, %c0_12, %c0_13] : memref<2x1x512xf32, #tpu.memory_space<vmem>>, vector<2x1x512xf32>
      %26 = tpu.iota {dimensions = array<i32: 0>} : vector<2x1x512xi32>
      %c512_i32 = arith.constant 512 : i32
      %27 = vector.broadcast %c512_i32 : i32 to vector<2x1x512xi32>
      %28 = arith.muli %26, %27 : vector<2x1x512xi32>
      %29 = tpu.iota {dimensions = array<i32: 2>} : vector<2x1x512xi32>
      %30 = arith.addi %28, %29 : vector<2x1x512xi32>
      %c0_14 = arith.constant 0 : index
      %31 = memref.load %arg1[%c0_14] : memref<1xi32, #tpu.memory_space<smem>>
      %32 = vector.broadcast %31 : i32 to vector<2x1x512xi32>
      %33 = arith.cmpi slt, %30, %32 : vector<2x1x512xi32>
      %cst_15 = arith.constant 0xFF800000 : f32
      %34 = vector.broadcast %cst_15 : f32 to vector<2x1x512xf32>
      %35 = arith.select %33, %25, %34 : vector<2x1x512xi1>, vector<2x1x512xf32>
      %cst_16 = arith.constant dense<0xFF800000> : vector<2x1xf32>
      %36 = vector.multi_reduction <maximumf>, %35, %cst_16 [2] : vector<2x1x512xf32> to vector<2x1xf32>
      %37 = vector.shape_cast %36 : vector<2x1xf32> to vector<2x1x1xf32>
      %cst_17 = arith.constant dense<0xFF800000> : vector<1x1xf32>
      %38 = vector.multi_reduction <maximumf>, %37, %cst_17 [0] : vector<2x1x1xf32> to vector<1x1xf32>
      %39 = vector.shape_cast %38 : vector<1x1xf32> to vector<1x1x1xf32>
      %40 = vector.broadcast %39 : vector<1x1x1xf32> to vector<2x1x512xf32>
      %41 = arith.subf %35, %40 : vector<2x1x512xf32>
      %42 = math.exp %41 : vector<2x1x512xf32>
      %cst_18 = arith.constant dense<0.000000e+00> : vector<2x1xf32>
      %43 = vector.multi_reduction <add>, %42, %cst_18 [2] : vector<2x1x512xf32> to vector<2x1xf32>
      %44 = vector.shape_cast %43 : vector<2x1xf32> to vector<2x1x1xf32>
      %cst_19 = arith.constant dense<0.000000e+00> : vector<1x1xf32>
      %45 = vector.multi_reduction <add>, %44, %cst_19 [0] : vector<2x1x1xf32> to vector<1x1xf32>
      %46 = vector.shape_cast %45 : vector<1x1xf32> to vector<1x1x1xf32>
      %47 = vector.broadcast %46 : vector<1x1x1xf32> to vector<2x1x512xf32>
      %48 = arith.divf %42, %47 : vector<2x1x512xf32>
      %c0_20 = arith.constant 0 : index
      %c0_21 = arith.constant 0 : index
      %c0_22 = arith.constant 0 : index
      %49 = vector.load %arg6[%c0_20, %c0_21, %c0_22] : memref<2x1x512xf32, #tpu.memory_space<vmem>>, vector<2x1x512xf32>
      tpu.vector_store %arg6[%c0_20, %c0_21, %c0_22], %48 {strides = array<i32>} : memref<2x1x512xf32, #tpu.memory_space<vmem>>, vector<2x1x512xf32>,
    } else {
    }
    return
  }
  func.func @transform_0(%arg0: i32, %arg1: memref<1xi32, #tpu.memory_space<smem>>) -> (i32, i32) {
    %c0_i32 = arith.constant 0 : i32
    %c0_i32_0 = arith.constant 0 : i32
    return %arg0, %c0_i32 : i32, i32
  }
  func.func @transform_1(%arg0: i32, %arg1: memref<1xi32, #tpu.memory_space<smem>>) -> (i32, i32) {
    %c0_i32 = arith.constant 0 : i32
    %c0_i32_0 = arith.constant 0 : i32
    %c0_i32_1 = arith.constant 0 : i32
    return %c0_i32, %c0_i32_0 : i32, i32
  }
  func.func @transform_2(%arg0: i32, %arg1: memref<1xi32, #tpu.memory_space<smem>>) -> (i32, i32) {
    %c0_i32 = arith.constant 0 : i32
    %c0_i32_0 = arith.constant 0 : i32
    %c0_i32_1 = arith.constant 0 : i32
    return %c0_i32, %c0_i32_0 : i32, i32
  }
  func.func @transform_3(%arg0: i32, %arg1: memref<1xi32, #tpu.memory_space<smem>>) -> (i32, i32) {
    %c0_i32 = arith.constant 0 : i32
    %c0_i32_0 = arith.constant 0 : i32
    %c0_i32_1 = arith.constant 0 : i32
    return %c0_i32, %c0_i32_0 : i32, i32
  }
  func.func @transform_4(%arg0: i32, %arg1: memref<1xi32, #tpu.memory_space<smem>>) -> (i32, i32, i32) {
    %c0_i32 = arith.constant 0 : i32
    %c0_i32_0 = arith.constant 0 : i32
    %c0_i32_1 = arith.constant 0 : i32
    %c0_i32_2 = arith.constant 0 : i32
    return %c0_i32, %c0_i32_0, %c0_i32_1 : i32, i32, i32
  }
}

</mosaic_0001>

<bundles_post_ra>
// kernel: tpu_custom_call.1
= control target key start
LH: loop header
LB: loop body
LE: loop exit
PB: predicated region body
PF: predicated region fallthrough
CT: control target
= control target key end

     0   :  { %s7322_s0 = inlined_call_operand.<no memory space> [shape: s32[1], index: 0, kind: input, shape index: {}]   ;;  %s7323_s1 = inlined_call_operand.hbm [shape: bf16[1024,768], index: 1, kind: input, shape index: {}]   ;;  %s7324_s2 = inlined_call_operand.hbm [shape: bf16[768,256], index: 2, kind: input, shape index: {}]   ;;  %s7325_s3 = inlined_call_operand.hbm [shape: f32[1,256], index: 3, kind: input, shape index: {}]   ;;  %s7326_s4 = inlined_call_operand.hbm [shape: bf16[1,128], index: 4, kind: input, shape index: {}]   ;;  %s7327_s5 = inlined_call_operand.hbm [shape: f32[2,1,512], index: 5, kind: output, shape index: {}]  }
   0x1   :  { %10 = sst [smem:[#allocation3]] %s7322_s0 }
   0x2   :  { %11 = vsyncpa [#allocation5], 0 }
   0x3   :  { %13 = vsyncpa [#allocation5 + $0x1], 0 }
   0x4   :  { %14 = vsyncpa [#allocation8], 0 }
   0x5   :  { %15 = vsyncpa [#allocation11], 0 }
   0x6   :  { %16 = vsyncpa [#allocation6], 0  ;;  %s5595_s20 = smov 0   ;;  %s5597_s21 = smov 0  }
   0x7   :  { %s5599_s22 = smov 0   ;;  %s5601_s23 = smov 0  }
   0x8 LB: > { %s5614_s0 = sadd.s32 4294967295, %s5548_s23   ;;  %p42_p0 = scmp.ne.s32.totalorder %s5540_s21, %s5536_s20  ;;  %s5548_s23 = sphi %s5601_s23, %s7626_s23   ;;  %s5544_s22 = sphi %s5599_s22, %s7625_s22   ;;  %s5540_s21 = sphi %s5597_s21, %s7624_s21   ;;  %s5536_s20 = sphi %s5595_s20, %s7623_s20  }
   0x9   : > { %p7328_p1 = scmp.eq.s32.totalorder %s5614_s0, 0  ;;  %p4013_p2 = scmp.ge.s32.totalorder %s5548_s23, 1 }
   0xa   : > { %p137_p3 = scmp.lt.s32.totalorder %s5548_s23, 3  ;;  %s5550_s26 = smov [#allocation7]  }
   0xb   : > { %p5622_p4 = por %p7328_p1, %p42_p0  ;;  %s149_s27 = sshll.u32 %s5550_s26, 4  ;;  %s150_s27 = int_to_ptr.vmem [resolvable:$true] %s149_s27 }
   0xc   : > { %p5626_p5 = pnand %p4013_p2, %p137_p3  ;;  %s5551_s29 = smov [#allocation9]  }
   0xd   : > { %s7355_s24 = scalar_select %p5622_p4, 1, 0 }
   0xe   : > { %s7356_s25 = scalar_select %p5626_p5, 1, 0 }
   0xf   : > { %p4472_p6 = pneg %p5626_p5  ;;  %s163_s30 = sshll.u32 %s5551_s29, 4  ;;  %s164_s30 = int_to_ptr.vmem [resolvable:$true] %s163_s30 }
  0x10   : > { %s5552_s6 = smov [#allocation10]   ;;  %s5383_s8 = scalar_lea.vmem %s150_s27, 12288 }
  0x11   : > { %p5634_p7 = pnand %p4472_p6, %p7328_p1  ;;  %s174_s7 = sshll.u32 %s5552_s6, 4  ;;  %s175_s7 = int_to_ptr.vmem [resolvable:$true] %s174_s7 }
  0x12   : > { %p5384_p9 = scmp.ne.s32.totalorder %s150_s27, %s5383_s8  ;;  %p5391_p12 = scmp.lt.s32.totalorder %s150_s27, %s150_s27 }
  0x13   : > { %p5374_p8 = pneg %p5634_p7  ;;  %p5392_p13 = scmp.lt.s32.totalorder %s5383_s8, %s5383_s8 }
  0x15   : > { %p5386_p10 = pnand %p5384_p9, %p5374_p8  ;;  %p5393_p0 = por %p5392_p13, %p5391_p12 }
  0x17   : > { %p5387_p11 = pneg %p5386_p10 }
  0x19   : > { %p5394_p2 = pnand %p5393_p0, %p5387_p11 }
  0x1b   : > { %5397 = shalt.err (!%p5394_p2)
}
  0x1c   : > { %s5553_s9 = smov 128   ;;  %s5554_s10 = smov 8  }
  0x1d   : > { %4475 = dma.hbm_to_vmem [thread:$0]  (!%p5634_p7), %s7324_s2, 12288, %s150_s27, [#allocation8], %s5553_s9, %s5553_s9, %s5554_s10  }
  0x1e   : > { %s5409_s13 = scalar_lea.vmem %s164_s30, 32  ;;  %p5417_p10 = scmp.lt.s32.totalorder %s164_s30, %s164_s30 }
  0x1f   : > { %p5410_p3 = scmp.ne.s32.totalorder %s164_s30, %s5409_s13  ;;  %p5418_p1 = scmp.lt.s32.totalorder %s5409_s13, %s5409_s13 }
  0x21   : > { %p5412_p6 = pnand %p5410_p3, %p5374_p8  ;;  %p5419_p12 = por %p5418_p1, %p5417_p10 }
  0x23   : > { %p5413_p9 = pneg %p5412_p6 }
  0x25   : > { %p5420_p11 = pnand %p5419_p12, %p5413_p9 }
  0x27   : > { %5423 = shalt.err (!%p5420_p11)
}
  0x28   : > { %4478 = dma.hbm_to_vmem [thread:$0]  (!%p5634_p7), %s7325_s3, 32, %s164_s30, [#allocation8]  }
  0x29   : > { %s5435_s16 = scalar_lea.vmem %s175_s7, 16  ;;  %s5442_s17 = scalar_lea.vmem %s175_s7, 32 }
  0x2a   : > { %p5436_p13 = scmp.ne.s32.totalorder %s175_s7, %s5435_s16  ;;  %p5443_p3 = scmp.lt.s32.totalorder %s175_s7, %s175_s7 }
  0x2b   : > { %p5444_p6 = scmp.lt.s32.totalorder %s5442_s17, %s5435_s16 }
  0x2c   : > { %p5438_p0 = pnand %p5436_p13, %p5374_p8 }
  0x2d   : > { %p5445_p1 = por %p5444_p6, %p5443_p3 }
  0x2e   : > { %p5439_p2 = pneg %p5438_p0 }
  0x30   : > { %p5446_p9 = pnand %p5445_p1, %p5439_p2 }
  0x32   : > { %5449 = shalt.err (!%p5446_p9)
}
  0x33   : > { %4481 = dma.hbm_to_vmem [thread:$0]  (!%p5634_p7), %s7326_s4, 16, %s175_s7, [#allocation11]  }
  0x34   : > { %s5665_s20 = sadd.s32 1, %s5548_s23   ;;  %s29_s27 = sadd.s32 1, %s5544_s22 }
  0x35   : > { %s26_s26 = ssub.s32 %s5548_s23, %s5665_s20  ;;  %p36_p10 = scmp.ne.s32.totalorder %s5544_s22, %s5540_s21 }
  0x36   : > { %p27_p8 = scmp.eq.s32.totalorder %s26_s26, 0  ;;  %p37_p12 = scmp.eq.s32.totalorder %s5548_s23, 0 }
  0x37   : > { %p4489_p11 = scmp.lt.s32.totalorder %s5548_s23, 2  ;;  %s185_s29 = sand.u32 1, %s5544_s22  }
  0x38   : > { %s5675_s28 = scalar_select %p27_p8, %s5544_s22, %s29_s27  }
  0x39   : > { %p38_p13 = por %p37_p12, %p36_p10  ;;  %s4451_s30 = smul.u32 1536, %s185_s29 }
  0x3a   : > { %s4452_s6 = smul.u32 24576, %s5548_s23  ;;  %s5690_s13 = scalar_lea.sflag [#allocation5], %s185_s29 }
  0x3b   : > { %p5679_p0 = pnand %p4489_p11, %p38_p13  ;;  %s189_s11 = scalar_lea.vmem [#allocation4], %s4451_s30 }
  0x3c   : > { %s5686_s10 = scalar_lea.hbm %s7323_s1, %s4452_s6  ;;  %s197_s12 = sshll.u32 %s189_s11, 4  ;;  %s5688_s12 = int_to_ptr.vmem [resolvable:$true] %s197_s12 }
  0x3d   : > { %s5450_s23 = scalar_lea.hbm %s5686_s10, 24576  ;;  %p5452_p2 = pneg %p5679_p0 }
  0x3e   : > { %p5451_p7 = scmp.ne.s32.totalorder %s5686_s10, %s5450_s23  ;;  %s5455_s16 = scalar_lea.hbm %s7323_s1, 49152 }
  0x3f   : > { %p5456_p1 = scmp.lt.s32.totalorder %s5686_s10, %s7323_s1  ;;  %p5457_p9 = scmp.lt.s32.totalorder %s5455_s16, %s5450_s23 }
  0x40   : > { %p5453_p3 = pnand %p5452_p2, %p5451_p7 }
  0x41   : > { %p5458_p8 = por %p5457_p9, %p5456_p1 }
  0x42   : > { %p5454_p6 = pneg %p5453_p3 }
  0x44   : > { %p5459_p10 = pnand %p5458_p8, %p5454_p6 }
  0x46   : > { %5462 = shalt.err (!%p5459_p10)
}
  0x47   : > { %s5463_s19 = scalar_lea.vmem %s5688_s12, 24576  ;;  %s5555_s26 = smov [#allocation4]  }
  0x48   : > { %p5464_p12 = scmp.ne.s32.totalorder %s5688_s12, %s5463_s19  ;;  %s5468_s27 = sshll.u32 %s5555_s26, 4  ;;  %s5469_s27 = int_to_ptr.vmem [resolvable:$false] %s5468_s27 }
  0x49   : > { %s5470_s29 = scalar_lea.vmem %s5469_s27, 49152  ;;  %p5471_p7 = scmp.lt.s32.totalorder %s5688_s12, %s5469_s27 }
  0x4a   : > { %p5466_p11 = pnand %p5464_p12, %p5452_p2  ;;  %p5472_p3 = scmp.lt.s32.totalorder %s5470_s29, %s5463_s19 }
  0x4c   : > { %p5467_p13 = pneg %p5466_p11  ;;  %p5473_p4 = por %p5472_p3, %p5471_p7 }
  0x4e   : > { %p5474_p5 = pnand %p5473_p4, %p5467_p13 }
  0x50   : > { %5477 = shalt.err (!%p5474_p5)
}
  0x51   : > { %s5556_s30 = smov 384   ;;  %s5557_s6 = smov 24  }
  0x52   : > { %4485 = dma.hbm_to_vmem [thread:$0]  (!%p5679_p0), %s5686_s10, 24576, %s5688_s12, %s5690_s13, %s5556_s30, %s5556_s30, %s5557_s6  }
  0x53   : > { %p7359_p2 = scmp.ne.s32.totalorder %s7356_s25, 0 }
  0x55   : > { %209 = sbr.rel (%p7359_p2) target bundleno = 1464 (0x5b8), region = 36 }
  0x5a   : > { %s211_s7 = sand.u32 1, %s5540_s21   ;;  %p7360_p4 = scmp.ne.s32.totalorder %s7355_s24, 0 }
  0x5b   : > { %s4453_s9 = smul.u32 1536, %s211_s7  ;;  %s212_s11 = scalar_lea.sflag [#allocation5], %s211_s7 }
  0x5d   : > { %s5714_s23 = scalar_lea.vmem [#allocation4], %s4453_s9 }
  0x5e   : > { %5519 = dma.done.wait (%p7360_p4), %s212_s11, 24576  }
  0x5f   : > { %5521 = vsyncadd (%p7360_p4), %s212_s11, 4294942720  ;;  %p7361_p5 = scmp.eq.s32.totalorder %s5614_s0, 0 }
  0x61   : > { %5523 = dma.done.wait (%p7361_p5), [#allocation8], 12320   ;;  %p7362_p0 = pmov %p7361_p5 }
  0x63   : > { %5525 = vsyncadd (%p7362_p0), [#allocation8], 4294954976  ;;  %p7363_p6 = pmov %p7362_p0 }
  0x64   : > { %p7364_p1 = pmov %p7362_p0 }
  0x65   : > { %5527 = dma.done.wait (%p7363_p6), [#allocation11], 16  }
  0x66   : > { %5529 = vsyncadd (%p7364_p1), [#allocation11], 4294967280  ;;  %v4538_v0 = vld [vmem:[#allocation7 + $0x74] ss:$8 sps:$4 sm:$0xff]   ;;  %v4540_v1 = vld [vmem:[#allocation7 + $0x70] ss:$8 sps:$4 sm:$0xff]  }
  0x67   : > { %1989 = vmatprep.subr.bf16.mxu0 %v4538_v0  ;;  %4419 = vmatprep.subr.bf16.mxu1 %v4538_v0  ;;  %v4541_v2 = vld [vmem:[#allocation7 + $0x64] ss:$8 sps:$4 sm:$0xff]   ;;  %v4543_v3 = vld [vmem:[#allocation7 + $0x60] ss:$8 sps:$4 sm:$0xff]   ;;  %v4544_v4 = vld [vmem:[#allocation7 + $0x54] ss:$8 sps:$4 sm:$0xff]  }
  0x68   : > { %1990 = vmatpush1.bf16.msra.mxu0 %v4540_v1  ;;  %4435 = vmatpush1.bf16.msra.mxu1 %v4540_v1  ;;  %v4546_v5 = vld [vmem:[#allocation7 + $0x50] ss:$8 sps:$4 sm:$0xff]   ;;  %v4547_v6 = vld [vmem:[#allocation7 + $0x44] ss:$8 sps:$4 sm:$0xff]   ;;  %v4549_v7 = vld [vmem:[#allocation7 + $0x40] ss:$8 sps:$4 sm:$0xff]  }
  0x69   : > { %1991 = vmatprep.subr.bf16.mxu0 %v4541_v2  ;;  %4420 = vmatprep.subr.bf16.mxu1 %v4541_v2  ;;  %v4550_v8 = vld [vmem:[#allocation7 + $0x34] ss:$8 sps:$4 sm:$0xff]   ;;  %v4552_v9 = vld [vmem:[#allocation7 + $0x30] ss:$8 sps:$4 sm:$0xff]   ;;  %v4553_v10 = vld [vmem:[#allocation7 + $0x24] ss:$8 sps:$4 sm:$0xff]  }
  0x6a   : > { %v4555_v11 = vld [vmem:[#allocation7 + $0x20] ss:$8 sps:$4 sm:$0xff]   ;;  %v4556_v12 = vld [vmem:[#allocation7 + $0x14] ss:$8 sps:$4 sm:$0xff]   ;;  %v4558_v14 = vld [vmem:[#allocation7 + $0x10] ss:$8 sps:$4 sm:$0xff]  }
  0x6b   : > { %v4588_v13 = vld [vmem:[%s5714_s23 + $0x4] ss:$24 sps:$4 sm:$0xff]   ;;  %v4591_v15 = vld [vmem:[%s5714_s23 + $0x3f4] ss:$24 sps:$4 sm:$0xff]   ;;  %v4561_v17 = vld [vmem:[#allocation7] ss:$8 sps:$4 sm:$0xff]  }
  0x6c   : > { %1992 = vmatpush1.bf16.msra.mxu0 %v4543_v3  ;;  %4436 = vmatpush1.bf16.msra.mxu1 %v4543_v3  ;;  %v4559_v16 = vld [vmem:[#allocation7 + $0x4] ss:$8 sps:$4 sm:$0xff]   ;;  %v4562_v18 = vld [vmem:[#allocation7 + $0xf4] ss:$8 sps:$4 sm:$0xff]   ;;  %v4564_v19 = vld [vmem:[#allocation7 + $0xf0] ss:$8 sps:$4 sm:$0xff]  }
  0x6d   : > { %1993 = vmatprep.subr.bf16.mxu0 %v4544_v4  ;;  %4421 = vmatprep.subr.bf16.mxu1 %v4544_v4  ;;  %v4565_v20 = vld [vmem:[#allocation7 + $0xe4] ss:$8 sps:$4 sm:$0xff]   ;;  %v4567_v21 = vld [vmem:[#allocation7 + $0xe0] ss:$8 sps:$4 sm:$0xff]   ;;  %v4568_v22 = vld [vmem:[#allocation7 + $0xd4] ss:$8 sps:$4 sm:$0xff]  }
  0x6e   : > { %2021 = vmatprep.mubr.bf16.mxu0 %v4588_v13  ;;  %2231 = vmatprep.mubr.bf16.mxu1 %v4591_v15  ;;  %v4570_v23 = vld [vmem:[#allocation7 + $0xd0] ss:$8 sps:$4 sm:$0xff]   ;;  %v4571_v24 = vld [vmem:[#allocation7 + $0xc4] ss:$8 sps:$4 sm:$0xff]   ;;  %v4573_v25 = vld [vmem:[#allocation7 + $0xc0] ss:$8 sps:$4 sm:$0xff]  }
  0x6f   : > { %v4574_v26 = vld [vmem:[#allocation7 + $0xb4] ss:$8 sps:$4 sm:$0xff]   ;;  %v4576_v27 = vld [vmem:[#allocation7 + $0xb0] ss:$8 sps:$4 sm:$0xff]   ;;  %v4577_v28 = vld [vmem:[#allocation7 + $0xa4] ss:$8 sps:$4 sm:$0xff]  }
  0x70   : > { %1994 = vmatpush1.bf16.msra.mxu0 %v4546_v5  ;;  %4437 = vmatpush1.bf16.msra.mxu1 %v4546_v5  ;;  %v4579_v29 = vld [vmem:[#allocation7 + $0xa0] ss:$8 sps:$4 sm:$0xff]   ;;  %v4580_v30 = vld [vmem:[#allocation7 + $0x94] ss:$8 sps:$4 sm:$0xff]   ;;  %v4582_v31 = vld [vmem:[#allocation7 + $0x90] ss:$8 sps:$4 sm:$0xff]  }
  0x71   : > { %1995 = vmatprep.subr.bf16.mxu0 %v4547_v6  ;;  %4422 = vmatprep.subr.bf16.mxu1 %v4547_v6  ;;  %v4583_v32 = vld [vmem:[#allocation7 + $0x84] ss:$8 sps:$4 sm:$0xff]   ;;  %v4585_v33 = vld [vmem:[#allocation7 + $0x80] ss:$8 sps:$4 sm:$0xff]   ;;  %v4612_v34 = vld [vmem:[#allocation7 + $0x174] ss:$8 sps:$4 sm:$0xff]  }
  0x72   : > { %v4586_v35 = vld [vmem:[%s5714_s23] ss:$24 sps:$4 sm:$0xff]   ;;  %v4589_v36 = vld [vmem:[%s5714_s23 + $0x3f0] ss:$24 sps:$4 sm:$0xff]   ;;  %v4592_v37 = vld [vmem:[%s5714_s23 + $0x34] ss:$24 sps:$4 sm:$0xff]  }
  0x73   : > { %v4594_v38 = vld [vmem:[%s5714_s23 + $0x424] ss:$24 sps:$4 sm:$0xff]   ;;  %v4610_v39 = vld [vmem:[#allocation7 + $0x170] ss:$8 sps:$4 sm:$0xff]   ;;  %v4613_v41 = vld [vmem:[#allocation7 + $0x160] ss:$8 sps:$4 sm:$0xff]  }
  0x74   : > { %1996 = vmatpush1.bf16.msra.mxu0 %v4549_v7  ;;  %4438 = vmatpush1.bf16.msra.mxu1 %v4549_v7  ;;  %v4615_v40 = vld [vmem:[#allocation7 + $0x164] ss:$8 sps:$4 sm:$0xff]   ;;  %v4624_v42 = vld [vmem:[#allocation7 + $0x154] ss:$8 sps:$4 sm:$0xff]   ;;  %v4596_v43 = vld [vmem:[%s5714_s23 + $0x30] ss:$24 sps:$4 sm:$0xff]  }
  0x75   : > { %1997 = vmatprep.subr.bf16.mxu0 %v4550_v8  ;;  %4423 = vmatprep.subr.bf16.mxu1 %v4550_v8  ;;  %v4597_v44 = vld [vmem:[%s5714_s23 + $0x420] ss:$24 sps:$4 sm:$0xff]   ;;  %v4598_v45 = vld [vmem:[%s5714_s23 + $0x64] ss:$24 sps:$4 sm:$0xff]   ;;  %v4600_v46 = vld [vmem:[%s5714_s23 + $0x454] ss:$24 sps:$4 sm:$0xff]  }
  0x76   : > { %v4622_v47 = vld [vmem:[#allocation7 + $0x150] ss:$8 sps:$4 sm:$0xff]   ;;  %v4627_v48 = vld [vmem:[#allocation7 + $0x144] ss:$8 sps:$4 sm:$0xff]   ;;  %v4625_v51 = vld [vmem:[#allocation7 + $0x140] ss:$8 sps:$4 sm:$0xff]  }
  0x77   : > { %v4602_v49 = vld [vmem:[%s5714_s23 + $0x60] ss:$24 sps:$4 sm:$0xff]   ;;  %v4603_v50 = vld [vmem:[%s5714_s23 + $0x450] ss:$24 sps:$4 sm:$0xff]   ;;  %v4636_v52 = vld [vmem:[#allocation7 + $0x134] ss:$8 sps:$4 sm:$0xff]  }
  0x78   : > { %1998 = vmatpush1.bf16.msra.mxu0 %v4552_v9  ;;  %4439 = vmatpush1.bf16.msra.mxu1 %v4552_v9  ;;  %v4604_v53 = vld [vmem:[%s5714_s23 + $0x94] ss:$24 sps:$4 sm:$0xff]   ;;  %v4606_v54 = vld [vmem:[%s5714_s23 + $0x484] ss:$24 sps:$4 sm:$0xff]   ;;  %v4634_v55 = vld [vmem:[#allocation7 + $0x130] ss:$8 sps:$4 sm:$0xff]  }
  0x79   : > { %1999 = vmatprep.subr.bf16.mxu0 %v4553_v10  ;;  %4424 = vmatprep.subr.bf16.mxu1 %v4553_v10  ;;  %v4639_v56 = vld [vmem:[#allocation7 + $0x124] ss:$8 sps:$4 sm:$0xff]   ;;  %v4718_v57 = vld [vmem:[#allocation7 + $0x270] ss:$8 sps:$4 sm:$0xff]   ;;  %v4720_v58 = vld [vmem:[#allocation7 + $0x274] ss:$8 sps:$4 sm:$0xff]  }
  0x7a   : > { %v4723_v59 = vld [vmem:[#allocation7 + $0x264] ss:$8 sps:$4 sm:$0xff]   ;;  %v4608_v60 = vld [vmem:[%s5714_s23 + $0x90] ss:$24 sps:$4 sm:$0xff]   ;;  %v4609_v61 = vld [vmem:[%s5714_s23 + $0x480] ss:$24 sps:$4 sm:$0xff]  }
  0x7b   : > { %v4637_v62 = vld [vmem:[#allocation7 + $0x120] ss:$8 sps:$4 sm:$0xff]   ;;  %v4648_v63 = vld [vmem:[#allocation7 + $0x114] ss:$8 sps:$4 sm:$0xff]   ;;  %v4646_v3 = vld [vmem:[#allocation7 + $0x110] ss:$8 sps:$4 sm:$0xff]  }
  0x7c   : > { %2000 = vmatpush1.bf16.msra.mxu0 %v4555_v11  ;;  %4440 = vmatpush1.bf16.msra.mxu1 %v4555_v11  ;;  %v4721_v0 = vld [vmem:[#allocation7 + $0x260] ss:$8 sps:$4 sm:$0xff]   ;;  %v4616_v1 = vld [vmem:[%s5714_s23 + $0xc4] ss:$24 sps:$4 sm:$0xff]   ;;  %v4618_v2 = vld [vmem:[%s5714_s23 + $0x4b4] ss:$24 sps:$4 sm:$0xff]  }
  0x7d   : > { %2001 = vmatprep.subr.bf16.mxu0 %v4556_v12  ;;  %4425 = vmatprep.subr.bf16.mxu1 %v4556_v12  ;;  %v4651_v4 = vld [vmem:[#allocation7 + $0x104] ss:$8 sps:$4 sm:$0xff]   ;;  %v4732_v5 = vld [vmem:[#allocation7 + $0x254] ss:$8 sps:$4 sm:$0xff]   ;;  %v4730_v6 = vld [vmem:[#allocation7 + $0x250] ss:$8 sps:$4 sm:$0xff]  }
  0x7e   : > { %v4735_v7 = vld [vmem:[#allocation7 + $0x244] ss:$8 sps:$4 sm:$0xff]   ;;  %v4649_v8 = vld [vmem:[#allocation7 + $0x100] ss:$8 sps:$4 sm:$0xff]   ;;  %v4660_v11 = vld [vmem:[#allocation7 + $0x1f4] ss:$8 sps:$4 sm:$0xff]  }
  0x7f   : > { %v4620_v9 = vld [vmem:[%s5714_s23 + $0xc0] ss:$24 sps:$4 sm:$0xff]   ;;  %v4621_v10 = vld [vmem:[%s5714_s23 + $0x4b0] ss:$24 sps:$4 sm:$0xff]   ;;  %v4628_v13 = vld [vmem:[%s5714_s23 + $0xf4] ss:$24 sps:$4 sm:$0xff]  }
  0x80   : > { %2002 = vmatpush1.bf16.msra.mxu0 %v4558_v14  ;;  %4441 = vmatpush1.bf16.msra.mxu1 %v4558_v14  ;;  %v4733_v12 = vld [vmem:[#allocation7 + $0x240] ss:$8 sps:$4 sm:$0xff]   ;;  %v4630_v14 = vld [vmem:[%s5714_s23 + $0x4e4] ss:$24 sps:$4 sm:$0xff]   ;;  %v4658_v15 = vld [vmem:[#allocation7 + $0x1f0] ss:$8 sps:$4 sm:$0xff]  }
  0x81   : > { %2003 = vmatprep.subr.bf16.mxu0 %v4559_v16  ;;  %4426 = vmatprep.subr.bf16.mxu1 %v4559_v16  ;;  %v4663_v16 = vld [vmem:[#allocation7 + $0x1e4] ss:$8 sps:$4 sm:$0xff]   ;;  %s4377_s24 = sshll.u32 %s5614_s0, 2  ;;  %p4378_p9 = scmp.ne.s32.totalorder %s5614_s0, 1 }
  0x82   : > { %s3705_s25 = scalar_lea.vmem [#allocation12], %s4377_s24  ;;  %s3726_s8 = sld [smem:[#allocation3]] (!%p4378_p9) }
  0x84   : > { %2004 = vmatpush1.bf16.msra.mxu0 %v4561_v17  ;;  %4442 = vmatpush1.bf16.msra.mxu1 %v4561_v17  ;;  %v4744_v17 = vld [vmem:[#allocation7 + $0x234] ss:$8 sps:$4 sm:$0xff]  }
  0x85   : > { %2005 = vmatprep.subr.bf16.mxu0 %v4562_v18  ;;  %4427 = vmatprep.subr.bf16.mxu1 %v4562_v18  ;;  %v4742_v18 = vld [vmem:[#allocation7 + $0x230] ss:$8 sps:$4 sm:$0xff]  }
  0x88   : > { %2006 = vmatpush2.bf16.msra.mxu0 %v4564_v19  ;;  %4443 = vmatpush2.bf16.msra.mxu1 %v4564_v19  ;;  %v4747_v19 = vld [vmem:[#allocation7 + $0x224] ss:$8 sps:$4 sm:$0xff]  }
  0x89   : > { %2007 = vmatprep.subr.bf16.mxu0 %v4565_v20  ;;  %4428 = vmatprep.subr.bf16.mxu1 %v4565_v20  ;;  %v4632_v20 = vld [vmem:[%s5714_s23 + $0xf0] ss:$24 sps:$4 sm:$0xff]  }
  0x8c   : > { %2008 = vmatpush2.bf16.msra.mxu0 %v4567_v21  ;;  %4444 = vmatpush2.bf16.msra.mxu1 %v4567_v21  ;;  %v4633_v21 = vld [vmem:[%s5714_s23 + $0x4e0] ss:$24 sps:$4 sm:$0xff]  }
  0x8d   : > { %2009 = vmatprep.subr.bf16.mxu0 %v4568_v22  ;;  %4429 = vmatprep.subr.bf16.mxu1 %v4568_v22  ;;  %v4661_v22 = vld [vmem:[#allocation7 + $0x1e0] ss:$8 sps:$4 sm:$0xff]  }
  0x90   : > { %2010 = vmatpush2.bf16.msra.mxu0 %v4570_v23  ;;  %4445 = vmatpush2.bf16.msra.mxu1 %v4570_v23  ;;  %v4672_v23 = vld [vmem:[#allocation7 + $0x1d4] ss:$8 sps:$4 sm:$0xff]  }
  0x91   : > { %2011 = vmatprep.subr.bf16.mxu0 %v4571_v24  ;;  %4430 = vmatprep.subr.bf16.mxu1 %v4571_v24  ;;  %v4745_v24 = vld [vmem:[#allocation7 + $0x220] ss:$8 sps:$4 sm:$0xff]  }
  0x94   : > { %2012 = vmatpush2.bf16.msra.mxu0 %v4573_v25  ;;  %4446 = vmatpush2.bf16.msra.mxu1 %v4573_v25  ;;  %v4640_v25 = vld [vmem:[%s5714_s23 + $0x124] ss:$24 sps:$4 sm:$0xff]  }
  0x95   : > { %2013 = vmatprep.subr.bf16.mxu0 %v4574_v26  ;;  %4431 = vmatprep.subr.bf16.mxu1 %v4574_v26  ;;  %v4642_v26 = vld [vmem:[%s5714_s23 + $0x514] ss:$24 sps:$4 sm:$0xff]  }
  0x98   : > { %2014 = vmatpush2.bf16.msra.mxu0 %v4576_v27  ;;  %4447 = vmatpush2.bf16.msra.mxu1 %v4576_v27  ;;  %v4670_v27 = vld [vmem:[#allocation7 + $0x1d0] ss:$8 sps:$4 sm:$0xff]  }
  0x99   : > { %2015 = vmatprep.subr.bf16.mxu0 %v4577_v28  ;;  %4432 = vmatprep.subr.bf16.mxu1 %v4577_v28  ;;  %v4675_v28 = vld [vmem:[#allocation7 + $0x1c4] ss:$8 sps:$4 sm:$0xff]  }
  0x9c   : > { %2016 = vmatpush2.bf16.msra.mxu0 %v4579_v29  ;;  %4448 = vmatpush2.bf16.msra.mxu1 %v4579_v29  ;;  %v4756_v29 = vld [vmem:[#allocation7 + $0x214] ss:$8 sps:$4 sm:$0xff]  }
  0x9d   : > { %2017 = vmatprep.subr.bf16.mxu0 %v4580_v30  ;;  %4433 = vmatprep.subr.bf16.mxu1 %v4580_v30  ;;  %v4754_v30 = vld [vmem:[#allocation7 + $0x210] ss:$8 sps:$4 sm:$0xff]  }
  0xa0   : > { %2018 = vmatpush2.bf16.msra.mxu0 %v4582_v31  ;;  %4449 = vmatpush2.bf16.msra.mxu1 %v4582_v31  ;;  %v4759_v31 = vld [vmem:[#allocation7 + $0x204] ss:$8 sps:$4 sm:$0xff]  }
  0xa1   : > { %2019 = vmatprep.subr.bf16.mxu0 %v4583_v32  ;;  %4434 = vmatprep.subr.bf16.mxu1 %v4583_v32  ;;  %v4673_v32 = vld [vmem:[#allocation7 + $0x1c0] ss:$8 sps:$4 sm:$0xff]  }
  0xa4   : > { %2020 = vmatpush2.bf16.msra.mxu0 %v4585_v33  ;;  %4450 = vmatpush2.bf16.msra.mxu1 %v4585_v33  ;;  %v4644_v33 = vld [vmem:[%s5714_s23 + $0x120] ss:$24 sps:$4 sm:$0xff]  }
  0xa5   : > { %2342 = vmatprep.subr.bf16.mxu1 %v4612_v34  ;;  %2695 = vmatprep.subr.bf16.mxu0 %v4720_v58  ;;  %v4645_v34 = vld [vmem:[%s5714_s23 + $0x510] ss:$24 sps:$4 sm:$0xff]  }
  0xa6   : > { %v4781_v58 = vld [vmem:[#allocation7 + $0x2c0] ss:$8 sps:$4 sm:$0xff]  }
  0xa7   : > { %2022 = vmatmul.mubr.bf16.vlgmr.msra.gmra.mxu0 %v4586_v35  ;;  %2232 = vmatmul.mubr.bf16.vlgmr.msra.gmra.mxu1 %v4589_v36  ;;  %v4684_v35 = vld [vmem:[#allocation7 + $0x1b4] ss:$8 sps:$4 sm:$0xff]   ;;  %v4757_v36 = vld [vmem:[#allocation7 + $0x200] ss:$8 sps:$4 sm:$0xff]  }
  0xa8   : > { %2031 = vmatprep.mubr.bf16.mxu0 %v4592_v37  ;;  %2241 = vmatprep.mubr.bf16.mxu1 %v4594_v38  ;;  %v4652_v37 = vld [vmem:[%s5714_s23 + $0x154] ss:$24 sps:$4 sm:$0xff]   ;;  %v4654_v38 = vld [vmem:[%s5714_s23 + $0x544] ss:$24 sps:$4 sm:$0xff]  }
  0xa9   : > { %2343 = vmatpush1.bf16.msra.mxu1 %v4610_v39  ;;  %2696 = vmatpush1.bf16.msra.mxu0 %v4718_v57  ;;  %v4682_v39 = vld [vmem:[#allocation7 + $0x1b0] ss:$8 sps:$4 sm:$0xff]   ;;  %v4697_v57 = vld [vmem:[#allocation7 + $0x180] ss:$8 sps:$4 sm:$0xff]  }
  0xaa   : > { %2344 = vmatprep.subr.bf16.mxu1 %v4615_v40  ;;  %2697 = vmatprep.subr.bf16.mxu0 %v4723_v59  ;;  %v4687_v40 = vld [vmem:[#allocation7 + $0x1a4] ss:$8 sps:$4 sm:$0xff]   ;;  %v4669_v59 = vld [vmem:[%s5714_s23 + $0x570] ss:$24 sps:$4 sm:$0xff]  }
  0xad   : > { %2345 = vmatpush1.bf16.msra.mxu1 %v4613_v41  ;;  %2698 = vmatpush1.bf16.msra.mxu0 %v4721_v0  ;;  %v4768_v41 = vld [vmem:[#allocation7 + $0x2f4] ss:$8 sps:$4 sm:$0xff]   ;;  %v4795_v0 = vld [vmem:[#allocation7 + $0x2a4] ss:$8 sps:$4 sm:$0xff]  }
  0xae   : > { %2346 = vmatprep.subr.bf16.mxu1 %v4624_v42  ;;  %2699 = vmatprep.subr.bf16.mxu0 %v4732_v5  ;;  %v4766_v42 = vld [vmem:[#allocation7 + $0x2f0] ss:$8 sps:$4 sm:$0xff]   ;;  %v4690_v5 = vld [vmem:[%s5714_s23 + $0x5d4] ss:$24 sps:$4 sm:$0xff]  }
  0xaf   : > { %2032 = vmatmul.mubr.bf16.gmra.mxu0 %v4596_v43  ;;  %2242 = vmatmul.mubr.bf16.gmra.mxu1 %v4597_v44  ;;  %v4771_v43 = vld [vmem:[#allocation7 + $0x2e4] ss:$8 sps:$4 sm:$0xff]   ;;  %v4656_v44 = vld [vmem:[%s5714_s23 + $0x150] ss:$24 sps:$4 sm:$0xff]  }
  0xb0   : > { %2041 = vmatprep.mubr.bf16.mxu0 %v4598_v45  ;;  %2251 = vmatprep.mubr.bf16.mxu1 %v4600_v46  ;;  %v4657_v45 = vld [vmem:[%s5714_s23 + $0x540] ss:$24 sps:$4 sm:$0xff]  }
  0xb1   : > { %2347 = vmatpush1.bf16.msra.mxu1 %v4622_v47  ;;  %2700 = vmatpush1.bf16.msra.mxu0 %v4730_v6  ;;  %v4685_v46 = vld [vmem:[#allocation7 + $0x1a0] ss:$8 sps:$4 sm:$0xff]   ;;  %v4696_v47 = vld [vmem:[#allocation7 + $0x194] ss:$8 sps:$4 sm:$0xff]   ;;  %v4802_v6 = vld [vmem:[#allocation7 + $0x290] ss:$8 sps:$4 sm:$0xff]  }
  0xb2   : > { %2348 = vmatprep.subr.bf16.mxu1 %v4627_v48  ;;  %2701 = vmatprep.subr.bf16.mxu0 %v4735_v7  ;;  %v4769_v48 = vld [vmem:[#allocation7 + $0x2e0] ss:$8 sps:$4 sm:$0xff]   ;;  %v4804_v7 = vld [vmem:[#allocation7 + $0x294] ss:$8 sps:$4 sm:$0xff]  }
  0xb5   : > { %2349 = vmatpush1.bf16.msra.mxu1 %v4625_v51  ;;  %2702 = vmatpush1.bf16.msra.mxu0 %v4733_v12  ;;  %v4694_v51 = vld [vmem:[#allocation7 + $0x190] ss:$8 sps:$4 sm:$0xff]   ;;  %v4700_v12 = vld [vmem:[%s5714_s23 + $0x214] ss:$24 sps:$4 sm:$0xff]  }
  0xb6   : > { %2350 = vmatprep.subr.bf16.mxu1 %v4636_v52  ;;  %2703 = vmatprep.subr.bf16.mxu0 %v4744_v17  ;;  %v4699_v52 = vld [vmem:[#allocation7 + $0x184] ss:$8 sps:$4 sm:$0xff]   ;;  %v4708_v17 = vld [vmem:[%s5714_s23 + $0x3c] ss:$24 sps:$4 sm:$0xff]  }
  0xb7   : > { %2042 = vmatmul.mubr.bf16.gmra.mxu0 %v4602_v49  ;;  %2252 = vmatmul.mubr.bf16.gmra.mxu1 %v4603_v50  ;;  %v4664_v49 = vld [vmem:[%s5714_s23 + $0x184] ss:$24 sps:$4 sm:$0xff]   ;;  %v4666_v50 = vld [vmem:[%s5714_s23 + $0x574] ss:$24 sps:$4 sm:$0xff]  }
  0xb8   : > { %2051 = vmatprep.mubr.bf16.mxu0 %v4604_v53  ;;  %2261 = vmatprep.mubr.bf16.mxu1 %v4606_v54  ;;  %v4780_v53 = vld [vmem:[#allocation7 + $0x2d4] ss:$8 sps:$4 sm:$0xff]   ;;  %v4778_v54 = vld [vmem:[#allocation7 + $0x2d0] ss:$8 sps:$4 sm:$0xff]  }
  0xb9   : > { %2351 = vmatpush1.bf16.msra.mxu1 %v4634_v55  ;;  %2704 = vmatpush1.bf16.msra.mxu0 %v4742_v18  ;;  %v4783_v55 = vld [vmem:[#allocation7 + $0x2c4] ss:$8 sps:$4 sm:$0xff]   ;;  %v4710_v18 = vld [vmem:[%s5714_s23 + $0x240] ss:$24 sps:$4 sm:$0xff]  }
  0xba   : > { %2352 = vmatprep.subr.bf16.mxu1 %v4639_v56  ;;  %2705 = vmatprep.subr.bf16.mxu0 %v4747_v19  ;;  %v4668_v56 = vld [vmem:[%s5714_s23 + $0x180] ss:$24 sps:$4 sm:$0xff]  }
  0xbb   : > { %v4711_v19 = vld [vmem:[%s5714_s23 + $0x38] ss:$24 sps:$4 sm:$0xff]  }
  0xbd   : > { %2353 = vmatpush1.bf16.msra.mxu1 %v4637_v62  ;;  %2706 = vmatpush1.bf16.msra.mxu0 %v4745_v24  ;;  %v4792_v62 = vld [vmem:[#allocation7 + $0x2b4] ss:$8 sps:$4 sm:$0xff]  }
  0xbe   : > { %2354 = vmatprep.subr.bf16.mxu1 %v4648_v63  ;;  %2707 = vmatprep.subr.bf16.mxu0 %v4756_v29  ;;  %v4790_v63 = vld [vmem:[#allocation7 + $0x2b0] ss:$8 sps:$4 sm:$0xff]   ;;  %v4724_v24 = vld [vmem:[%s5714_s23 + $0x2a4] ss:$24 sps:$4 sm:$0xff]  }
  0xbf   : > { %2052 = vmatmul.mubr.bf16.gmra.mxu0 %v4608_v60  ;;  %2262 = vmatmul.mubr.bf16.gmra.mxu1 %v4609_v61  ;;  %v4676_v60 = vld [vmem:[%s5714_s23 + $0x1b4] ss:$24 sps:$4 sm:$0xff]   ;;  %v4678_v61 = vld [vmem:[%s5714_s23 + $0x5a4] ss:$24 sps:$4 sm:$0xff]  }
  0xc0   : > { %2061 = vmatprep.mubr.bf16.mxu0 %v4616_v1  ;;  %2271 = vmatprep.mubr.bf16.mxu1 %v4618_v2  ;;  %v4793_v1 = vld [vmem:[#allocation7 + $0x2a0] ss:$8 sps:$4 sm:$0xff]   ;;  %v4738_v29 = vld [vmem:[%s5714_s23 + $0xcc] ss:$24 sps:$4 sm:$0xff]  }
  0xc1   : > { %2355 = vmatpush1.bf16.msra.mxu1 %v4646_v3  ;;  %2708 = vmatpush1.bf16.msra.mxu0 %v4754_v30  ;;  %v4680_v2 = vld [vmem:[%s5714_s23 + $0x1b0] ss:$24 sps:$4 sm:$0xff]   ;;  %v4681_v3 = vld [vmem:[%s5714_s23 + $0x5a0] ss:$24 sps:$4 sm:$0xff]  }
  0xc2   : > { %2356 = vmatprep.subr.bf16.mxu1 %v4651_v4  ;;  %2709 = vmatprep.subr.bf16.mxu0 %v4759_v31  ;;  %v4688_v4 = vld [vmem:[%s5714_s23 + $0x1e4] ss:$24 sps:$4 sm:$0xff]   ;;  %v4740_v30 = vld [vmem:[%s5714_s23 + $0x2d0] ss:$24 sps:$4 sm:$0xff]  }
  0xc3   : > { %v4741_v31 = vld [vmem:[%s5714_s23 + $0xc8] ss:$24 sps:$4 sm:$0xff]  }
  0xc5   : > { %2357 = vmatpush1.bf16.msra.mxu1 %v4649_v8  ;;  %2710 = vmatpush1.bf16.msra.mxu0 %v4757_v36  ;;  %v4807_v8 = vld [vmem:[#allocation7 + $0x284] ss:$8 sps:$4 sm:$0xff]  }
  0xc6   : > { %2358 = vmatprep.subr.bf16.mxu1 %v4660_v11  ;;  %2711 = vmatprep.subr.bf16.mxu0 %v4768_v41  ;;  %v4693_v11 = vld [vmem:[%s5714_s23 + $0x5d0] ss:$24 sps:$4 sm:$0xff]   ;;  %v4760_v36 = vld [vmem:[%s5714_s23 + $0x334] ss:$24 sps:$4 sm:$0xff]  }
  0xc7   : > { %2062 = vmatmul.mubr.bf16.gmra.mxu0 %v4620_v9  ;;  %2272 = vmatmul.mubr.bf16.gmra.mxu1 %v4621_v10  ;;  %v4805_v9 = vld [vmem:[#allocation7 + $0x280] ss:$8 sps:$4 sm:$0xff]   ;;  %v4774_v41 = vld [vmem:[%s5714_s23 + $0x15c] ss:$24 sps:$4 sm:$0xff]  }
  0xc8   : > { %2071 = vmatprep.mubr.bf16.mxu0 %v4628_v13  ;;  %2281 = vmatprep.mubr.bf16.mxu1 %v4630_v14  ;;  %v4692_v10 = vld [vmem:[%s5714_s23 + $0x1e0] ss:$24 sps:$4 sm:$0xff]   ;;  %v4704_v13 = vld [vmem:[%s5714_s23 + $0xc] ss:$24 sps:$4 sm:$0xff]  }
  0xc9   : > { %2359 = vmatpush2.bf16.msra.mxu1 %v4658_v15  ;;  %2712 = vmatpush2.bf16.msra.mxu0 %v4766_v42  ;;  %v4702_v14 = vld [vmem:[%s5714_s23 + $0x8] ss:$24 sps:$4 sm:$0xff]  }
  0xca   : > { %2360 = vmatprep.subr.bf16.mxu1 %v4663_v16  ;;  %2713 = vmatprep.subr.bf16.mxu0 %v4771_v43  ;;  %v4705_v15 = vld [vmem:[%s5714_s23 + $0x210] ss:$24 sps:$4 sm:$0xff]   ;;  %v4706_v16 = vld [vmem:[%s5714_s23 + $0x244] ss:$24 sps:$4 sm:$0xff]   ;;  %v4776_v42 = vld [vmem:[%s5714_s23 + $0x360] ss:$24 sps:$4 sm:$0xff]  }
  0xcb   : > { %v4777_v43 = vld [vmem:[%s5714_s23 + $0x158] ss:$24 sps:$4 sm:$0xff]  }
  0xcd   : > { %2361 = vmatpush2.bf16.msra.mxu1 %v4661_v22  ;;  %2714 = vmatpush2.bf16.msra.mxu0 %v4769_v48  ;;  %v4716_v22 = vld [vmem:[%s5714_s23 + $0x270] ss:$24 sps:$4 sm:$0xff]   ;;  %v4796_v48 = vld [vmem:[%s5714_s23 + $0x3c4] ss:$24 sps:$4 sm:$0xff]  }
  0xce   : > { %2362 = vmatprep.subr.bf16.mxu1 %v4672_v23  ;;  %2715 = vmatprep.subr.bf16.mxu0 %v4780_v53  ;;  %v4717_v23 = vld [vmem:[%s5714_s23 + $0x68] ss:$24 sps:$4 sm:$0xff]   ;;  %v4812_v53 = vld [vmem:[%s5714_s23 + $0x14] ss:$24 sps:$4 sm:$0xff]  }
  0xcf   : > { %2072 = vmatmul.mubr.bf16.gmra.mxu0 %v4632_v20  ;;  %2282 = vmatmul.mubr.bf16.gmra.mxu1 %v4633_v21  ;;  %v4712_v20 = vld [vmem:[%s5714_s23 + $0x274] ss:$24 sps:$4 sm:$0xff]  }
  0xd0   : > { %2081 = vmatprep.mubr.bf16.mxu0 %v4640_v25  ;;  %2291 = vmatprep.mubr.bf16.mxu1 %v4642_v26  ;;  %v4714_v21 = vld [vmem:[%s5714_s23 + $0x6c] ss:$24 sps:$4 sm:$0xff]   ;;  %v4726_v25 = vld [vmem:[%s5714_s23 + $0x9c] ss:$24 sps:$4 sm:$0xff]   ;;  %v4728_v26 = vld [vmem:[%s5714_s23 + $0x2a0] ss:$24 sps:$4 sm:$0xff]  }
  0xd1   : > { %2363 = vmatpush2.bf16.msra.mxu1 %v4670_v27  ;;  %2716 = vmatpush2.bf16.msra.mxu0 %v4778_v54  ;;  %v4729_v27 = vld [vmem:[%s5714_s23 + $0x98] ss:$24 sps:$4 sm:$0xff]  }
  0xd2   : > { %2364 = vmatprep.subr.bf16.mxu1 %v4675_v28  ;;  %2717 = vmatprep.subr.bf16.mxu0 %v4783_v55  ;;  %v4736_v28 = vld [vmem:[%s5714_s23 + $0x2d4] ss:$24 sps:$4 sm:$0xff]   ;;  %v4810_v54 = vld [vmem:[%s5714_s23 + $0x10] ss:$24 sps:$4 sm:$0xff]  }
  0xd3   : > { %v4813_v55 = vld [vmem:[%s5714_s23 + $0x1e8] ss:$24 sps:$4 sm:$0xff]  }
  0xd5   : > { %2365 = vmatpush2.bf16.msra.mxu1 %v4673_v32  ;;  %2718 = vmatpush2.bf16.msra.mxu0 %v4781_v58  ;;  %v4748_v32 = vld [vmem:[%s5714_s23 + $0x304] ss:$24 sps:$4 sm:$0xff]   ;;  %v4818_v58 = vld [vmem:[%s5714_s23 + $0x218] ss:$24 sps:$4 sm:$0xff]  }
  0xd6   : > { %2366 = vmatprep.subr.bf16.mxu1 %v4684_v35  ;;  %2719 = vmatprep.subr.bf16.mxu0 %v4792_v62  ;;  %v4753_v35 = vld [vmem:[%s5714_s23 + $0xf8] ss:$24 sps:$4 sm:$0xff]   ;;  %v4824_v62 = vld [vmem:[%s5714_s23 + $0x248] ss:$24 sps:$4 sm:$0xff]  }
  0xd7   : > { %2082 = vmatmul.mubr.bf16.gmra.mxu0 %v4644_v33  ;;  %2292 = vmatmul.mubr.bf16.gmra.mxu1 %v4645_v34  ;;  %v4750_v33 = vld [vmem:[%s5714_s23 + $0xfc] ss:$24 sps:$4 sm:$0xff]   ;;  %v4752_v34 = vld [vmem:[%s5714_s23 + $0x300] ss:$24 sps:$4 sm:$0xff]  }
  0xd8   : > { %2091 = vmatprep.mubr.bf16.mxu0 %v4652_v37  ;;  %2301 = vmatprep.mubr.bf16.mxu1 %v4654_v38  ;;  %v4762_v37 = vld [vmem:[%s5714_s23 + $0x12c] ss:$24 sps:$4 sm:$0xff]   ;;  %v4764_v38 = vld [vmem:[%s5714_s23 + $0x330] ss:$24 sps:$4 sm:$0xff]  }
  0xd9   : > { %2367 = vmatpush2.bf16.msra.mxu1 %v4682_v39  ;;  %2720 = vmatpush2.bf16.msra.mxu0 %v4790_v63  ;;  %v4765_v39 = vld [vmem:[%s5714_s23 + $0x128] ss:$24 sps:$4 sm:$0xff]  }
  0xda   : > { %2368 = vmatprep.subr.bf16.mxu1 %v4687_v40  ;;  %2721 = vmatprep.subr.bf16.mxu0 %v4795_v0  ;;  %v4772_v40 = vld [vmem:[%s5714_s23 + $0x364] ss:$24 sps:$4 sm:$0xff]   ;;  %v4825_v63 = vld [vmem:[%s5714_s23 + $0x70] ss:$24 sps:$4 sm:$0xff]  }
  0xdb   : > { %v4826_v0 = vld [vmem:[%s5714_s23 + $0x27c] ss:$24 sps:$4 sm:$0xff]  }
  0xdd   : > { %2369 = vmatpush2.bf16.msra.mxu1 %v4685_v46  ;;  %2722 = vmatpush2.bf16.msra.mxu0 %v4793_v1  ;;  %v4788_v46 = vld [vmem:[%s5714_s23 + $0x390] ss:$24 sps:$4 sm:$0xff]   ;;  %v4828_v1 = vld [vmem:[%s5714_s23 + $0xa4] ss:$24 sps:$4 sm:$0xff]  }
  0xde   : > { %2370 = vmatprep.subr.bf16.mxu1 %v4696_v47  ;;  %2723 = vmatprep.subr.bf16.mxu0 %v4804_v7  ;;  %v4789_v47 = vld [vmem:[%s5714_s23 + $0x188] ss:$24 sps:$4 sm:$0xff]  }
  0xdf   : > { %2092 = vmatmul.mubr.bf16.gmra.mxu0 %v4656_v44  ;;  %2302 = vmatmul.mubr.bf16.gmra.mxu1 %v4657_v45  ;;  %v4784_v44 = vld [vmem:[%s5714_s23 + $0x394] ss:$24 sps:$4 sm:$0xff]  }
  0xe0   : > { %2101 = vmatprep.mubr.bf16.mxu0 %v4664_v49  ;;  %2311 = vmatprep.mubr.bf16.mxu1 %v4666_v50  ;;  %v4786_v45 = vld [vmem:[%s5714_s23 + $0x18c] ss:$24 sps:$4 sm:$0xff]   ;;  %v4798_v49 = vld [vmem:[%s5714_s23 + $0x1bc] ss:$24 sps:$4 sm:$0xff]   ;;  %v4800_v50 = vld [vmem:[%s5714_s23 + $0x3c0] ss:$24 sps:$4 sm:$0xff]  }
  0xe1   : > { %2371 = vmatpush2.bf16.msra.mxu1 %v4694_v51  ;;  %2724 = vmatpush2.bf16.msra.mxu0 %v4802_v6  ;;  %v4801_v51 = vld [vmem:[%s5714_s23 + $0x1b8] ss:$24 sps:$4 sm:$0xff]  }
  0xe2   : > { %2372 = vmatprep.subr.bf16.mxu1 %v4699_v52  ;;  %2725 = vmatprep.subr.bf16.mxu0 %v4807_v8  ;;  %v4808_v52 = vld [vmem:[%s5714_s23 + $0x1ec] ss:$24 sps:$4 sm:$0xff]  }
  0xe5   : > { %2373 = vmatpush2.bf16.msra.mxu1 %v4697_v57  ;;  %2726 = vmatpush2.bf16.msra.mxu0 %v4805_v9  ;;  %v4816_v57 = vld [vmem:[%s5714_s23 + $0x44] ss:$24 sps:$4 sm:$0xff]  }
  0xe7   : > { %2102 = vmatmul.mubr.bf16.gmra.mxu0 %v4668_v56  ;;  %2312 = vmatmul.mubr.bf16.gmra.mxu1 %v4669_v59  ;;  %v4814_v56 = vld [vmem:[%s5714_s23 + $0x21c] ss:$24 sps:$4 sm:$0xff]   ;;  %v4819_v59 = vld [vmem:[%s5714_s23 + $0x40] ss:$24 sps:$4 sm:$0xff]  }
  0xe8   : > { %2111 = vmatprep.mubr.bf16.mxu0 %v4676_v60  ;;  %2321 = vmatprep.mubr.bf16.mxu1 %v4678_v61  ;;  %v4820_v60 = vld [vmem:[%s5714_s23 + $0x24c] ss:$24 sps:$4 sm:$0xff]  }
  0xe9   : > { %v4822_v61 = vld [vmem:[%s5714_s23 + $0x74] ss:$24 sps:$4 sm:$0xff]  }
  0xef   : > { %2112 = vmatmul.mubr.bf16.gmra.mxu0 %v4680_v2  ;;  %2322 = vmatmul.mubr.bf16.gmra.mxu1 %v4681_v3  ;;  %v4830_v2 = vld [vmem:[%s5714_s23 + $0x278] ss:$24 sps:$4 sm:$0xff]  }
  0xf0   : > { %2121 = vmatprep.mubr.bf16.mxu0 %v4688_v4  ;;  %2331 = vmatprep.mubr.bf16.mxu1 %v4690_v5  ;;  %v4831_v3 = vld [vmem:[%s5714_s23 + $0xa0] ss:$24 sps:$4 sm:$0xff]   ;;  %v4832_v4 = vld [vmem:[%s5714_s23 + $0x2ac] ss:$24 sps:$4 sm:$0xff]  }
  0xf1   : > { %v4834_v5 = vld [vmem:[%s5714_s23 + $0xd4] ss:$24 sps:$4 sm:$0xff]  }
  0xf7   : > { %2122 = vmatmul.mubr.bf16.gmra.mxu0 %v4692_v10  ;;  %2332 = vmatmul.mubr.bf16.gmra.mxu1 %v4693_v11 }
  0xf8   : > { %2131 = vmatprep.mubr.bf16.mxu0 %v4700_v12  ;;  %2374 = vmatprep.mubr.bf16.mxu1 %v4704_v13  ;;  %v4836_v12 = vld [vmem:[%s5714_s23 + $0x2a8] ss:$24 sps:$4 sm:$0xff]  }
  0xf9   : > { %v4837_v13 = vld [vmem:[%s5714_s23 + $0xd0] ss:$24 sps:$4 sm:$0xff]  }
  0xff   : > { %2132 = vmatmul.mubr.bf16.gmra.mxu0 %v4705_v15  ;;  %2375 = vmatmul.mubr.bf16.vlgmr.msra.gmra.mxu1 %v4702_v14  ;;  %v4838_v14 = vld [vmem:[%s5714_s23 + $0x2dc] ss:$24 sps:$4 sm:$0xff]  }
 0x100   : > { %2141 = vmatprep.mubr.bf16.mxu0 %v4706_v16  ;;  %2384 = vmatprep.mubr.bf16.mxu1 %v4708_v17  ;;  %v4840_v15 = vld [vmem:[%s5714_s23 + $0x104] ss:$24 sps:$4 sm:$0xff]  }
 0x107   : > { %2142 = vmatmul.mubr.bf16.gmra.mxu0 %v4710_v18  ;;  %2385 = vmatmul.mubr.bf16.gmra.mxu1 %v4711_v19 }
 0x108   : > { %2151 = vmatprep.mubr.bf16.mxu0 %v4712_v20  ;;  %2394 = vmatprep.mubr.bf16.mxu1 %v4714_v21 }
 0x10f   : > { %2152 = vmatmul.mubr.bf16.gmra.mxu0 %v4716_v22  ;;  %2395 = vmatmul.mubr.bf16.gmra.mxu1 %v4717_v23 }
 0x110   : > { %2161 = vmatprep.mubr.bf16.mxu0 %v4724_v24  ;;  %2404 = vmatprep.mubr.bf16.mxu1 %v4726_v25  ;;  %v4842_v24 = vld [vmem:[%s5714_s23 + $0x2d8] ss:$24 sps:$4 sm:$0xff]  }
 0x111   : > { %v4843_v25 = vld [vmem:[%s5714_s23 + $0x100] ss:$24 sps:$4 sm:$0xff]  }
 0x117   : > { %2162 = vmatmul.mubr.bf16.gmra.mxu0 %v4728_v26  ;;  %2405 = vmatmul.mubr.bf16.gmra.mxu1 %v4729_v27  ;;  %v4844_v26 = vld [vmem:[%s5714_s23 + $0x30c] ss:$24 sps:$4 sm:$0xff]  }
 0x118   : > { %2171 = vmatprep.mubr.bf16.mxu0 %v4736_v28  ;;  %2414 = vmatprep.mubr.bf16.mxu1 %v4738_v29  ;;  %v4846_v27 = vld [vmem:[%s5714_s23 + $0x134] ss:$24 sps:$4 sm:$0xff]  }
 0x11f   : > { %2172 = vmatmul.mubr.bf16.gmra.mxu0 %v4740_v30  ;;  %2415 = vmatmul.mubr.bf16.gmra.mxu1 %v4741_v31 }
 0x120   : > { %2181 = vmatprep.mubr.bf16.mxu0 %v4748_v32  ;;  %2424 = vmatprep.mubr.bf16.mxu1 %v4750_v33 }
 0x127   : > { %2182 = vmatmul.mubr.bf16.gmra.mxu0 %v4752_v34  ;;  %2425 = vmatmul.mubr.bf16.gmra.mxu1 %v4753_v35 }
 0x128   : > { %2191 = vmatprep.mubr.bf16.mxu0 %v4760_v36  ;;  %2434 = vmatprep.mubr.bf16.mxu1 %v4762_v37  ;;  %v4848_v36 = vld [vmem:[%s5714_s23 + $0x308] ss:$24 sps:$4 sm:$0xff]  }
 0x129   : > { %v4849_v37 = vld [vmem:[%s5714_s23 + $0x130] ss:$24 sps:$4 sm:$0xff]  }
 0x12f   : > { %2192 = vmatmul.mubr.bf16.gmra.mxu0 %v4764_v38  ;;  %2435 = vmatmul.mubr.bf16.gmra.mxu1 %v4765_v39  ;;  %v4852_v38 = vld [vmem:[%s5714_s23 + $0x33c] ss:$24 sps:$4 sm:$0xff]  }
 0x130   : > { %2201 = vmatprep.mubr.bf16.mxu0 %v4772_v40  ;;  %2444 = vmatprep.mubr.bf16.mxu1 %v4774_v41  ;;  %v4855_v39 = vld [vmem:[%s5714_s23 + $0x164] ss:$24 sps:$4 sm:$0xff]  }
 0x137   : > { %2202 = vmatmul.mubr.bf16.gmra.mxu0 %v4776_v42  ;;  %2445 = vmatmul.mubr.bf16.gmra.mxu1 %v4777_v43 }
 0x138   : > { %2211 = vmatprep.mubr.bf16.mxu0 %v4784_v44  ;;  %2454 = vmatprep.mubr.bf16.mxu1 %v4786_v45 }
 0x13f   : > { %2212 = vmatmul.mubr.bf16.gmra.mxu0 %v4788_v46  ;;  %2455 = vmatmul.mubr.bf16.gmra.mxu1 %v4789_v47 }
 0x140   : > { %2221 = vmatprep.mubr.bf16.mxu0 %v4796_v48  ;;  %2464 = vmatprep.mubr.bf16.mxu1 %v4798_v49  ;;  %v4850_v48 = vld [vmem:[%s5714_s23 + $0x338] ss:$24 sps:$4 sm:$0xff]  }
 0x141   : > { %v4853_v49 = vld [vmem:[%s5714_s23 + $0x160] ss:$24 sps:$4 sm:$0xff]  }
 0x147   : > { %2222 = vmatmul.mubr.bf16.gmra.mxu0 %v4800_v50  ;;  %2465 = vmatmul.mubr.bf16.gmra.mxu1 %v4801_v51  ;;  %v4858_v50 = vld [vmem:[%s5714_s23 + $0x36c] ss:$24 sps:$4 sm:$0xff]  }
 0x148   : > { %2474 = vmatprep.mubr.bf16.mxu1 %v4808_v52  ;;  %2727 = vmatprep.mubr.bf16.mxu0 %v4812_v53  ;;  %v4861_v51 = vld [vmem:[%s5714_s23 + $0x194] ss:$24 sps:$4 sm:$0xff]  }
 0x14f   : > { %2475 = vmatmul.mubr.bf16.gmra.mxu1 %v4813_v55  ;;  %2728 = vmatmul.mubr.bf16.vlgmr.msra.gmra.mxu0 %v4810_v54 }
 0x150   : > { %2484 = vmatprep.mubr.bf16.mxu1 %v4814_v56  ;;  %2737 = vmatprep.mubr.bf16.mxu0 %v4816_v57 }
 0x157   : > { %2485 = vmatmul.mubr.bf16.gmra.mxu1 %v4818_v58  ;;  %2738 = vmatmul.mubr.bf16.gmra.mxu0 %v4819_v59 }
 0x158   : > { %2494 = vmatprep.mubr.bf16.mxu1 %v4820_v60  ;;  %2747 = vmatprep.mubr.bf16.mxu0 %v4822_v61  ;;  %v4856_v60 = vld [vmem:[%s5714_s23 + $0x368] ss:$24 sps:$4 sm:$0xff]  }
 0x159   : > { %v4859_v61 = vld [vmem:[%s5714_s23 + $0x190] ss:$24 sps:$4 sm:$0xff]  }
 0x15f   : > { %2495 = vmatmul.mubr.bf16.gmra.mxu1 %v4824_v62  ;;  %2748 = vmatmul.mubr.bf16.gmra.mxu0 %v4825_v63  ;;  %v4864_v62 = vld [vmem:[%s5714_s23 + $0x39c] ss:$24 sps:$4 sm:$0xff]  }
 0x160   : > { %2504 = vmatprep.mubr.bf16.mxu1 %v4826_v0  ;;  %2757 = vmatprep.mubr.bf16.mxu0 %v4828_v1  ;;  %v4867_v63 = vld [vmem:[%s5714_s23 + $0x1c4] ss:$24 sps:$4 sm:$0xff]  }
 0x167   : > { %v5830_v6 = vpop.f32.mrf.mxu0  ;;  %v5832_v7 = vpop.f32.mrf.mxu1  ;;  %2505 = vmatmul.mubr.bf16.gmra.mxu1 %v4830_v2  ;;  %2758 = vmatmul.mubr.bf16.gmra.mxu0 %v4831_v3 }
 0x168   : > { %7365 = vst [vmem:[#allocation17_spill] sm:$0xff] %v5832_v7  ;;  %2514 = vmatprep.mubr.bf16.mxu1 %v4832_v4  ;;  %2767 = vmatprep.mubr.bf16.mxu0 %v4834_v5  ;;  %v4928_v7 = vld [vmem:[%s5714_s23 + $0x5a8] ss:$24 sps:$4 sm:$0xff]  }
 0x169   : > { %v5834_v8 = vpop.f32.mrf.mxu0  ;;  %v5836_v9 = vpop.f32.mrf.mxu1 }
 0x16a   : > { %7366 = vst [vmem:[#allocation18_spill] sm:$0xff] %v5836_v9  ;;  %v4907_v9 = vld [vmem:[%s5714_s23 + $0x310] ss:$24 sps:$4 sm:$0xff]  }
 0x16b   : > { %v5838_v10 = vpop.f32.mrf.mxu0  ;;  %v5840_v11 = vpop.f32.mrf.mxu1 }
 0x16c   : > { %7367 = vst [vmem:[#allocation19_spill] sm:$0xff] %v5840_v11 }
 0x16d   : > { %v5846_v16 = vpop.f32.mrf.mxu0  ;;  %v5848_v17 = vpop.f32.mrf.mxu1 }
 0x16e   : > { %7368 = vst [vmem:[#allocation20_spill] sm:$0xff] %v5848_v17 }
 0x16f   : > { %v5850_v18 = vpop.f32.mrf.mxu0  ;;  %v5852_v19 = vpop.f32.mrf.mxu1  ;;  %2515 = vmatmul.mubr.bf16.gmra.mxu1 %v4836_v12  ;;  %2768 = vmatmul.mubr.bf16.gmra.mxu0 %v4837_v13 }
 0x170   : > { %7369 = vst [vmem:[#allocation21_spill] sm:$0xff] %v5852_v19  ;;  %2524 = vmatprep.mubr.bf16.mxu1 %v4838_v14  ;;  %2777 = vmatprep.mubr.bf16.mxu0 %v4840_v15  ;;  %v4862_v14 = vld [vmem:[%s5714_s23 + $0x398] ss:$24 sps:$4 sm:$0xff]  }
 0x171   : > { %v5854_v20 = vpop.f32.mrf.mxu0  ;;  %v5856_v21 = vpop.f32.mrf.mxu1  ;;  %v4865_v15 = vld [vmem:[%s5714_s23 + $0x1c0] ss:$24 sps:$4 sm:$0xff]  }
 0x172   : > { %7370 = vst [vmem:[#allocation22_spill] sm:$0xff] %v5856_v21  ;;  %v4901_v19 = vld [vmem:[%s5714_s23 + $0x2e0] ss:$24 sps:$4 sm:$0xff]  }
 0x173   : > { %v5858_v22 = vpop.f32.mrf.mxu0  ;;  %v5860_v23 = vpop.f32.mrf.mxu1 }
 0x174   : > { %7371 = vst [vmem:[#allocation23_spill] sm:$0xff] %v5860_v23 }
 0x175   : > { %v5866_v28 = vpop.f32.mrf.mxu0  ;;  %v5868_v29 = vpop.f32.mrf.mxu1 }
 0x176   : > { %7372 = vst [vmem:[#allocation24_spill] sm:$0xff] %v5868_v29 }
 0x177   : > { %v5870_v30 = vpop.f32.mrf.mxu0  ;;  %v5872_v31 = vpop.f32.mrf.mxu1  ;;  %2525 = vmatmul.mubr.bf16.gmra.mxu1 %v4842_v24  ;;  %2778 = vmatmul.mubr.bf16.gmra.mxu0 %v4843_v25  ;;  %v4870_v24 = vld [vmem:[%s5714_s23 + $0x3cc] ss:$24 sps:$4 sm:$0xff]  }
 0x178   : > { %7373 = vst [vmem:[#allocation25_spill] sm:$0xff] %v5872_v31  ;;  %2534 = vmatprep.mubr.bf16.mxu1 %v4844_v26  ;;  %2787 = vmatprep.mubr.bf16.mxu0 %v4846_v27  ;;  %v4873_v25 = vld [vmem:[%s5714_s23 + $0x1f4] ss:$24 sps:$4 sm:$0xff]   ;;  %v4892_v31 = vld [vmem:[%s5714_s23 + $0x488] ss:$24 sps:$4 sm:$0xff]  }
 0x179   : > { %v5874_v32 = vpop.f32.mrf.mxu0  ;;  %v5876_v33 = vpop.f32.mrf.mxu1 }
 0x17a   : > { %7374 = vst [vmem:[#allocation26_spill] sm:$0xff] %v5876_v33 }
 0x17b   : > { %v5878_v34 = vpop.f32.mrf.mxu0  ;;  %v5880_v35 = vpop.f32.mrf.mxu1 }
 0x17c   : > { %7375 = vst [vmem:[#allocation27_spill] sm:$0xff] %v5880_v35 }
 0x17d   : > { %v5886_v40 = vpop.f32.mrf.mxu0  ;;  %v5888_v41 = vpop.f32.mrf.mxu1 }
 0x17e   : > { %7376 = vst [vmem:[#allocation28_spill] sm:$0xff] %v5888_v41 }
 0x17f   : > { %v5890_v42 = vpop.f32.mrf.mxu0  ;;  %v5892_v43 = vpop.f32.mrf.mxu1  ;;  %2535 = vmatmul.mubr.bf16.gmra.mxu1 %v4848_v36  ;;  %2788 = vmatmul.mubr.bf16.gmra.mxu0 %v4849_v37 }
 0x180   : > { %7377 = vst [vmem:[#allocation29_spill] sm:$0xff] %v5892_v43  ;;  %2544 = vmatprep.mubr.bf16.mxu1 %v4852_v38  ;;  %2797 = vmatprep.mubr.bf16.mxu0 %v4855_v39  ;;  %v4897_v43 = vld [vmem:[%s5714_s23 + $0x2b4] ss:$24 sps:$4 sm:$0xff]  }
 0x181   : > { %v5894_v44 = vpop.f32.mrf.mxu0  ;;  %v5896_v45 = vpop.f32.mrf.mxu1 }
 0x182   : > { %7378 = vst [vmem:[#allocation30_spill] sm:$0xff] %v5896_v45  ;;  %v4894_v45 = vld [vmem:[%s5714_s23 + $0x48c] ss:$24 sps:$4 sm:$0xff]  }
 0x183   : > { %v5898_v46 = vpop.f32.mrf.mxu0  ;;  %v5900_v47 = vpop.f32.mrf.mxu1 }
 0x184   : > { %7379 = vst [vmem:[#allocation31_spill] sm:$0xff] %v5900_v47  ;;  %v4889_v47 = vld [vmem:[%s5714_s23 + $0x280] ss:$24 sps:$4 sm:$0xff]  }
 0x185   : > { %v5906_v52 = vpop.f32.mrf.mxu0  ;;  %v5908_v53 = vpop.f32.mrf.mxu1 }
 0x186   : > { %7380 = vst [vmem:[#allocation32_spill] sm:$0xff] %v5908_v53  ;;  %v4886_v53 = vld [vmem:[%s5714_s23 + $0x458] ss:$24 sps:$4 sm:$0xff]  }
 0x187   : > { %v5910_v54 = vpop.f32.mrf.mxu0  ;;  %v5912_v55 = vpop.f32.mrf.mxu1  ;;  %2545 = vmatmul.mubr.bf16.gmra.mxu1 %v4850_v48  ;;  %2798 = vmatmul.mubr.bf16.gmra.mxu0 %v4853_v49 }
 0x188   : > { %7381 = vst [vmem:[#allocation33_spill] sm:$0xff] %v5912_v55  ;;  %2554 = vmatprep.mubr.bf16.mxu1 %v4858_v50  ;;  %2807 = vmatprep.mubr.bf16.mxu0 %v4861_v51  ;;  %v4868_v50 = vld [vmem:[%s5714_s23 + $0x3c8] ss:$24 sps:$4 sm:$0xff]  }
 0x189   : > { %v5914_v56 = vpop.f32.mrf.mxu0  ;;  %v5916_v57 = vpop.f32.mrf.mxu1  ;;  %v4871_v51 = vld [vmem:[%s5714_s23 + $0x1f0] ss:$24 sps:$4 sm:$0xff]  }
 0x18a   : > { %7382 = vst [vmem:[#allocation34_spill] sm:$0xff] %v5916_v57 }
 0x18b   : > { %v5918_v58 = vpop.f32.mrf.mxu0  ;;  %v5920_v59 = vpop.f32.mrf.mxu1 }
 0x18c   : > { %7383 = vst [vmem:[#allocation35_spill] sm:$0xff] %v5920_v59  ;;  %v4888_v59 = vld [vmem:[%s5714_s23 + $0x45c] ss:$24 sps:$4 sm:$0xff]  }
 0x18d   : > { %v5926_v0 = vpop.f32.mrf.mxu0  ;;  %v5928_v1 = vpop.f32.mrf.mxu1 }
 0x18e   : > { %7384 = vst [vmem:[#allocation36_spill] sm:$0xff] %v5928_v1  ;;  %v4883_v1 = vld [vmem:[%s5714_s23 + $0x250] ss:$24 sps:$4 sm:$0xff]  }
 0x18f   : > { %v5930_v2 = vpop.f32.mrf.mxu0  ;;  %v5932_v3 = vpop.f32.mrf.mxu1  ;;  %2555 = vmatmul.mubr.bf16.gmra.mxu1 %v4856_v60  ;;  %2808 = vmatmul.mubr.bf16.gmra.mxu0 %v4859_v61  ;;  %v4876_v60 = vld [vmem:[%s5714_s23 + $0x3fc] ss:$24 sps:$4 sm:$0xff]  }
 0x190   : > { %7385 = vst [vmem:[#allocation37_spill] sm:$0xff] %v5932_v3  ;;  %2564 = vmatprep.mubr.bf16.mxu1 %v4864_v62  ;;  %2817 = vmatprep.mubr.bf16.mxu0 %v4867_v63  ;;  %v4879_v61 = vld [vmem:[%s5714_s23 + $0x224] ss:$24 sps:$4 sm:$0xff]   ;;  %v4880_v3 = vld [vmem:[%s5714_s23 + $0x428] ss:$24 sps:$4 sm:$0xff]  }
 0x191   : > { %v5934_v4 = vpop.f32.mrf.mxu0  ;;  %v5936_v5 = vpop.f32.mrf.mxu1 }
 0x192   : > { %7386 = vst [vmem:[#allocation38_spill] sm:$0xff] %v5936_v5 }
 0x193   : > { %v5938_v12 = vpop.f32.mrf.mxu0  ;;  %v5940_v13 = vpop.f32.mrf.mxu1 }
 0x194   : > { %7387 = vst [vmem:[#allocation39_spill] sm:$0xff] %v5940_v13  ;;  %v4885_v13 = vld [vmem:[%s5714_s23 + $0x254] ss:$24 sps:$4 sm:$0xff]  }
 0x195   : > { %v5946_v26 = vpop.f32.mrf.mxu0  ;;  %v5948_v27 = vpop.f32.mrf.mxu1 }
 0x196   : > { %7388 = vst [vmem:[#allocation40_spill] sm:$0xff] %v5948_v27  ;;  %v4877_v27 = vld [vmem:[%s5714_s23 + $0x220] ss:$24 sps:$4 sm:$0xff]  }
 0x197   : > { %v5950_v36 = vpop.f32.mrf.mxu0  ;;  %v5952_v37 = vpop.f32.mrf.mxu1  ;;  %2565 = vmatmul.mubr.bf16.gmra.mxu1 %v4862_v14  ;;  %2818 = vmatmul.mubr.bf16.gmra.mxu0 %v4865_v15 }
 0x198   : > { %7389 = vst [vmem:[#allocation41_spill] sm:$0xff] %v5952_v37  ;;  %2574 = vmatprep.mubr.bf16.mxu1 %v4870_v24  ;;  %2827 = vmatprep.mubr.bf16.mxu0 %v4873_v25  ;;  %v4874_v37 = vld [vmem:[%s5714_s23 + $0x3f8] ss:$24 sps:$4 sm:$0xff]  }
 0x199   : > { %v5954_v38 = vpop.f32.mrf.mxu0  ;;  %v5956_v39 = vpop.f32.mrf.mxu1 }
 0x19a   : > { %7390 = vst [vmem:[#allocation42_spill] sm:$0xff] %v5956_v39 }
 0x19b   : > { %v5958_v48 = vpop.f32.mrf.mxu0  ;;  %v5960_v49 = vpop.f32.mrf.mxu1 }
 0x19c   : > { %7391 = vst [vmem:[#allocation43_spill] sm:$0xff] %v5960_v49 }
 0x19d   : > { %v5966_v62 = vpop.f32.mrf.mxu0  ;;  %v5968_v63 = vpop.f32.mrf.mxu1 }
 0x19e   : > { %7392 = vst [vmem:[#allocation44_spill] sm:$0xff] %v5968_v63  ;;  %v4882_v63 = vld [vmem:[%s5714_s23 + $0x42c] ss:$24 sps:$4 sm:$0xff]  }
 0x19f   : > { %v5970_v14 = vpop.f32.mrf.mxu0  ;;  %v5972_v15 = vpop.f32.mrf.mxu1  ;;  %2575 = vmatmul.mubr.bf16.gmra.mxu1 %v4868_v50  ;;  %2828 = vmatmul.mubr.bf16.gmra.mxu0 %v4871_v51 }
 0x1a0   : > { %7393 = vst [vmem:[#allocation45_spill] sm:$0xff] %v5972_v15  ;;  %2584 = vmatprep.mubr.bf16.mxu1 %v4876_v60  ;;  %2837 = vmatprep.mubr.bf16.mxu0 %v4879_v61 }
 0x1a1   : > { %v5974_v24 = vpop.f32.mrf.mxu0  ;;  %v5976_v25 = vpop.f32.mrf.mxu1 }
 0x1a2   : > { %7394 = vst [vmem:[#allocation46_spill] sm:$0xff] %v5976_v25 }
 0x1a3   : > { %v5978_v39 = vpop.f32.mrf.mxu0  ;;  %v5980_v49 = vpop.f32.mrf.mxu1 }
 0x1a4   : > { %7395 = vst [vmem:[#allocation47_spill] sm:$0xff] %v5980_v49 }
 0x1a5   : > { %v5986_v50 = vpop.f32.mrf.mxu0  ;;  %v5988_v51 = vpop.f32.mrf.mxu1 }
 0x1a6   : > { %7396 = vst [vmem:[#allocation48_spill] sm:$0xff] %v5988_v51  ;;  %v4891_v51 = vld [vmem:[%s5714_s23 + $0x284] ss:$24 sps:$4 sm:$0xff]  }
 0x1a7   : > { %v5990_v60 = vpop.f32.mrf.mxu0  ;;  %v5992_v61 = vpop.f32.mrf.mxu1  ;;  %2585 = vmatmul.mubr.bf16.gmra.mxu1 %v4874_v37  ;;  %2838 = vmatmul.mubr.bf16.gmra.mxu0 %v4877_v27 }
 0x1a8   : > { %7397 = vst [vmem:[#allocation49_spill] sm:$0xff] %v5992_v61  ;;  %2594 = vmatprep.mubr.bf16.mxu1 %v4882_v63  ;;  %2847 = vmatprep.mubr.bf16.mxu0 %v4885_v13  ;;  %v7331_v13 = vlaneseq }
 0x1a9   : > { %v5994_v49 = vpop.f32.mrf.mxu0  ;;  %v5996_v25 = vpop.f32.mrf.mxu1 }
 0x1aa   : > { %7398 = vst [vmem:[#allocation50_spill] sm:$0xff] %v5996_v25  ;;  %v6019_v25 = vshrl.u32 %v7331_v13, 7 }
 0x1ab   : > { %v5998_v15 = vpop.f32.mrf.mxu0  ;;  %v6000_v5 = vpop.f32.mrf.mxu1 }
 0x1ac   : > { %7399 = vst [vmem:[#allocation51_spill] sm:$0xff] %v6000_v5  ;;  %7403 = vst [vmem:[#allocation55_spill] sm:$0xff] %v6019_v25 }
 0x1ad   : > { %v6006_v57 = vpop.f32.mrf.mxu0  ;;  %v6008_v27 = vpop.f32.mrf.mxu1 }
 0x1ae   : > { %7400 = vst [vmem:[#allocation52_spill] sm:$0xff] %v6008_v27 }
 0x1af   : > { %v6010_v37 = vpop.f32.mrf.mxu0  ;;  %v6012_v63 = vpop.f32.mrf.mxu1  ;;  %2595 = vmatmul.mubr.bf16.gmra.mxu1 %v4880_v3  ;;  %2848 = vmatmul.mubr.bf16.gmra.mxu0 %v4883_v1  ;;  %v6034_v1 = vsub.s32 0, %v6019_v25  ;;  %v537_v3 = vld [vmem:[#allocation9] sm:$0x3] }
 0x1b0   : > { %7401 = vst [vmem:[#allocation53_spill] sm:$0xff] %v6012_v63  ;;  %2604 = vmatprep.mubr.bf16.mxu1 %v4888_v59  ;;  %2857 = vmatprep.mubr.bf16.mxu0 %v4891_v51 }
 0x1b1   : > { %v6014_v5 = vpop.f32.mrf.mxu0  ;;  %v6016_v61 = vpop.f32.mrf.mxu1  ;;  %7406 = vst [vmem:[#allocation58_spill] sm:$0xff] %v6034_v1  ;;  %v6048_v41 = vrot.slane %v537_v3, %v6034_v1 }
 0x1b2   : > { %7402 = vst [vmem:[#allocation54_spill] sm:$0xff] %v6016_v61 }
 0x1b3   : > { %v6021_v55 = vpop.f32.mrf.mxu0  ;;  %v6023_v27 = vpop.f32.mrf.mxu1  ;;  %v2024_v1 = vadd.f32 %v5830_v6, %v6048_v41  ;;  %v2028_v6 = vadd.f32 %v5838_v10, %v6048_v41  ;;  %v2034_v10 = vadd.f32 %v5850_v18, %v6048_v41 }
 0x1b4   : > { %7404 = vst [vmem:[#allocation56_spill] sm:$0xff] %v6023_v27  ;;  %v6041_v27 = vsub.s32 1, %v6019_v25  ;;  %v4903_v25 = vld [vmem:[%s5714_s23 + $0x2e4] ss:$24 sps:$4 sm:$0xff]  }
 0x1b5   : > { %v6029_v63 = vpop.f32.mrf.mxu0  ;;  %v6031_v59 = vpop.f32.mrf.mxu1 }
 0x1b6   : > { %7405 = vst [vmem:[#allocation57_spill] sm:$0xff] %v6031_v59  ;;  %7408 = vst [vmem:[#allocation60_spill] sm:$0xff] %v6041_v27 }
 0x1b7   : > { %v6036_v51 = vpop.f32.mrf.mxu0  ;;  %v6038_v13 = vpop.f32.mrf.mxu1  ;;  %2605 = vmatmul.mubr.bf16.gmra.mxu1 %v4886_v53  ;;  %2858 = vmatmul.mubr.bf16.gmra.mxu0 %v4889_v47  ;;  %v6057_v47 = vrot.slane %v537_v3, %v6041_v27  ;;  %v4900_v53 = vld [vmem:[%s5714_s23 + $0x4bc] ss:$24 sps:$4 sm:$0xff]  }
 0x1b8   : > { %7407 = vst [vmem:[#allocation59_spill] sm:$0xff] %v6038_v13  ;;  %2614 = vmatprep.mubr.bf16.mxu1 %v4894_v45  ;;  %2867 = vmatprep.mubr.bf16.mxu0 %v4897_v43  ;;  %v4895_v13 = vld [vmem:[%s5714_s23 + $0x2b0] ss:$24 sps:$4 sm:$0xff]  }
 0x1b9   : > { %v6043_v61 = vpop.f32.mrf.mxu0  ;;  %v6045_v59 = vpop.f32.mrf.mxu1  ;;  %v2026_v3 = vadd.f32 %v5834_v8, %v6057_v47  ;;  %v2030_v8 = vadd.f32 %v5846_v16, %v6057_v47  ;;  %v2036_v16 = vadd.f32 %v5854_v20, %v6057_v47  ;;  %v2040_v20 = vadd.f32 %v5866_v28, %v6057_v47 }
 0x1ba   : > { %7409 = vst [vmem:[#allocation61_spill] sm:$0xff] %v6045_v59  ;;  %v2046_v28 = vadd.f32 %v5874_v32, %v6057_v47  ;;  %v2050_v32 = vadd.f32 %v5886_v40, %v6057_v47  ;;  %v2056_v40 = vadd.f32 %v5894_v44, %v6057_v47  ;;  %v2060_v44 = vadd.f32 %v5906_v52, %v6057_v47 }
 0x1bb   : > { %v6050_v35 = vpop.f32.mrf.mxu0  ;;  %v6052_v33 = vpop.f32.mrf.mxu1  ;;  %v2066_v52 = vadd.f32 %v5914_v56, %v6057_v47  ;;  %v4930_v56 = vld [vmem:[%s5714_s23 + $0x5ac] ss:$24 sps:$4 sm:$0xff]  }
 0x1bc   : > { %7410 = vst [vmem:[#allocation62_spill] sm:$0xff] %v6052_v33 }
 0x1bd   : > { %v6061_v45 = vpop.f32.mrf.mxu0  ;;  %v6063_v43 = vpop.f32.mrf.mxu1 }
 0x1be   : > { %7411 = vst [vmem:[#allocation63_spill] sm:$0xff] %v6063_v43 }
 0x1bf   : > { %v6067_v59 = vpop.f32.mrf.mxu0  ;;  %v2376_v29 = vpop.f32.mrf.mxu1  ;;  %2615 = vmatmul.mubr.bf16.gmra.mxu1 %v4892_v31  ;;  %2868 = vmatmul.mubr.bf16.gmra.mxu0 %v4895_v13  ;;  %v4898_v13 = vld [vmem:[%s5714_s23 + $0x4b8] ss:$24 sps:$4 sm:$0xff]  }
 0x1c0   : > { %v6071_v27 = vadd.f32 %v2376_v29, %v2024_v1  ;;  %2624 = vmatprep.mubr.bf16.mxu1 %v4900_v53  ;;  %2877 = vmatprep.mubr.bf16.mxu0 %v4903_v25  ;;  %v4906_v1 = vld [vmem:[%s5714_s23 + $0x4ec] ss:$24 sps:$4 sm:$0xff]  }
 0x1c1   : > { %v6073_v33 = vpop.f32.mrf.mxu0  ;;  %v2378_v43 = vpop.f32.mrf.mxu1  ;;  %v4909_v25 = vld [vmem:[%s5714_s23 + $0x314] ss:$24 sps:$4 sm:$0xff]  }
 0x1c2   : > { %7412 = vst [vmem:[#allocation64_spill] sm:$0xff] %v6073_v33  ;;  %v6077_v23 = vadd.f32 %v2378_v43, %v2026_v3 }
 0x1c3   : > { %v6079_v21 = vpop.f32.mrf.mxu0  ;;  %v2380_v31 = vpop.f32.mrf.mxu1 }
 0x1c4   : > { %v6085_v29 = vadd.f32 %v2380_v31, %v2028_v6 }
 0x1c5   : > { %v6089_v53 = vpop.f32.mrf.mxu0  ;;  %v2382_v17 = vpop.f32.mrf.mxu1 }
 0x1c6   : > { %7413 = vst [vmem:[#allocation65_spill] sm:$0xff] %v6089_v53  ;;  %v6093_v43 = vadd.f32 %v2382_v17, %v2030_v8  ;;  %v2038_v17 = vadd.f32 %v5858_v22, %v6048_v41  ;;  %v2044_v22 = vadd.f32 %v5870_v30, %v6048_v41 }
 0x1c7   : > { %v6095_v3 = vpop.f32.mrf.mxu0  ;;  %v2386_v11 = vpop.f32.mrf.mxu1  ;;  %2625 = vmatmul.mubr.bf16.gmra.mxu1 %v4898_v13  ;;  %2878 = vmatmul.mubr.bf16.gmra.mxu0 %v4901_v19  ;;  %v4904_v19 = vld [vmem:[%s5714_s23 + $0x4e8] ss:$24 sps:$4 sm:$0xff]  }
 0x1c8   : > { %v6099_v6 = vadd.f32 %v2386_v11, %v2034_v10  ;;  %2634 = vmatprep.mubr.bf16.mxu1 %v4906_v1  ;;  %2887 = vmatprep.mubr.bf16.mxu0 %v4909_v25  ;;  %v4912_v1 = vld [vmem:[%s5714_s23 + $0x51c] ss:$24 sps:$4 sm:$0xff]  }
 0x1c9   : > { %v6101_v31 = vpop.f32.mrf.mxu0  ;;  %v2388_v18 = vpop.f32.mrf.mxu1  ;;  %v4915_v25 = vld [vmem:[%s5714_s23 + $0x344] ss:$24 sps:$4 sm:$0xff]  }
 0x1ca   : > { %7414 = vst [vmem:[#allocation66_spill] sm:$0xff] %v6101_v31  ;;  %v6105_v8 = vadd.f32 %v2388_v18, %v2036_v16 }
 0x1cb   : > { %v6107_v53 = vpop.f32.mrf.mxu0  ;;  %v2390_v13 = vpop.f32.mrf.mxu1 }
 0x1cc   : > { %7415 = vst [vmem:[#allocation67_spill] sm:$0xff] %v6107_v53  ;;  %v6113_v11 = vadd.f32 %v2390_v13, %v2038_v17 }
 0x1cd   : > { %v6117_v10 = vpop.f32.mrf.mxu0  ;;  %v2392_v31 = vpop.f32.mrf.mxu1 }
 0x1ce   : > { %7416 = vst [vmem:[#allocation68_spill] sm:$0xff] %v6117_v10  ;;  %v6121_v16 = vadd.f32 %v2392_v31, %v2040_v20  ;;  %v2048_v31 = vadd.f32 %v5878_v34, %v6048_v41  ;;  %v4913_v10 = vld [vmem:[%s5714_s23 + $0x340] ss:$24 sps:$4 sm:$0xff]   ;;  %v2054_v34 = vadd.f32 %v5890_v42, %v6048_v41 }
 0x1cf   : > { %v6123_v18 = vpop.f32.mrf.mxu0  ;;  %v2396_v53 = vpop.f32.mrf.mxu1  ;;  %2635 = vmatmul.mubr.bf16.gmra.mxu1 %v4904_v19  ;;  %2888 = vmatmul.mubr.bf16.gmra.mxu0 %v4907_v9  ;;  %v4910_v9 = vld [vmem:[%s5714_s23 + $0x518] ss:$24 sps:$4 sm:$0xff]  }
 0x1d0   : > { %7417 = vst [vmem:[#allocation69_spill] sm:$0xff] %v6123_v18  ;;  %v6127_v17 = vadd.f32 %v2396_v53, %v2044_v22  ;;  %2644 = vmatprep.mubr.bf16.mxu1 %v4912_v1  ;;  %2897 = vmatprep.mubr.bf16.mxu0 %v4915_v25  ;;  %v4918_v1 = vld [vmem:[%s5714_s23 + $0x54c] ss:$24 sps:$4 sm:$0xff]  }
 0x1d1   : > { %v6129_v13 = vpop.f32.mrf.mxu0  ;;  %v2398_v30 = vpop.f32.mrf.mxu1  ;;  %v4921_v25 = vld [vmem:[%s5714_s23 + $0x374] ss:$24 sps:$4 sm:$0xff]  }
 0x1d2   : > { %7418 = vst [vmem:[#allocation70_spill] sm:$0xff] %v6129_v13  ;;  %v6133_v20 = vadd.f32 %v2398_v30, %v2046_v28 }
 0x1d3   : > { %v6135_v18 = vpop.f32.mrf.mxu0  ;;  %v2400_v19 = vpop.f32.mrf.mxu1 }
 0x1d4   : > { %7419 = vst [vmem:[#allocation71_spill] sm:$0xff] %v6135_v18  ;;  %v6141_v53 = vadd.f32 %v2400_v19, %v2048_v31 }
 0x1d5   : > { %v6145_v22 = vpop.f32.mrf.mxu0  ;;  %v2402_v13 = vpop.f32.mrf.mxu1 }
 0x1d6   : > { %7420 = vst [vmem:[#allocation72_spill] sm:$0xff] %v6145_v22  ;;  %v6149_v28 = vadd.f32 %v2402_v13, %v2050_v32  ;;  %v2058_v13 = vadd.f32 %v5898_v46, %v6048_v41  ;;  %v4919_v22 = vld [vmem:[%s5714_s23 + $0x370] ss:$24 sps:$4 sm:$0xff]   ;;  %v2064_v46 = vadd.f32 %v5910_v54, %v6048_v41 }
 0x1d7   : > { %v6151_v30 = vpop.f32.mrf.mxu0  ;;  %v2406_v18 = vpop.f32.mrf.mxu1  ;;  %2645 = vmatmul.mubr.bf16.gmra.mxu1 %v4910_v9  ;;  %2898 = vmatmul.mubr.bf16.gmra.mxu0 %v4913_v10  ;;  %v4916_v10 = vld [vmem:[%s5714_s23 + $0x548] ss:$24 sps:$4 sm:$0xff]  }
 0x1d8   : > { %7421 = vst [vmem:[#allocation73_spill] sm:$0xff] %v6151_v30  ;;  %v6155_v31 = vadd.f32 %v2406_v18, %v2054_v34  ;;  %2654 = vmatprep.mubr.bf16.mxu1 %v4918_v1  ;;  %2907 = vmatprep.mubr.bf16.mxu0 %v4921_v25  ;;  %v4924_v1 = vld [vmem:[%s5714_s23 + $0x57c] ss:$24 sps:$4 sm:$0xff]  }
 0x1d9   : > { %v6157_v19 = vpop.f32.mrf.mxu0  ;;  %v2408_v42 = vpop.f32.mrf.mxu1  ;;  %v4927_v25 = vld [vmem:[%s5714_s23 + $0x3a4] ss:$24 sps:$4 sm:$0xff]  }
 0x1da   : > { %7422 = vst [vmem:[#allocation74_spill] sm:$0xff] %v6157_v19  ;;  %v6161_v32 = vadd.f32 %v2408_v42, %v2056_v40 }
 0x1db   : > { %v6163_v30 = vpop.f32.mrf.mxu0  ;;  %v2410_v9 = vpop.f32.mrf.mxu1 }
 0x1dc   : > { %7423 = vst [vmem:[#allocation75_spill] sm:$0xff] %v6163_v30  ;;  %v6169_v18 = vadd.f32 %v2410_v9, %v2058_v13 }
 0x1dd   : > { %v6173_v34 = vpop.f32.mrf.mxu0  ;;  %v2412_v19 = vpop.f32.mrf.mxu1 }
 0x1de   : > { %7424 = vst [vmem:[#allocation76_spill] sm:$0xff] %v6173_v34  ;;  %v6177_v40 = vadd.f32 %v2412_v19, %v2060_v44  ;;  %v2068_v19 = vadd.f32 %v5918_v58, %v6048_v41  ;;  %v4922_v34 = vld [vmem:[%s5714_s23 + $0x578] ss:$24 sps:$4 sm:$0xff]  }
 0x1df   : > { %v6179_v42 = vpop.f32.mrf.mxu0  ;;  %v2416_v30 = vpop.f32.mrf.mxu1  ;;  %2655 = vmatmul.mubr.bf16.gmra.mxu1 %v4916_v10  ;;  %2908 = vmatmul.mubr.bf16.gmra.mxu0 %v4919_v22  ;;  %v4925_v22 = vld [vmem:[%s5714_s23 + $0x3a0] ss:$24 sps:$4 sm:$0xff]  }
 0x1e0   : > { %7425 = vst [vmem:[#allocation77_spill] sm:$0xff] %v6179_v42  ;;  %v6183_v13 = vadd.f32 %v2416_v30, %v2064_v46  ;;  %2664 = vmatprep.mubr.bf16.mxu1 %v4924_v1  ;;  %2917 = vmatprep.mubr.bf16.mxu0 %v4927_v25  ;;  %v4933_v30 = vld [vmem:[%s5714_s23 + $0x3d4] ss:$24 sps:$4 sm:$0xff]   ;;  %v2074_v25 = vadd.f32 %v5930_v2, %v6048_v41 }
 0x1e1   : > { %v6185_v9 = vpop.f32.mrf.mxu0  ;;  %v2418_v54 = vpop.f32.mrf.mxu1  ;;  %v2078_v2 = vadd.f32 %v5938_v12, %v6048_v41 }
 0x1e2   : > { %7426 = vst [vmem:[#allocation78_spill] sm:$0xff] %v6185_v9  ;;  %v6189_v44 = vadd.f32 %v2418_v54, %v2066_v52  ;;  %v2076_v54 = vadd.f32 %v5934_v4, %v6057_v47  ;;  %v4936_v4 = vld [vmem:[%s5714_s23 + $0x5dc] ss:$24 sps:$4 sm:$0xff]  }
 0x1e3   : > { %v6191_v42 = vpop.f32.mrf.mxu0  ;;  %v2420_v10 = vpop.f32.mrf.mxu1 }
 0x1e4   : > { %7427 = vst [vmem:[#allocation79_spill] sm:$0xff] %v6191_v42  ;;  %v6195_v33 = vadd.f32 %v2420_v10, %v2068_v19 }
 0x1e5   : > { %v6199_v46 = vpop.f32.mrf.mxu0  ;;  %v6201_v1 = vpop.f32.mrf.mxu1 }
 0x1e6   : > { %7428 = vst [vmem:[#allocation80_spill] sm:$0xff] %v6199_v46 }
 0x1e7   : > { %v6205_v58 = vpop.f32.mrf.mxu0  ;;  %v2426_v52 = vpop.f32.mrf.mxu1  ;;  %2665 = vmatmul.mubr.bf16.gmra.mxu1 %v4922_v34  ;;  %2918 = vmatmul.mubr.bf16.gmra.mxu0 %v4925_v22  ;;  %v4931_v22 = vld [vmem:[%s5714_s23 + $0x3d0] ss:$24 sps:$4 sm:$0xff]  }
 0x1e8   : > { %7429 = vst [vmem:[#allocation81_spill] sm:$0xff] %v6205_v58  ;;  %v6209_v19 = vadd.f32 %v2426_v52, %v2074_v25  ;;  %2674 = vmatprep.mubr.bf16.mxu1 %v4930_v56  ;;  %2927 = vmatprep.mubr.bf16.mxu0 %v4933_v30  ;;  %v4939_v25 = vld [vmem:[%s5714_s23 + $0x404] ss:$24 sps:$4 sm:$0xff]   ;;  %v2084_v30 = vadd.f32 %v5950_v36, %v6048_v41 }
 0x1e9   : > { %v6211_v10 = vpop.f32.mrf.mxu0  ;;  %v2428_v42 = vpop.f32.mrf.mxu1  ;;  %v2088_v36 = vadd.f32 %v5958_v48, %v6048_v41  ;;  %v2094_v48 = vadd.f32 %v5970_v14, %v6048_v41  ;;  %v2098_v14 = vadd.f32 %v5978_v39, %v6048_v41 }
 0x1ea   : > { %7430 = vst [vmem:[#allocation82_spill] sm:$0xff] %v6211_v10  ;;  %v6215_v46 = vadd.f32 %v2428_v42, %v2076_v54  ;;  %v2086_v54 = vadd.f32 %v5954_v38, %v6057_v47  ;;  %v4934_v10 = vld [vmem:[%s5714_s23 + $0x5d8] ss:$24 sps:$4 sm:$0xff]   ;;  %v2090_v38 = vadd.f32 %v5966_v62, %v6057_v47  ;;  %v2096_v62 = vadd.f32 %v5974_v24, %v6057_v47  ;;  %v4945_v24 = vld [vmem:[%s5714_s23 + $0x464] ss:$24 sps:$4 sm:$0xff]  }
 0x1eb   : > { %v6217_v9 = vpop.f32.mrf.mxu0  ;;  %v2430_v34 = vpop.f32.mrf.mxu1 }
 0x1ec   : > { %7431 = vst [vmem:[#allocation83_spill] sm:$0xff] %v6217_v9  ;;  %v6221_v58 = vadd.f32 %v2430_v34, %v2078_v2 }
 0x1ed   : > { %v6225_v52 = vpop.f32.mrf.mxu0  ;;  %v6227_v56 = vpop.f32.mrf.mxu1 }
 0x1ee   : > { %7432 = vst [vmem:[#allocation84_spill] sm:$0xff] %v6225_v52 }
 0x1ef   : > { %v6231_v12 = vpop.f32.mrf.mxu0  ;;  %v2436_v42 = vpop.f32.mrf.mxu1  ;;  %2675 = vmatmul.mubr.bf16.gmra.mxu1 %v4928_v7  ;;  %2928 = vmatmul.mubr.bf16.gmra.mxu0 %v4931_v22  ;;  %v4937_v22 = vld [vmem:[%s5714_s23 + $0x400] ss:$24 sps:$4 sm:$0xff]  }
 0x1f0   : > { %7433 = vst [vmem:[#allocation85_spill] sm:$0xff] %v6231_v12  ;;  %v6235_v2 = vadd.f32 %v2436_v42, %v2084_v30  ;;  %2684 = vmatprep.mubr.bf16.mxu1 %v4936_v4  ;;  %2937 = vmatprep.mubr.bf16.mxu0 %v4939_v25  ;;  %v4942_v4 = vld [vmem:[%s5714_s23 + $0x434] ss:$24 sps:$4 sm:$0xff]  }
 0x1f1   : > { %v6237_v34 = vpop.f32.mrf.mxu0  ;;  %v2438_v52 = vpop.f32.mrf.mxu1 }
 0x1f2   : > { %7434 = vst [vmem:[#allocation86_spill] sm:$0xff] %v6237_v34  ;;  %v6241_v9 = vadd.f32 %v2438_v52, %v2086_v54  ;;  %v4940_v34 = vld [vmem:[%s5714_s23 + $0x430] ss:$24 sps:$4 sm:$0xff]  }
 0x1f3   : > { %v6243_v12 = vpop.f32.mrf.mxu0  ;;  %v2440_v7 = vpop.f32.mrf.mxu1 }
 0x1f4   : > { %7435 = vst [vmem:[#allocation87_spill] sm:$0xff] %v6243_v12  ;;  %v6249_v30 = vadd.f32 %v2440_v7, %v2088_v36 }
 0x1f5   : > { %v6252_v25 = vpop.f32.mrf.mxu0  ;;  %v2442_v42 = vpop.f32.mrf.mxu1 }
 0x1f6   : > { %7436 = vst [vmem:[#allocation88_spill] sm:$0xff] %v6252_v25  ;;  %v6256_v52 = vadd.f32 %v2442_v42, %v2090_v38 }
 0x1f7   : > { %v6258_v54 = vpop.f32.mrf.mxu0  ;;  %v2446_v12 = vpop.f32.mrf.mxu1  ;;  %2685 = vmatmul.mubr.bf16.gmra.mxu1 %v4934_v10  ;;  %2938 = vmatmul.mubr.bf16.gmra.mxu0 %v4937_v22  ;;  %v2100_v10 = vadd.f32 %v5986_v50, %v6057_v47  ;;  %v2106_v50 = vadd.f32 %v5994_v49, %v6057_v47  ;;  %v4948_v49 = vld [vmem:[%s5714_s23 + $0x494] ss:$24 sps:$4 sm:$0xff]  }
 0x1f8   : > { %7437 = vst [vmem:[#allocation89_spill] sm:$0xff] %v6258_v54  ;;  %v6262_v36 = vadd.f32 %v2446_v12, %v2094_v48  ;;  %2947 = vmatprep.mubr.bf16.mxu0 %v4942_v4  ;;  %v2104_v48 = vadd.f32 %v5990_v60, %v6048_v41 }
 0x1f9   : > { %v6264_v7 = vpop.f32.mrf.mxu0  ;;  %v2448_v25 = vpop.f32.mrf.mxu1 }
 0x1fa   : > { %7438 = vst [vmem:[#allocation90_spill] sm:$0xff] %v6264_v7  ;;  %v6268_v38 = vadd.f32 %v2448_v25, %v2096_v62 }
 0x1fb   : > { %v6270_v42 = vpop.f32.mrf.mxu0  ;;  %v2450_v54 = vpop.f32.mrf.mxu1 }
 0x1fc   : > { %7439 = vst [vmem:[#allocation91_spill] sm:$0xff] %v6270_v42  ;;  %v6275_v22 = vadd.f32 %v2450_v54, %v2098_v14  ;;  %v2108_v42 = vadd.f32 %v5998_v15, %v6048_v41 }
 0x1fd   : > { %v6278_v12 = vpop.f32.mrf.mxu0  ;;  %v2452_v4 = vpop.f32.mrf.mxu1 }
 0x1fe   : > { %7440 = vst [vmem:[#allocation92_spill] sm:$0xff] %v6278_v12  ;;  %v6282_v39 = vadd.f32 %v2452_v4, %v2100_v10 }
 0x1ff   : > { %v6284_v25 = vpop.f32.mrf.mxu0  ;;  %v2456_v62 = vpop.f32.mrf.mxu1  ;;  %2948 = vmatmul.mubr.bf16.gmra.mxu0 %v4940_v34  ;;  %v2110_v34 = vadd.f32 %v6006_v57, %v6057_v47  ;;  %v2116_v57 = vadd.f32 %v6014_v5, %v6057_v47  ;;  %v4951_v5 = vld [vmem:[%s5714_s23 + $0x4c4] ss:$24 sps:$4 sm:$0xff]  }
 0x200   : > { %7441 = vst [vmem:[#allocation93_spill] sm:$0xff] %v6284_v25  ;;  %v6288_v54 = vadd.f32 %v2456_v62, %v2104_v48  ;;  %2957 = vmatprep.mubr.bf16.mxu0 %v4945_v24  ;;  %v4943_v25 = vld [vmem:[%s5714_s23 + $0x460] ss:$24 sps:$4 sm:$0xff]   ;;  %v2114_v62 = vadd.f32 %v6010_v37, %v6048_v41 }
 0x201   : > { %v6290_v14 = vpop.f32.mrf.mxu0  ;;  %v2458_v12 = vpop.f32.mrf.mxu1 }
 0x202   : > { %7442 = vst [vmem:[#allocation94_spill] sm:$0xff] %v6290_v14  ;;  %v6294_v60 = vadd.f32 %v2458_v12, %v2106_v50 }
 0x203   : > { %v6296_v10 = vpop.f32.mrf.mxu0  ;;  %v2460_v4 = vpop.f32.mrf.mxu1 }
 0x204   : > { %7443 = vst [vmem:[#allocation95_spill] sm:$0xff] %v6296_v10  ;;  %v6301_v7 = vadd.f32 %v2460_v4, %v2108_v42  ;;  %v2118_v10 = vadd.f32 %v6021_v55, %v6048_v41 }
 0x205   : > { %v6304_v48 = vpop.f32.mrf.mxu0  ;;  %v2462_v24 = vpop.f32.mrf.mxu1 }
 0x206   : > { %7444 = vst [vmem:[#allocation96_spill] sm:$0xff] %v6304_v48  ;;  %v6308_v15 = vadd.f32 %v2462_v24, %v2110_v34 }
 0x207   : > { %v6310_v12 = vpop.f32.mrf.mxu0  ;;  %v2466_v50 = vpop.f32.mrf.mxu1  ;;  %2958 = vmatmul.mubr.bf16.gmra.mxu0 %v4943_v25  ;;  %v2120_v25 = vadd.f32 %v6029_v63, %v6057_v47 }
 0x208   : > { %7445 = vst [vmem:[#allocation97_spill] sm:$0xff] %v6310_v12  ;;  %v6314_v42 = vadd.f32 %v2466_v50, %v2114_v62  ;;  %2967 = vmatprep.mubr.bf16.mxu0 %v4948_v49  ;;  %v4946_v12 = vld [vmem:[%s5714_s23 + $0x490] ss:$24 sps:$4 sm:$0xff]   ;;  %v2124_v50 = vadd.f32 %v6036_v51, %v6048_v41  ;;  %v2128_v51 = vadd.f32 %v6050_v35, %v6048_v41 }
 0x209   : > { %v6316_v4 = vpop.f32.mrf.mxu0  ;;  %v2468_v48 = vpop.f32.mrf.mxu1  ;;  %v2134_v35 = vadd.f32 %v6067_v59, %v6048_v41 }
 0x20a   : > { %7446 = vst [vmem:[#allocation98_spill] sm:$0xff] %v6316_v4  ;;  %v6320_v37 = vadd.f32 %v2468_v48, %v2116_v57 }
 0x20b   : > { %v6322_v34 = vpop.f32.mrf.mxu0  ;;  %v2470_v24 = vpop.f32.mrf.mxu1 }
 0x20c   : > { %7447 = vst [vmem:[#allocation99_spill] sm:$0xff] %v6322_v34  ;;  %v6327_v14 = vadd.f32 %v2470_v24, %v2118_v10  ;;  %v2126_v34 = vadd.f32 %v6043_v61, %v6057_v47  ;;  %v2130_v61 = vadd.f32 %v6061_v45, %v6057_v47 }
 0x20d   : > { %v6330_v62 = vpop.f32.mrf.mxu0  ;;  %v2472_v49 = vpop.f32.mrf.mxu1 }
 0x20e   : > { %7448 = vst [vmem:[#allocation100_spill] sm:$0xff] %v6330_v62  ;;  %v6334_v55 = vadd.f32 %v2472_v49, %v2120_v25 }
 0x20f   : > { %v2476_v48 = vpop.f32.mrf.mxu1  ;;  %v2729_v57 = vpop.f32.mrf.mxu0  ;;  %2968 = vmatmul.mubr.bf16.gmra.mxu0 %v4946_v12 }
 0x210   : > { %7449 = vst [vmem:[#allocation101_spill] sm:$0xff] %v6334_v55  ;;  %v6338_v63 = vadd.f32 %v2476_v48, %v2124_v50  ;;  %v6341_v10 = vadd.f32 %v2729_v57, %v6071_v27  ;;  %2977 = vmatprep.mubr.bf16.mxu0 %v4951_v5  ;;  %v4949_v55 = vld [vmem:[%s5714_s23 + $0x4c0] ss:$24 sps:$4 sm:$0xff]   ;;  %v4954_v5 = vld [vmem:[%s5714_s23 + $0x4f4] ss:$24 sps:$4 sm:$0xff]  }
 0x211   : > { %v2478_v24 = vpop.f32.mrf.mxu1  ;;  %v2731_v62 = vpop.f32.mrf.mxu0 }
 0x212   : > { %7450 = vst [vmem:[#allocation102_spill] sm:$0xff] %v6338_v63  ;;  %v6345_v25 = vadd.f32 %v2478_v24, %v2126_v34  ;;  %v2732_v49 = vadd.f32 %v2731_v62, %v6077_v23 }
 0x213   : > { %v2480_v12 = vpop.f32.mrf.mxu1  ;;  %v2733_v4 = vpop.f32.mrf.mxu0 }
 0x214   : > { %v4313_v50 = vmul.f32 -1.442695, %v2732_v49  ;;  %v6351_v48 = vadd.f32 %v2480_v12, %v2128_v51  ;;  %v6354_v27 = vadd.f32 %v2733_v4, %v6085_v29  ;;  %v2138_v49 = vadd.f32 %v6079_v21, %v6048_v41 }
 0x215   : > { %v2482_v57 = vpop.f32.mrf.mxu1  ;;  %v2735_v63 = vpop.f32.mrf.mxu0 }
 0x216   : > { %4970 = vpow2.f32 %v4313_v50  ;;  %v6359_v23 = vadd.f32 %v2482_v57, %v2130_v61  ;;  %v2736_v34 = vadd.f32 %v2735_v63, %v6093_v43 }
 0x217   : > { %v2486_v62 = vpop.f32.mrf.mxu1  ;;  %v2739_v45 = vpop.f32.mrf.mxu0  ;;  %2978 = vmatmul.mubr.bf16.gmra.mxu0 %v4949_v55  ;;  %v4952_v55 = vld [vmem:[%s5714_s23 + $0x4f0] ss:$24 sps:$4 sm:$0xff]  }
 0x218   : > { %v4314_v24 = vmul.f32 -1.442695, %v2736_v34  ;;  %v6362_v51 = vadd.f32 %v2486_v62, %v2134_v35  ;;  %v6365_v29 = vadd.f32 %v2739_v45, %v6099_v6  ;;  %2987 = vmatprep.mubr.bf16.mxu0 %v4954_v5  ;;  %v4957_v6 = vld [vmem:[%s5714_s23 + $0x524] ss:$24 sps:$4 sm:$0xff]   ;;  %v2144_v34 = vadd.f32 %v6095_v3, %v6048_v41 }
 0x219   : > { %v6367_v4 = vpop.f32.mrf.mxu1  ;;  %v2741_v59 = vpop.f32.mrf.mxu0 }
 0x21a   : > { %4972 = vpow2.f32 %v4314_v24  ;;  %v2742_v43 = vadd.f32 %v2741_v59, %v6105_v8 }
 0x21b   : > { %v2490_v63 = vpop.f32.mrf.mxu1  ;;  %v2743_v12 = vpop.f32.mrf.mxu0 }
 0x21c   : > { %v4315_v61 = vmul.f32 -1.442695, %v2742_v43  ;;  %v6373_v50 = vadd.f32 %v2490_v63, %v2138_v49  ;;  %v6376_v57 = vadd.f32 %v2743_v12, %v6113_v11  ;;  %v4955_v12 = vld [vmem:[%s5714_s23 + $0x520] ss:$24 sps:$4 sm:$0xff]  }
 0x21d   : > { %v6379_v5 = vpop.f32.mrf.mxu1  ;;  %v2745_v35 = vpop.f32.mrf.mxu0 }
 0x21e   : > { %4974 = vpow2.f32 %v4315_v61  ;;  %v2746_v21 = vadd.f32 %v2745_v35, %v6121_v16 }
 0x21f   : > { %v2496_v8 = vpop.f32.mrf.mxu1  ;;  %v2749_v62 = vpop.f32.mrf.mxu0  ;;  %2988 = vmatmul.mubr.bf16.gmra.mxu0 %v4952_v55 }
 0x220   : > { %v4316_v45 = vmul.f32 -1.442695, %v2746_v21  ;;  %v6384_v24 = vadd.f32 %v2496_v8, %v2144_v34  ;;  %v6387_v11 = vadd.f32 %v2749_v62, %v6127_v17  ;;  %2997 = vmatprep.mubr.bf16.mxu0 %v4957_v6  ;;  %v4960_v34 = vld [vmem:[%s5714_s23 + $0x554] ss:$24 sps:$4 sm:$0xff]  }
 0x221   : > { %v6389_v59 = vpop.f32.mrf.mxu1  ;;  %v2751_v49 = vpop.f32.mrf.mxu0 }
 0x222   : > { %4976 = vpow2.f32 %v4316_v45  ;;  %v2752_v3 = vadd.f32 %v2751_v49, %v6133_v20 }
 0x223   : > { %v4971_v43 = vpop.eup %4970  ;;  %v6392_v63 = vpop.f32.mrf.mxu1  ;;  %4978 = vtanh.f32 %v6341_v10 }
 0x224   : > { %v2753_v16 = vpop.f32.mrf.mxu0  ;;  %v3304_v55 = vadd.f32 1.0, %v4971_v43  ;;  %v4317_v61 = vmul.f32 -1.442695, %v2752_v3 }
 0x225   : > { %v6396_v35 = vadd.f32 %v2753_v16, %v6141_v53  ;;  %v6400_v17 = vpop.f32.mrf.mxu1 }
 0x226   : > { %v2755_v6 = vpop.f32.mrf.mxu0  ;;  %4980 = vrcp.f32 %v3304_v55  ;;  %v4958_v55 = vld [vmem:[%s5714_s23 + $0x550] ss:$24 sps:$4 sm:$0xff]  }
 0x227   : > { %v2756_v21 = vadd.f32 %v2755_v6, %v6149_v28  ;;  %v4973_v20 = vpop.eup %4972  ;;  %4982 = vpow2.f32 %v4317_v61  ;;  %v6403_v8 = vpop.f32.mrf.mxu1  ;;  %2998 = vmatmul.mubr.bf16.gmra.mxu0 %v4955_v12 }
 0x228   : > { %v2759_v62 = vpop.f32.mrf.mxu0  ;;  %v3305_v45 = vadd.f32 1.0, %v4973_v20  ;;  %3007 = vmatprep.mubr.bf16.mxu0 %v4960_v34  ;;  %4984 = vtanh.f32 %v6354_v27  ;;  %v4963_v34 = vld [vmem:[%s5714_s23 + $0x584] ss:$24 sps:$4 sm:$0xff]  }
 0x229   : > { %v4318_v53 = vmul.f32 -1.442695, %v2756_v21  ;;  %v6407_v10 = vadd.f32 %v2759_v62, %v6155_v31  ;;  %v6409_v49 = vpop.f32.mrf.mxu1 }
 0x22a   : > { %v2761_v3 = vpop.f32.mrf.mxu0  ;;  %4986 = vrcp.f32 %v3305_v45 }
 0x22b   : > { %v2762_v28 = vadd.f32 %v2761_v3, %v6161_v32  ;;  %v4975_v43 = vpop.eup %4974  ;;  %4988 = vpow2.f32 %v4318_v53  ;;  %v6412_v16 = vpop.f32.mrf.mxu1 }
 0x22c   : > { %v2763_v12 = vpop.f32.mrf.mxu0  ;;  %v3306_v61 = vadd.f32 1.0, %v4975_v43  ;;  %4990 = vtanh.f32 %v6365_v29  ;;  %v2070_v43 = vadd.f32 %v5926_v0, %v6057_v47 }
 0x22d   : > { %v4319_v6 = vmul.f32 -1.442695, %v2762_v28  ;;  %v6418_v31 = vadd.f32 %v2763_v12, %v6169_v18  ;;  %v6420_v27 = vpop.f32.mrf.mxu1 }
 0x22e   : > { %v2765_v21 = vpop.f32.mrf.mxu0  ;;  %4992 = vrcp.f32 %v3306_v61 }
 0x22f   : > { %v2766_v32 = vadd.f32 %v2765_v21, %v6177_v40  ;;  %v4977_v20 = vpop.eup %4976  ;;  %4994 = vpow2.f32 %v4319_v6  ;;  %v6423_v62 = vpop.f32.mrf.mxu1  ;;  %3008 = vmatmul.mubr.bf16.gmra.mxu0 %v4958_v55 }
 0x230   : > { %7451 = vst [vmem:[#allocation103_spill] sm:$0xff] %v6423_v62  ;;  %v2769_v45 = vpop.f32.mrf.mxu0  ;;  %v3307_v53 = vadd.f32 1.0, %v4977_v20  ;;  %3017 = vmatprep.mubr.bf16.mxu0 %v4963_v34  ;;  %4996 = vtanh.f32 %v6376_v57  ;;  %v4979_v40 = vpop.eup %4978  ;;  %v4961_v57 = vld [vmem:[%s5714_s23 + $0x580] ss:$24 sps:$4 sm:$0xff]   ;;  %v4966_v20 = vld [vmem:[%s5714_s23 + $0x5b4] ss:$24 sps:$4 sm:$0xff]  }
 0x231   : > { %v4320_v3 = vmul.f32 -1.442695, %v2766_v32  ;;  %v6427_v18 = vadd.f32 %v2769_v45, %v6183_v13  ;;  %v6429_v29 = vpop.f32.mrf.mxu1  ;;  %v2423_v13 = vadd.f32 %v6201_v1, %v2070_v43 }
 0x232   : > { %v2771_v28 = vpop.f32.mrf.mxu0  ;;  %4998 = vrcp.f32 %v3307_v53 }
 0x233   : > { %v2772_v12 = vadd.f32 %v2771_v28, %v6189_v44  ;;  %v4981_v55 = vpop.eup %4980  ;;  %5000 = vpow2.f32 %v4320_v3  ;;  %v6434_v61 = vpop.f32.mrf.mxu1 }
 0x234   : > { %7452 = vst [vmem:[#allocation104_spill] sm:$0xff] %v6434_v61  ;;  %v2773_v6 = vpop.f32.mrf.mxu0  ;;  %v4983_v34 = vpop.eup %4982  ;;  %5002 = vtanh.f32 %v6387_v11  ;;  %v6445_v53 = vmul.f32 %v4981_v55, %v4979_v40 }
 0x235   : > { %v4321_v21 = vmul.f32 -1.442695, %v2772_v12  ;;  %v6439_v32 = vadd.f32 %v2773_v6, %v6195_v33  ;;  %v3308_v0 = vadd.f32 1.0, %v4983_v34  ;;  %v6443_v45 = vpop.f32.mrf.mxu1  ;;  %v4985_v3 = vpop.eup %4984 }
 0x236   : > { %v2775_v44 = vpop.f32.mrf.mxu0  ;;  %7453 = vst [vmem:[#allocation105_spill] sm:$0xff] %v6445_v53 }
 0x237   : > { %5004 = vpow2.f32 %v4321_v21  ;;  %v2776_v28 = vadd.f32 %v2775_v44, %v2423_v13  ;;  %v4987_v61 = vpop.eup %4986  ;;  %v6447_v62 = vpop.f32.mrf.mxu1  ;;  %3018 = vmatmul.mubr.bf16.gmra.mxu0 %v4961_v57  ;;  %v2080_v57 = vadd.f32 %v5946_v26, %v6057_v47  ;;  %v4969_v26 = vld [vmem:[%s5714_s23 + $0x5e4] ss:$24 sps:$4 sm:$0xff]  }
 0x238   : > { %5006 = vrcp.f32 %v3308_v0  ;;  %v2779_v1 = vpop.f32.mrf.mxu0  ;;  %v4989_v33 = vpop.eup %4988  ;;  %3027 = vmatprep.mubr.bf16.mxu0 %v4966_v20  ;;  %v6455_v6 = vmul.f32 %v4987_v61, %v4985_v3 }
 0x239   : > { %v4322_v43 = vmul.f32 -1.442695, %v2776_v28  ;;  %v6450_v11 = vadd.f32 %v2779_v1, %v6209_v19  ;;  %5008 = vtanh.f32 %v6396_v35  ;;  %v3309_v40 = vadd.f32 1.0, %v4989_v33  ;;  %v6453_v12 = vpop.f32.mrf.mxu1  ;;  %v4991_v34 = vpop.eup %4990  ;;  %v4964_v35 = vld [vmem:[%s5714_s23 + $0x5b0] ss:$24 sps:$4 sm:$0xff]  }
 0x23a   : > { %v2781_v55 = vpop.f32.mrf.mxu0  ;;  %7454 = vst [vmem:[#allocation106_spill] sm:$0xff] %v6455_v6  ;;  %v2433_v61 = vadd.f32 %v6227_v56, %v2080_v57 }
 0x23b   : > { %5010 = vpow2.f32 %v4322_v43  ;;  %v2782_v13 = vadd.f32 %v2781_v55, %v6215_v46  ;;  %v4993_v21 = vpop.eup %4992  ;;  %v6460_v19 = vpop.f32.mrf.mxu1  ;;  %v7457_v55 = vld [vmem:[#allocation81_spill] sm:$0xff] }
 0x23c   : > { %5012 = vrcp.f32 %v3309_v40  ;;  %7455 = vst [vmem:[#allocation107_spill] sm:$0xff] %v6460_v19  ;;  %v2783_v20 = vpop.f32.mrf.mxu0  ;;  %v4995_v44 = vpop.eup %4994  ;;  %v6473_v43 = vmul.f32 %v4993_v21, %v4991_v34  ;;  %v2184_v0 = vadd.f32 %v7457_v55, %v6048_v41 }
 0x23d   : > { %v4323_v3 = vmul.f32 -1.442695, %v2782_v13  ;;  %v6467_v28 = vadd.f32 %v2783_v20, %v6221_v58  ;;  %5014 = vtanh.f32 %v6407_v10  ;;  %v3310_v46 = vadd.f32 1.0, %v4995_v44  ;;  %v6471_v1 = vpop.f32.mrf.mxu1  ;;  %v4997_v40 = vpop.eup %4996  ;;  %v7458_v10 = vld [vmem:[#allocation82_spill] sm:$0xff] }
 0x23e   : > { %v2785_v33 = vpop.f32.mrf.mxu0  ;;  %7456 = vst [vmem:[#allocation108_spill] sm:$0xff] %v6473_v43  ;;  %v2186_v20 = vadd.f32 %v7458_v10, %v6057_v47 }
 0x23f   : > { %5016 = vpow2.f32 %v4323_v3  ;;  %v2786_v53 = vadd.f32 %v2785_v33, %v2433_v61  ;;  %v4999_v56 = vpop.eup %4998  ;;  %v2536_v57 = vpop.f32.mrf.mxu1  ;;  %3028 = vmatmul.mubr.bf16.gmra.mxu0 %v4964_v35  ;;  %v7460_v33 = vld [vmem:[#allocation83_spill] sm:$0xff] }
 0x240   : > { %5018 = vrcp.f32 %v3310_v46  ;;  %v2789_v58 = vpop.f32.mrf.mxu0  ;;  %v5001_v13 = vpop.eup %5000  ;;  %v6479_v6 = vadd.f32 %v2536_v57, %v2184_v0  ;;  %3037 = vmatprep.mubr.bf16.mxu0 %v4969_v26  ;;  %v6485_v46 = vmul.f32 %v4999_v56, %v4997_v40  ;;  %v2188_v55 = vadd.f32 %v7460_v33, %v6048_v41  ;;  %v7461_v40 = vld [vmem:[#allocation84_spill] sm:$0xff] }
 0x241   : > { %v4324_v44 = vmul.f32 -1.442695, %v2786_v53  ;;  %v6482_v34 = vadd.f32 %v2789_v58, %v6235_v2  ;;  %5020 = vtanh.f32 %v6418_v31  ;;  %v3311_v21 = vadd.f32 1.0, %v5001_v13  ;;  %v2538_v61 = vpop.f32.mrf.mxu1  ;;  %v5003_v35 = vpop.eup %5002  ;;  %v4967_v58 = vld [vmem:[%s5714_s23 + $0x5e0] ss:$24 sps:$4 sm:$0xff]  }
 0x242   : > { %v2791_v3 = vpop.f32.mrf.mxu0  ;;  %7459 = vst [vmem:[#allocation81_spill] sm:$0xff] %v6485_v46  ;;  %v6489_v53 = vadd.f32 %v2538_v61, %v2186_v20  ;;  %v2190_v56 = vadd.f32 %v7461_v40, %v6057_v47 }
 0x243   : > { %5022 = vpow2.f32 %v4324_v44  ;;  %v2792_v0 = vadd.f32 %v2791_v3, %v6241_v9  ;;  %v2540_v57 = vpop.f32.mrf.mxu1  ;;  %v7463_v3 = vld [vmem:[#allocation85_spill] sm:$0xff] }
 0x244   : > { %v5005_v2 = vpop.eup %5004  ;;  %5024 = vrcp.f32 %v3311_v21  ;;  %v2793_v26 = vpop.f32.mrf.mxu0  ;;  %v6497_v33 = vadd.f32 %v2540_v57, %v2188_v55  ;;  %v2194_v31 = vadd.f32 %v7463_v3, %v6048_v41  ;;  %v7464_v57 = vld [vmem:[#allocation86_spill] sm:$0xff] }
 0x245   : > { %v5007_v13 = vpop.eup %5006  ;;  %v3312_v10 = vadd.f32 1.0, %v5005_v2  ;;  %v4325_v19 = vmul.f32 -1.442695, %v2792_v0  ;;  %5026 = vtanh.f32 %v6427_v18  ;;  %v6501_v9 = vadd.f32 %v2793_v26, %v6249_v30  ;;  %v2542_v20 = vpop.f32.mrf.mxu1 }
 0x246   : > { %v2795_v44 = vpop.f32.mrf.mxu0  ;;  %v6503_v21 = vmul.f32 %v5007_v13, %v5003_v35  ;;  %v5009_v61 = vpop.eup %5008  ;;  %v6507_v43 = vadd.f32 %v2542_v20, %v2190_v56  ;;  %v2196_v26 = vadd.f32 %v7464_v57, %v6057_v47 }
 0x247   : > { %5028 = vrcp.f32 %v3312_v10  ;;  %v2796_v0 = vadd.f32 %v2795_v44, %v6256_v52  ;;  %v2546_v2 = vpop.f32.mrf.mxu1  ;;  %3038 = vmatmul.mubr.bf16.gmra.mxu0 %v4967_v58  ;;  %v7466_v58 = vld [vmem:[#allocation87_spill] sm:$0xff] }
 0x248   : > { %7462 = vst [vmem:[#allocation82_spill] sm:$0xff] %v6503_v21  ;;  %v5011_v55 = vpop.eup %5010  ;;  %5030 = vpow2.f32 %v4325_v19  ;;  %v2799_v18 = vpop.f32.mrf.mxu0  ;;  %v6512_v40 = vadd.f32 %v2546_v2, %v2194_v31  ;;  %v2198_v44 = vadd.f32 %v7466_v58, %v6048_v41 }
 0x249   : > { %v5013_v30 = vpop.eup %5012  ;;  %v3313_v35 = vadd.f32 1.0, %v5011_v55  ;;  %v4326_v13 = vmul.f32 -1.442695, %v2796_v0  ;;  %5032 = vtanh.f32 %v6439_v32  ;;  %v6516_v56 = vadd.f32 %v2799_v18, %v6262_v36  ;;  %v2548_v10 = vpop.f32.mrf.mxu1 }
 0x24a   : > { %v2801_v52 = vpop.f32.mrf.mxu0  ;;  %v6518_v20 = vmul.f32 %v5013_v30, %v5009_v61  ;;  %v5015_v19 = vpop.eup %5014  ;;  %v6522_v3 = vadd.f32 %v2548_v10, %v2196_v26  ;;  %v7467_v61 = vld [vmem:[#allocation88_spill] sm:$0xff] }
 0x24b   : > { %5034 = vrcp.f32 %v3313_v35  ;;  %v2802_v0 = vadd.f32 %v2801_v52, %v6268_v38  ;;  %v2550_v55 = vpop.f32.mrf.mxu1  ;;  %v2200_v18 = vadd.f32 %v7467_v61, %v6057_v47  ;;  %v7469_v52 = vld [vmem:[#allocation89_spill] sm:$0xff] }
 0x24c   : > { %7465 = vst [vmem:[#allocation83_spill] sm:$0xff] %v6518_v20  ;;  %v5017_v31 = vpop.eup %5016  ;;  %5036 = vpow2.f32 %v4326_v13  ;;  %v2803_v32 = vpop.f32.mrf.mxu0  ;;  %v6529_v46 = vadd.f32 %v2550_v55, %v2198_v44  ;;  %v2204_v58 = vadd.f32 %v7469_v52, %v6048_v41 }
 0x24d   : > { %v5019_v2 = vpop.eup %5018  ;;  %v3314_v30 = vadd.f32 1.0, %v5017_v31  ;;  %v4327_v57 = vmul.f32 -1.442695, %v2802_v0  ;;  %5038 = vtanh.f32 %v6450_v11  ;;  %v6533_v26 = vadd.f32 %v2803_v32, %v6275_v22  ;;  %v2552_v38 = vpop.f32.mrf.mxu1  ;;  %v7470_v22 = vld [vmem:[#allocation90_spill] sm:$0xff] }
 0x24e   : > { %v2805_v35 = vpop.f32.mrf.mxu0  ;;  %v6535_v13 = vmul.f32 %v5019_v2, %v5015_v19  ;;  %v5021_v10 = vpop.eup %5020  ;;  %v6539_v36 = vadd.f32 %v2552_v38, %v2200_v18  ;;  %v2206_v32 = vadd.f32 %v7470_v22, %v6057_v47 }
 0x24f   : > { %5040 = vrcp.f32 %v3314_v30  ;;  %v2806_v0 = vadd.f32 %v2805_v35, %v6282_v39  ;;  %v2556_v31 = vpop.f32.mrf.mxu1  ;;  %v7472_v35 = vld [vmem:[#allocation91_spill] sm:$0xff] }
 0x250   : > { %7468 = vst [vmem:[#allocation84_spill] sm:$0xff] %v6535_v13  ;;  %v5023_v44 = vpop.eup %5022  ;;  %5042 = vpow2.f32 %v4327_v57  ;;  %v2809_v11 = vpop.f32.mrf.mxu0  ;;  %v6544_v2 = vadd.f32 %v2556_v31, %v2204_v58  ;;  %v2208_v52 = vadd.f32 %v7472_v35, %v6048_v41  ;;  %v7475_v35 = vld [vmem:[#allocation93_spill] sm:$0xff] }
 0x251   : > { %v5025_v55 = vpop.eup %5024  ;;  %v3315_v61 = vadd.f32 1.0, %v5023_v44  ;;  %v4328_v19 = vmul.f32 -1.442695, %v2806_v0  ;;  %5044 = vtanh.f32 %v6467_v28  ;;  %v6548_v30 = vadd.f32 %v2809_v11, %v6288_v54  ;;  %v2558_v18 = vpop.f32.mrf.mxu1 }
 0x252   : > { %v2811_v38 = vpop.f32.mrf.mxu0  ;;  %v6550_v39 = vmul.f32 %v5025_v55, %v5021_v10  ;;  %v5027_v57 = vpop.eup %5026  ;;  %v6554_v21 = vadd.f32 %v2558_v18, %v2206_v32  ;;  %v7473_v10 = vld [vmem:[#allocation92_spill] sm:$0xff]  ;;  %v2214_v54 = vadd.f32 %v7475_v35, %v6048_v41 }
 0x253   : > { %5046 = vrcp.f32 %v3315_v61  ;;  %v2812_v0 = vadd.f32 %v2811_v38, %v6294_v60  ;;  %v2560_v44 = vpop.f32.mrf.mxu1  ;;  %v2210_v11 = vadd.f32 %v7473_v10, %v6057_v47 }
 0x254   : > { %7471 = vst [vmem:[#allocation85_spill] sm:$0xff] %v6550_v39  ;;  %v5029_v58 = vpop.eup %5028  ;;  %5048 = vpow2.f32 %v4328_v19  ;;  %v2813_v28 = vpop.f32.mrf.mxu0  ;;  %v6561_v22 = vadd.f32 %v2560_v44, %v2208_v52 }
 0x255   : > { %v5031_v31 = vpop.eup %5030  ;;  %v4329_v55 = vmul.f32 -1.442695, %v2812_v0  ;;  %v6564_v61 = vadd.f32 %v2813_v28, %v6301_v7  ;;  %5050 = vtanh.f32 %v6482_v34  ;;  %v2562_v32 = vpop.f32.mrf.mxu1  ;;  %v6567_v18 = vmul.f32 %v5029_v58, %v5027_v57  ;;  %v7476_v34 = vld [vmem:[#allocation94_spill] sm:$0xff] }
 0x256   : > { %v3316_v60 = vadd.f32 1.0, %v5031_v31  ;;  %v2815_v19 = vpop.f32.mrf.mxu0  ;;  %v5033_v38 = vpop.eup %5032  ;;  %v6571_v20 = vadd.f32 %v2562_v32, %v2210_v11  ;;  %v2216_v31 = vadd.f32 %v7476_v34, %v6057_v47 }
 0x257   : > { %7474 = vst [vmem:[#allocation86_spill] sm:$0xff] %v6567_v18  ;;  %5052 = vpow2.f32 %v4329_v55  ;;  %v2816_v52 = vadd.f32 %v2815_v19, %v6308_v15  ;;  %v2566_v7 = vpop.f32.mrf.mxu1  ;;  %v7478_v19 = vld [vmem:[#allocation95_spill] sm:$0xff] }
 0x258   : > { %v5035_v0 = vpop.eup %5034  ;;  %5054 = vrcp.f32 %v3316_v60  ;;  %v2819_v44 = vpop.f32.mrf.mxu0  ;;  %v6576_v57 = vadd.f32 %v2566_v7, %v2214_v54  ;;  %v2218_v35 = vadd.f32 %v7478_v19, %v6048_v41  ;;  %v7481_v19 = vld [vmem:[#allocation97_spill] sm:$0xff] }
 0x259   : > { %v5037_v28 = vpop.eup %5036  ;;  %v4330_v10 = vmul.f32 -1.442695, %v2816_v52  ;;  %v6579_v58 = vadd.f32 %v2819_v44, %v6314_v42  ;;  %5056 = vtanh.f32 %v6501_v9  ;;  %v2568_v55 = vpop.f32.mrf.mxu1  ;;  %v6582_v15 = vmul.f32 %v5035_v0, %v5033_v38  ;;  %v7479_v38 = vld [vmem:[#allocation96_spill] sm:$0xff] }
 0x25a   : > { %v3317_v11 = vadd.f32 1.0, %v5037_v28  ;;  %v2821_v32 = vpop.f32.mrf.mxu0  ;;  %v5039_v60 = vpop.eup %5038  ;;  %v6586_v13 = vadd.f32 %v2568_v55, %v2216_v31  ;;  %v2220_v0 = vadd.f32 %v7479_v38, %v6057_v47  ;;  %v2224_v9 = vadd.f32 %v7481_v19, %v6048_v41  ;;  %v7488_v19 = vld [vmem:[#allocation99_spill] sm:$0xff] }
 0x25b   : > { %7477 = vst [vmem:[#allocation87_spill] sm:$0xff] %v6582_v15  ;;  %5058 = vpow2.f32 %v4330_v10  ;;  %v2822_v54 = vadd.f32 %v2821_v32, %v6320_v37  ;;  %v2570_v42 = vpop.f32.mrf.mxu1 }
 0x25c   : > { %v5041_v52 = vpop.eup %5040  ;;  %5060 = vrcp.f32 %v3317_v11  ;;  %v2823_v7 = vpop.f32.mrf.mxu0  ;;  %v6593_v34 = vadd.f32 %v2570_v42, %v2218_v35 }
 0x25d   : > { %v5043_v44 = vpop.eup %5042  ;;  %v4331_v28 = vmul.f32 -1.442695, %v2822_v54  ;;  %v6596_v10 = vadd.f32 %v2823_v7, %v6327_v14  ;;  %5062 = vtanh.f32 %v6516_v56  ;;  %v2572_v31 = vpop.f32.mrf.mxu1  ;;  %v6599_v55 = vmul.f32 %v5041_v52, %v5039_v60  ;;  %v7483_v54 = vld [vmem:[#allocation101_spill] sm:$0xff]  ;;  %v7484_v56 = vld [vmem:[#allocation98_spill] sm:$0xff] }
 0x25e   : > { %v3318_v37 = vadd.f32 1.0, %v5043_v44  ;;  %v2825_v11 = vpop.f32.mrf.mxu0  ;;  %v5045_v32 = vpop.eup %5044  ;;  %v6603_v39 = vadd.f32 %v2572_v31, %v2220_v0  ;;  %v2226_v44 = vadd.f32 %v7484_v56, %v6057_v47  ;;  %v7486_v52 = vld [vmem:[#allocation102_spill] sm:$0xff] }
 0x25f   : > { %7480 = vst [vmem:[#allocation88_spill] sm:$0xff] %v6599_v55  ;;  %5064 = vpow2.f32 %v4331_v28  ;;  %v2826_v35 = vadd.f32 %v2825_v11, %v7483_v54  ;;  %v2576_v14 = vpop.f32.mrf.mxu1  ;;  %v2228_v54 = vadd.f32 %v7488_v19, %v6048_v41 }
 0x260   : > { %7482 = vst [vmem:[#allocation89_spill] sm:$0xff] %v6603_v39  ;;  %v5047_v42 = vpop.eup %5046  ;;  %5066 = vrcp.f32 %v3318_v37  ;;  %v2829_v7 = vpop.f32.mrf.mxu0  ;;  %v6608_v60 = vadd.f32 %v2576_v14, %v2224_v9 }
 0x261   : > { %v5049_v38 = vpop.eup %5048  ;;  %v4332_v18 = vmul.f32 -1.442695, %v2826_v35  ;;  %v6611_v15 = vadd.f32 %v2829_v7, %v7486_v52  ;;  %5068 = vtanh.f32 %v6533_v26  ;;  %v2578_v28 = vpop.f32.mrf.mxu1  ;;  %v6614_v11 = vmul.f32 %v5047_v42, %v5045_v32  ;;  %v7489_v32 = vld [vmem:[#allocation100_spill] sm:$0xff] }
 0x262   : > { %7485 = vst [vmem:[#allocation90_spill] sm:$0xff] %v6608_v60  ;;  %v3319_v0 = vadd.f32 1.0, %v5049_v38  ;;  %v2831_v31 = vpop.f32.mrf.mxu0  ;;  %v5051_v37 = vpop.eup %5050  ;;  %v6618_v39 = vadd.f32 %v2578_v28, %v2226_v44  ;;  %v2230_v42 = vadd.f32 %v7489_v32, %v6057_v47  ;;  %v7492_v26 = vld [vmem:[#allocation64_spill] sm:$0xff] }
 0x263   : > { %7487 = vst [vmem:[#allocation91_spill] sm:$0xff] %v6614_v11  ;;  %5070 = vpow2.f32 %v4332_v18  ;;  %v2832_v9 = vadd.f32 %v2831_v31, %v6345_v25  ;;  %v2580_v14 = vpop.f32.mrf.mxu1  ;;  %v7490_v18 = vld [vmem:[#allocation17_spill] sm:$0xff]  ;;  %v2136_v32 = vadd.f32 %v7492_v26, %v6057_v47  ;;  %v7495_v26 = vld [vmem:[#allocation19_spill] sm:$0xff] }
 0x264   : > { %v5053_v35 = vpop.eup %5052  ;;  %5072 = vrcp.f32 %v3319_v0  ;;  %v2833_v7 = vpop.f32.mrf.mxu0  ;;  %v6625_v60 = vadd.f32 %v2580_v14, %v2228_v54  ;;  %v2234_v44 = vadd.f32 %v7490_v18, %v6048_v41  ;;  %v7493_v14 = vld [vmem:[#allocation18_spill] sm:$0xff] }
 0x265   : > { %v5055_v38 = vpop.eup %5054  ;;  %v3320_v56 = vadd.f32 1.0, %v5053_v35  ;;  %v4333_v52 = vmul.f32 -1.442695, %v2832_v9  ;;  %5074 = vtanh.f32 %v6548_v30  ;;  %v6631_v25 = vadd.f32 %v2833_v7, %v6351_v48  ;;  %v2582_v0 = vpop.f32.mrf.mxu1 }
 0x266   : > { %v2835_v28 = vpop.f32.mrf.mxu0  ;;  %v6633_v31 = vmul.f32 %v5055_v38, %v5051_v37  ;;  %v5057_v19 = vpop.eup %5056  ;;  %v6637_v9 = vadd.f32 %v2582_v0, %v2230_v42  ;;  %v2236_v30 = vadd.f32 %v7493_v14, %v6057_v47  ;;  %v2489_v37 = vadd.f32 %v6367_v4, %v2136_v32  ;;  %v7496_v14 = vld [vmem:[#allocation65_spill] sm:$0xff] }
 0x267   : > { %5076 = vrcp.f32 %v3320_v56  ;;  %v2836_v54 = vadd.f32 %v2835_v28, %v6359_v23  ;;  %v2586_v48 = vpop.f32.mrf.mxu1  ;;  %v2238_v42 = vadd.f32 %v7495_v26, %v6048_v41  ;;  %v2140_v4 = vadd.f32 %v7496_v14, %v6057_v47 }
 0x268   : > { %7491 = vst [vmem:[#allocation92_spill] sm:$0xff] %v6633_v31  ;;  %v5059_v35 = vpop.eup %5058  ;;  %5078 = vpow2.f32 %v4333_v52  ;;  %v2839_v7 = vpop.f32.mrf.mxu0  ;;  %v6643_v11 = vadd.f32 %v2586_v48, %v2234_v44 }
 0x269   : > { %v5061_v18 = vpop.eup %5060  ;;  %v3321_v38 = vadd.f32 1.0, %v5059_v35  ;;  %v4334_v55 = vmul.f32 -1.442695, %v2836_v54  ;;  %5080 = vtanh.f32 %v6564_v61  ;;  %v6649_v23 = vadd.f32 %v2839_v7, %v6362_v51  ;;  %v2588_v56 = vpop.f32.mrf.mxu1  ;;  %v7497_v35 = vld [vmem:[#allocation20_spill] sm:$0xff]  ;;  %v7499_v7 = vld [vmem:[#allocation66_spill] sm:$0xff] }
 0x26a   : > { %7494 = vst [vmem:[#allocation93_spill] sm:$0xff] %v6643_v11  ;;  %v2841_v0 = vpop.f32.mrf.mxu0  ;;  %v6651_v52 = vmul.f32 %v5061_v18, %v5057_v19  ;;  %v5063_v28 = vpop.eup %5062  ;;  %v6655_v32 = vadd.f32 %v2588_v56, %v2236_v30  ;;  %v2240_v48 = vadd.f32 %v7497_v35, %v6057_v47  ;;  %v2493_v18 = vadd.f32 %v6379_v5, %v2140_v4  ;;  %v7498_v30 = vld [vmem:[#allocation21_spill] sm:$0xff] }
 0x26b   : > { %5082 = vrcp.f32 %v3321_v38  ;;  %v2842_v44 = vadd.f32 %v2841_v0, %v2489_v37  ;;  %v2590_v61 = vpop.f32.mrf.mxu1  ;;  %v2244_v37 = vadd.f32 %v7498_v30, %v6048_v41  ;;  %v2146_v5 = vadd.f32 %v7499_v7, %v6057_v47  ;;  %v7502_v7 = vld [vmem:[#allocation23_spill] sm:$0xff] }
 0x26c   : > { %v5065_v54 = vpop.eup %5064  ;;  %5084 = vpow2.f32 %v4334_v55  ;;  %v2843_v51 = vpop.f32.mrf.mxu0  ;;  %v6662_v14 = vadd.f32 %v2590_v61, %v2238_v42 }
 0x26d   : > { %v5067_v19 = vpop.eup %5066  ;;  %v3322_v26 = vadd.f32 1.0, %v5065_v54  ;;  %v4335_v11 = vmul.f32 -1.442695, %v2842_v44  ;;  %5086 = vtanh.f32 %v6579_v58  ;;  %v6668_v38 = vadd.f32 %v2843_v51, %v6373_v50  ;;  %v2592_v55 = vpop.f32.mrf.mxu1  ;;  %v7500_v54 = vld [vmem:[#allocation22_spill] sm:$0xff] }
 0x26e   : > { %v2845_v56 = vpop.f32.mrf.mxu0  ;;  %v6670_v0 = vmul.f32 %v5067_v19, %v5063_v28  ;;  %v5069_v35 = vpop.eup %5068  ;;  %v6674_v4 = vadd.f32 %v2592_v55, %v2240_v48  ;;  %v2246_v61 = vadd.f32 %v7500_v54, %v6057_v47  ;;  %v2499_v30 = vadd.f32 %v6389_v59, %v2146_v5  ;;  %v7503_v54 = vld [vmem:[#allocation68_spill] sm:$0xff] }
 0x26f   : > { %5088 = vrcp.f32 %v3322_v26  ;;  %v2846_v42 = vadd.f32 %v2845_v56, %v2493_v18  ;;  %v2596_v58 = vpop.f32.mrf.mxu1  ;;  %v2248_v26 = vadd.f32 %v7502_v7, %v6048_v41  ;;  %v2150_v59 = vadd.f32 %v7503_v54, %v6057_v47 }
 0x270   : > { %v5071_v44 = vpop.eup %5070  ;;  %5090 = vpow2.f32 %v4335_v11  ;;  %v2849_v50 = vpop.f32.mrf.mxu0  ;;  %v6679_v31 = vadd.f32 %v2596_v58, %v2244_v37 }
 0x271   : > { %v5073_v51 = vpop.eup %5072  ;;  %v3323_v28 = vadd.f32 1.0, %v5071_v44  ;;  %v4336_v19 = vmul.f32 -1.442695, %v2846_v42  ;;  %5092 = vtanh.f32 %v6596_v10  ;;  %v6685_v48 = vadd.f32 %v2849_v50, %v6384_v24  ;;  %v2598_v18 = vpop.f32.mrf.mxu1 }
 0x272   : > { %7501 = vst [vmem:[#allocation94_spill] sm:$0xff] %v6679_v31  ;;  %v2851_v55 = vpop.f32.mrf.mxu0  ;;  %v6687_v11 = vmul.f32 %v5073_v51, %v5069_v35  ;;  %v5075_v56 = vpop.eup %5074  ;;  %v6691_v5 = vadd.f32 %v2598_v18, %v2246_v61  ;;  %v7505_v35 = vld [vmem:[#allocation24_spill] sm:$0xff]  ;;  %v2503_v51 = vadd.f32 %v6400_v17, %v2150_v59  ;;  %v7507_v61 = vld [vmem:[#allocation25_spill] sm:$0xff] }
 0x273   : > { %5094 = vrcp.f32 %v3323_v28  ;;  %v2852_v37 = vadd.f32 %v2851_v55, %v2499_v30  ;;  %v2600_v44 = vpop.f32.mrf.mxu1  ;;  %v2250_v50 = vadd.f32 %v7505_v35, %v6057_v47  ;;  %v2254_v30 = vadd.f32 %v7507_v61, %v6048_v41 }
 0x274   : > { %7504 = vst [vmem:[#allocation95_spill] sm:$0xff] %v6691_v5  ;;  %v5077_v42 = vpop.eup %5076  ;;  %5096 = vpow2.f32 %v4336_v19  ;;  %v6693_v58 = vpop.f32.mrf.mxu0  ;;  %v6700_v54 = vadd.f32 %v2600_v44, %v2248_v26  ;;  %v7509_v5 = vld [vmem:[#allocation70_spill] sm:$0xff] }
 0x275   : > { %v5079_v10 = vpop.eup %5078  ;;  %v4337_v7 = vmul.f32 -1.442695, %v2852_v37  ;;  %5098 = vtanh.f32 %v6611_v15  ;;  %v2602_v19 = vpop.f32.mrf.mxu1  ;;  %v6705_v55 = vmul.f32 %v5077_v42, %v5075_v56  ;;  %v2156_v31 = vadd.f32 %v7509_v5, %v6057_v47  ;;  %v7511_v15 = vld [vmem:[#allocation26_spill] sm:$0xff]  ;;  %v7513_v5 = vld [vmem:[#allocation27_spill] sm:$0xff] }
 0x276   : > { %7506 = vst [vmem:[#allocation96_spill] sm:$0xff] %v6700_v54  ;;  %v3324_v28 = vadd.f32 1.0, %v5079_v10  ;;  %v2855_v18 = vpop.f32.mrf.mxu0  ;;  %v5081_v24 = vpop.eup %5080  ;;  %v6709_v35 = vadd.f32 %v2602_v19, %v2250_v50  ;;  %v2256_v10 = vadd.f32 %v7511_v15, %v6057_v47 }
 0x277   : > { %7508 = vst [vmem:[#allocation97_spill] sm:$0xff] %v6705_v55  ;;  %5100 = vpow2.f32 %v4337_v7  ;;  %v2856_v17 = vadd.f32 %v2855_v18, %v2503_v51  ;;  %v2606_v59 = vpop.f32.mrf.mxu1  ;;  %v2509_v56 = vadd.f32 %v6409_v49, %v2156_v31  ;;  %v2258_v7 = vadd.f32 %v7513_v5, %v6048_v41  ;;  %v7521_v55 = vld [vmem:[#allocation74_spill] sm:$0xff] }
 0x278   : > { %7510 = vst [vmem:[#allocation101_spill] sm:$0xff] %v6709_v35  ;;  %v5083_v26 = vpop.eup %5082  ;;  %5102 = vrcp.f32 %v3324_v28  ;;  %v6711_v37 = vpop.f32.mrf.mxu0  ;;  %v6716_v61 = vadd.f32 %v2606_v59, %v2254_v30  ;;  %v7515_v35 = vld [vmem:[#allocation72_spill] sm:$0xff] }
 0x279   : > { %v5085_v44 = vpop.eup %5084  ;;  %v4338_v42 = vmul.f32 -1.442695, %v2856_v17  ;;  %5104 = vtanh.f32 %v6631_v25  ;;  %v2608_v51 = vpop.f32.mrf.mxu1  ;;  %v6721_v19 = vmul.f32 %v5083_v26, %v5081_v24  ;;  %v2160_v54 = vadd.f32 %v7515_v35, %v6057_v47  ;;  %v7517_v24 = vld [vmem:[#allocation28_spill] sm:$0xff] }
 0x27a   : > { %7512 = vst [vmem:[#allocation98_spill] sm:$0xff] %v6716_v61  ;;  %v3325_v50 = vadd.f32 1.0, %v5085_v44  ;;  %v2861_v28 = vpop.f32.mrf.mxu0  ;;  %v5087_v18 = vpop.eup %5086  ;;  %v6725_v15 = vadd.f32 %v2608_v51, %v2256_v10  ;;  %v2260_v26 = vadd.f32 %v7517_v24, %v6057_v47  ;;  %v7519_v10 = vld [vmem:[#allocation29_spill] sm:$0xff] }
 0x27b   : > { %7514 = vst [vmem:[#allocation102_spill] sm:$0xff] %v6721_v19  ;;  %5106 = vpow2.f32 %v4338_v42  ;;  %v2862_v49 = vadd.f32 %v2861_v28, %v2509_v56  ;;  %v2610_v30 = vpop.f32.mrf.mxu1  ;;  %v2513_v44 = vadd.f32 %v6420_v27, %v2160_v54  ;;  %v2264_v56 = vadd.f32 %v7519_v10, %v6048_v41 }
 0x27c   : > { %7516 = vst [vmem:[#allocation99_spill] sm:$0xff] %v6725_v15  ;;  %v5089_v31 = vpop.eup %5088  ;;  %5108 = vrcp.f32 %v3325_v50  ;;  %v6727_v17 = vpop.f32.mrf.mxu0  ;;  %v6734_v35 = vadd.f32 %v2610_v30, %v2258_v7  ;;  %v2166_v19 = vadd.f32 %v7521_v55, %v6057_v47  ;;  %v7523_v7 = vld [vmem:[#allocation30_spill] sm:$0xff]  ;;  %v7524_v30 = vld [vmem:[#allocation31_spill] sm:$0xff]  ;;  %v7528_v15 = vld [vmem:[#allocation76_spill] sm:$0xff] }
 0x27d   : > { %v5091_v59 = vpop.eup %5090  ;;  %v4339_v5 = vmul.f32 -1.442695, %v2862_v49  ;;  %5110 = vtanh.f32 %v6649_v23  ;;  %v2612_v50 = vpop.f32.mrf.mxu1  ;;  %v6739_v28 = vmul.f32 %v5089_v31, %v5087_v18  ;;  %v2266_v49 = vadd.f32 %v7523_v7, %v6057_v47  ;;  %v7525_v31 = vld [vmem:[#allocation32_spill] sm:$0xff] }
 0x27e   : > { %7518 = vst [vmem:[#allocation100_spill] sm:$0xff] %v6734_v35  ;;  %v3326_v42 = vadd.f32 1.0, %v5091_v59  ;;  %v2865_v51 = vpop.f32.mrf.mxu0  ;;  %v5093_v25 = vpop.eup %5092  ;;  %v6743_v24 = vadd.f32 %v2612_v50, %v2260_v26  ;;  %v2268_v23 = vadd.f32 %v7524_v30, %v6048_v41  ;;  %v2270_v35 = vadd.f32 %v7525_v31, %v6057_v47 }
 0x27f   : > { %7520 = vst [vmem:[#allocation17_spill] sm:$0xff] %v6739_v28  ;;  %5112 = vpow2.f32 %v4339_v5  ;;  %v2866_v27 = vadd.f32 %v2865_v51, %v2513_v44  ;;  %v2616_v59 = vpop.f32.mrf.mxu1  ;;  %v2519_v55 = vadd.f32 %v6429_v29, %v2166_v19  ;;  %v7526_v44 = vld [vmem:[#allocation67_spill] sm:$0xff]  ;;  %v2170_v61 = vadd.f32 %v7528_v15, %v6057_v47 }
 0x280   : > { %7522 = vst [vmem:[#allocation64_spill] sm:$0xff] %v6743_v24  ;;  %v5095_v54 = vpop.eup %5094  ;;  %5114 = vrcp.f32 %v3326_v42  ;;  %v6749_v10 = vpop.f32.mrf.mxu0  ;;  %v6754_v5 = vadd.f32 %v2616_v59, %v2264_v56  ;;  %v2148_v50 = vadd.f32 %v7526_v44, %v6048_v41  ;;  %v7529_v56 = vld [vmem:[#allocation33_spill] sm:$0xff] }
 0x281   : > { %v5097_v18 = vpop.eup %5096  ;;  %v4340_v26 = vmul.f32 -1.442695, %v2866_v27  ;;  %5116 = vtanh.f32 %v6668_v38  ;;  %v2618_v7 = vpop.f32.mrf.mxu1  ;;  %v6759_v30 = vmul.f32 %v5095_v54, %v5093_v25  ;;  %v2274_v27 = vadd.f32 %v7529_v56, %v6048_v41  ;;  %v7531_v25 = vld [vmem:[#allocation78_spill] sm:$0xff] }
 0x282   : > { %v3327_v51 = vadd.f32 1.0, %v5097_v18  ;;  %v2871_v42 = vpop.f32.mrf.mxu0  ;;  %v5099_v24 = vpop.eup %5098  ;;  %v6763_v31 = vadd.f32 %v2618_v7, %v2266_v49  ;;  %v2501_v59 = vadd.f32 %v6392_v63, %v2148_v50  ;;  %v2523_v15 = vadd.f32 %v6443_v45, %v2170_v61 }
 0x283   : > { %7527 = vst [vmem:[#allocation18_spill] sm:$0xff] %v6759_v30  ;;  %5118 = vpow2.f32 %v4340_v26  ;;  %v2872_v29 = vadd.f32 %v2871_v42, %v2519_v55  ;;  %v2620_v38 = vpop.f32.mrf.mxu1  ;;  %v7530_v55 = vld [vmem:[#allocation69_spill] sm:$0xff]  ;;  %v2176_v28 = vadd.f32 %v7531_v25, %v6057_v47 }
 0x284   : > { %v5101_v19 = vpop.eup %5100  ;;  %5120 = vrcp.f32 %v3327_v51  ;;  %v6768_v18 = vpop.f32.mrf.mxu0  ;;  %v6773_v44 = vadd.f32 %v2620_v38, %v2268_v23  ;;  %v2154_v7 = vadd.f32 %v7530_v55, %v6048_v41  ;;  %v2854_v63 = vadd.f32 %v6693_v58, %v2501_v59 }
 0x285   : > { %v5103_v54 = vpop.eup %5102  ;;  %v3328_v26 = vadd.f32 1.0, %v5101_v19  ;;  %v4341_v49 = vmul.f32 -1.442695, %v2872_v29  ;;  %5122 = vtanh.f32 %v6685_v48  ;;  %v2622_v50 = vpop.f32.mrf.mxu1  ;;  %v7532_v29 = vld [vmem:[#allocation34_spill] sm:$0xff]  ;;  %v7533_v48 = vld [vmem:[#allocation35_spill] sm:$0xff]  ;;  %v2529_v25 = vadd.f32 %v6453_v12, %v2176_v28 }
 0x286   : > { %v2875_v51 = vpop.f32.mrf.mxu0  ;;  %v6779_v42 = vmul.f32 %v5103_v54, %v5099_v24  ;;  %v5105_v56 = vpop.eup %5104  ;;  %v6783_v45 = vadd.f32 %v2622_v50, %v2270_v35  ;;  %v2276_v19 = vadd.f32 %v7532_v29, %v6057_v47  ;;  %v2278_v38 = vadd.f32 %v7533_v48, %v6048_v41 }
 0x287   : > { %5124 = vrcp.f32 %v3328_v26  ;;  %v2876_v61 = vadd.f32 %v2875_v51, %v2523_v15  ;;  %v2507_v58 = vadd.f32 %v6403_v8, %v2154_v7  ;;  %v2626_v24 = vpop.f32.mrf.mxu1  ;;  %v7534_v15 = vld [vmem:[#allocation71_spill] sm:$0xff]  ;;  %v7535_v7 = vld [vmem:[#allocation80_spill] sm:$0xff] }
 0x288   : > { %v5107_v23 = vpop.eup %5106  ;;  %5126 = vpow2.f32 %v4341_v49  ;;  %v6790_v59 = vpop.f32.mrf.mxu0  ;;  %v6793_v55 = vadd.f32 %v2626_v24, %v2274_v27  ;;  %v2158_v50 = vadd.f32 %v7534_v15, %v6048_v41  ;;  %v2180_v30 = vadd.f32 %v7535_v7, %v6057_v47 }
 0x289   : > { %v5109_v54 = vpop.eup %5108  ;;  %v3329_v26 = vadd.f32 1.0, %v5107_v23  ;;  %v4342_v35 = vmul.f32 -1.442695, %v2876_v61  ;;  %5128 = vtanh.f32 %v2854_v63  ;;  %v2860_v51 = vadd.f32 %v6711_v37, %v2507_v58  ;;  %v2628_v29 = vpop.f32.mrf.mxu1  ;;  %v7537_v61 = vld [vmem:[#allocation36_spill] sm:$0xff] }
 0x28a   : > { %v2881_v48 = vpop.f32.mrf.mxu0  ;;  %v6798_v8 = vmul.f32 %v5109_v54, %v5105_v56  ;;  %v5111_v49 = vpop.eup %5110  ;;  %v6802_v12 = vadd.f32 %v2628_v29, %v2276_v19  ;;  %v2280_v23 = vadd.f32 %v7537_v61, %v6057_v47  ;;  %v2511_v63 = vadd.f32 %v6412_v16, %v2158_v50  ;;  %v7540_v61 = vld [vmem:[#allocation37_spill] sm:$0xff] }
 0x28b   : > { %5130 = vrcp.f32 %v3329_v26  ;;  %v2882_v28 = vadd.f32 %v2881_v48, %v2529_v25  ;;  %v2630_v37 = vpop.f32.mrf.mxu1  ;;  %v2533_v54 = vadd.f32 %v6471_v1, %v2180_v30  ;;  %v7539_v25 = vld [vmem:[#allocation73_spill] sm:$0xff]  ;;  %v2284_v56 = vadd.f32 %v7540_v61, %v6048_v41 }
 0x28c   : > { %7536 = vst [vmem:[#allocation19_spill] sm:$0xff] %v6802_v12  ;;  %v5113_v27 = vpop.eup %5112  ;;  %5132 = vpow2.f32 %v4342_v35  ;;  %v6807_v58 = vpop.f32.mrf.mxu0  ;;  %v6812_v15 = vadd.f32 %v2630_v37, %v2278_v38  ;;  %v2164_v29 = vadd.f32 %v7539_v25, %v6048_v41  ;;  %v2864_v16 = vadd.f32 %v6727_v17, %v2511_v63  ;;  %v7542_v37 = vld [vmem:[#allocation103_spill] sm:$0xff] }
 0x28d   : > { %v5115_v24 = vpop.eup %5114  ;;  %v3330_v26 = vadd.f32 1.0, %v5113_v27  ;;  %v4343_v19 = vmul.f32 -1.442695, %v2882_v28  ;;  %5134 = vtanh.f32 %v2860_v51  ;;  %v2632_v35 = vpop.f32.mrf.mxu1  ;;  %v7541_v28 = vld [vmem:[#allocation38_spill] sm:$0xff] }
 0x28e   : > { %7538 = vst [vmem:[#allocation65_spill] sm:$0xff] %v6812_v15  ;;  %v2885_v50 = vpop.f32.mrf.mxu0  ;;  %v6817_v48 = vmul.f32 %v5115_v24, %v5111_v49  ;;  %v5117_v7 = vpop.eup %5116  ;;  %v6821_v1 = vadd.f32 %v2632_v35, %v2280_v23  ;;  %v2286_v27 = vadd.f32 %v7541_v28, %v6057_v47  ;;  %v2517_v51 = vadd.f32 %v7542_v37, %v2164_v29  ;;  %v7543_v49 = vld [vmem:[#allocation75_spill] sm:$0xff] }
 0x28f   : > { %5136 = vrcp.f32 %v3330_v26  ;;  %v2886_v30 = vadd.f32 %v2885_v50, %v2533_v54  ;;  %v2636_v17 = vpop.f32.mrf.mxu1  ;;  %v2168_v24 = vadd.f32 %v7543_v49, %v6048_v41  ;;  %v7544_v50 = vld [vmem:[#allocation39_spill] sm:$0xff] }
 0x290   : > { %v5119_v38 = vpop.eup %5118  ;;  %5138 = vpow2.f32 %v4343_v19  ;;  %v2889_v63 = vpop.f32.mrf.mxu0  ;;  %v6828_v61 = vadd.f32 %v2636_v17, %v2284_v56  ;;  %v2870_v23 = vadd.f32 %v6749_v10, %v2517_v51  ;;  %v2288_v28 = vadd.f32 %v7544_v50, %v6048_v41 }
 0x291   : > { %v5121_v25 = vpop.eup %5120  ;;  %v3331_v15 = vadd.f32 1.0, %v5119_v38  ;;  %v4344_v12 = vmul.f32 -1.442695, %v2886_v30  ;;  %5140 = vtanh.f32 %v2864_v16  ;;  %v6832_v54 = vadd.f32 %v2889_v63, %v6479_v6  ;;  %v2638_v26 = vpop.f32.mrf.mxu1  ;;  %v7545_v16 = vld [vmem:[#allocation40_spill] sm:$0xff] }
 0x292   : > { %v2891_v35 = vpop.f32.mrf.mxu0  ;;  %v6834_v29 = vmul.f32 %v5121_v25, %v5117_v7  ;;  %v5123_v19 = vpop.eup %5122  ;;  %v6838_v37 = vadd.f32 %v2638_v26, %v2286_v27  ;;  %v2290_v10 = vadd.f32 %v7545_v16, %v6057_v47  ;;  %v7546_v38 = vld [vmem:[#allocation104_spill] sm:$0xff]  ;;  %v7547_v25 = vld [vmem:[#allocation77_spill] sm:$0xff] }
 0x293   : > { %5142 = vrcp.f32 %v3331_v15  ;;  %v2892_v56 = vadd.f32 %v2891_v35, %v6489_v53  ;;  %v2521_v6 = vadd.f32 %v7546_v38, %v2168_v24  ;;  %v2640_v51 = vpop.f32.mrf.mxu1  ;;  %v2174_v15 = vadd.f32 %v7547_v25, %v6048_v41  ;;  %v7548_v38 = vld [vmem:[#allocation41_spill] sm:$0xff] }
 0x294   : > { %v5125_v30 = vpop.eup %5124  ;;  %5144 = vpow2.f32 %v4344_v12  ;;  %v2893_v17 = vpop.f32.mrf.mxu0  ;;  %v6848_v49 = vadd.f32 %v2640_v51, %v2288_v28  ;;  %v2294_v7 = vadd.f32 %v7548_v38, %v6048_v41 }
 0x295   : > { %v5127_v63 = vpop.eup %5126  ;;  %v4345_v27 = vmul.f32 -1.442695, %v2892_v56  ;;  %v6851_v53 = vadd.f32 %v2893_v17, %v6497_v33  ;;  %5146 = vtanh.f32 %v2870_v23  ;;  %v2874_v24 = vadd.f32 %v6768_v18, %v2521_v6  ;;  %v2642_v12 = vpop.f32.mrf.mxu1  ;;  %v7549_v6 = vld [vmem:[#allocation79_spill] sm:$0xff] }
 0x296   : > { %v3332_v26 = vadd.f32 1.0, %v5127_v63  ;;  %v2895_v35 = vpop.f32.mrf.mxu0  ;;  %v6854_v50 = vmul.f32 %v5125_v30, %v5123_v19  ;;  %v5129_v16 = vpop.eup %5128  ;;  %v6858_v25 = vadd.f32 %v2642_v12, %v2290_v10  ;;  %v2527_v33 = vadd.f32 %v6447_v62, %v2174_v15  ;;  %v7550_v12 = vld [vmem:[#allocation43_spill] sm:$0xff] }
 0x297   : > { %5148 = vpow2.f32 %v4345_v27  ;;  %v2896_v28 = vadd.f32 %v2895_v35, %v6507_v43  ;;  %v2646_v23 = vpop.f32.mrf.mxu1  ;;  %v2178_v19 = vadd.f32 %v7549_v6, %v6048_v41  ;;  %v2298_v35 = vadd.f32 %v7550_v12, %v6048_v41 }
 0x298   : > { %v5131_v56 = vpop.eup %5130  ;;  %5150 = vrcp.f32 %v3332_v26  ;;  %v2899_v51 = vpop.f32.mrf.mxu0  ;;  %v6864_v17 = vadd.f32 %v2646_v23, %v2294_v7  ;;  %v2880_v43 = vadd.f32 %v6790_v59, %v2527_v33 }
 0x299   : > { %v5133_v18 = vpop.eup %5132  ;;  %v4346_v30 = vmul.f32 -1.442695, %v2896_v28  ;;  %v6867_v63 = vadd.f32 %v2899_v51, %v6512_v40  ;;  %5152 = vtanh.f32 %v2874_v24  ;;  %v6870_v27 = vpop.f32.mrf.mxu1  ;;  %v6872_v15 = vmul.f32 %v5131_v56, %v5129_v16  ;;  %v7551_v28 = vld [vmem:[#allocation107_spill] sm:$0xff] }
 0x29a   : > { %v3333_v10 = vadd.f32 1.0, %v5133_v18  ;;  %v2901_v62 = vpop.f32.mrf.mxu0  ;;  %v5135_v26 = vpop.eup %5134  ;;  %v2531_v40 = vadd.f32 %v7551_v28, %v2178_v19 }
 0x29b   : > { %5154 = vpow2.f32 %v4346_v30  ;;  %v2902_v7 = vadd.f32 %v2901_v62, %v6522_v3  ;;  %v2650_v24 = vpop.f32.mrf.mxu1  ;;  %v3572_v59 = vpack.c.bf16 %v6872_v15, %v6854_v50  ;;  %v7552_v62 = vld [vmem:[#allocation45_spill] sm:$0xff] }
 0x29c   : > { %v5137_v38 = vpop.eup %5136  ;;  %5156 = vrcp.f32 %v3333_v10  ;;  %v2903_v23 = vpop.f32.mrf.mxu0  ;;  %v6880_v16 = vadd.f32 %v2650_v24, %v2298_v35  ;;  %v2884_v3 = vadd.f32 %v6807_v58, %v2531_v40  ;;  %v2304_v12 = vadd.f32 %v7552_v62, %v6048_v41  ;;  %v6903_v62 = vld [vmem:[#allocation10] sm:$0x1] }
 0x29d   : > { %v5139_v33 = vpop.eup %5138  ;;  %v4347_v51 = vmul.f32 -1.442695, %v2902_v7  ;;  %v6883_v56 = vadd.f32 %v2903_v23, %v6529_v46  ;;  %5158 = vtanh.f32 %v2880_v43  ;;  %v6886_v6 = vpop.f32.mrf.mxu1  ;;  %v6888_v30 = vmul.f32 %v5137_v38, %v5135_v26  ;;  %4399 = vmatprep.mubr.bf16.mxu1 %v6903_v62 }
 0x29e   : > { %v3334_v18 = vadd.f32 1.0, %v5139_v33  ;;  %v2905_v19 = vpop.f32.mrf.mxu0  ;;  %v5141_v10 = vpop.eup %5140 }
 0x29f   : > { %5160 = vpow2.f32 %v4347_v51  ;;  %v2906_v35 = vadd.f32 %v2905_v19, %v6539_v36  ;;  %v2656_v46 = vpop.f32.mrf.mxu1 }
 0x2a0   : > { %v5143_v7 = vpop.eup %5142  ;;  %5162 = vrcp.f32 %v3334_v18  ;;  %v2909_v28 = vpop.f32.mrf.mxu0  ;;  %v6893_v23 = vadd.f32 %v2656_v46, %v2304_v12 }
 0x2a1   : > { %v5145_v43 = vpop.eup %5144  ;;  %v4348_v24 = vmul.f32 -1.442695, %v2906_v35  ;;  %v6896_v58 = vadd.f32 %v2909_v28, %v6544_v2  ;;  %5164 = vtanh.f32 %v2884_v3  ;;  %v6898_v40 = vmul.f32 %v5143_v7, %v5141_v10 }
 0x2a2   : > { %v3335_v26 = vadd.f32 1.0, %v5145_v43  ;;  %v2911_v38 = vpop.f32.mrf.mxu0  ;;  %v5147_v33 = vpop.eup %5146 }
 0x2a3   : > { %5166 = vpow2.f32 %v4348_v24  ;;  %v2912_v36 = vadd.f32 %v2911_v38, %v6554_v21  ;;  %v3573_v19 = vpack.c.bf16 %v6898_v40, %v6888_v30 }
 0x2a4   : > { %v5149_v51 = vpop.eup %5148  ;;  %5168 = vrcp.f32 %v3335_v26  ;;  %v2913_v18 = vpop.f32.mrf.mxu0 }
 0x2a5   : > { %v5151_v12 = vpop.eup %5150  ;;  %v3336_v2 = vadd.f32 1.0, %v5149_v51  ;;  %v4349_v35 = vmul.f32 -1.442695, %v2912_v36  ;;  %5170 = vtanh.f32 %v6832_v54  ;;  %v6908_v3 = vadd.f32 %v2913_v18, %v6561_v22 }
 0x2a6   : > { %v2915_v10 = vpop.f32.mrf.mxu0  ;;  %v3524_v21 = vmul.f32 %v5151_v12, %v5147_v33  ;;  %v5153_v7 = vpop.eup %5152 }
 0x2a7   : > { %5172 = vrcp.f32 %v3336_v2  ;;  %v2916_v46 = vadd.f32 %v2915_v10, %v6571_v20 }
 0x2a8   : > { %v5155_v28 = vpop.eup %5154  ;;  %5174 = vpow2.f32 %v4349_v35  ;;  %v2919_v43 = vpop.f32.mrf.mxu0 }
 0x2a9   : > { %v5157_v24 = vpop.eup %5156  ;;  %v3337_v26 = vadd.f32 1.0, %v5155_v28  ;;  %v4350_v38 = vmul.f32 -1.442695, %v2916_v46  ;;  %5176 = vtanh.f32 %v6851_v53  ;;  %v6913_v36 = vadd.f32 %v2919_v43, %v6576_v57 }
 0x2aa   : > { %v2921_v54 = vpop.f32.mrf.mxu0  ;;  %v3525_v22 = vmul.f32 %v5157_v24, %v5153_v7  ;;  %v5159_v51 = vpop.eup %5158  ;;  %v7553_v7 = vld [vmem:[#allocation89_spill] sm:$0xff] }
 0x2ab   : > { %5178 = vrcp.f32 %v3337_v26  ;;  %v2922_v33 = vadd.f32 %v2921_v54, %v6586_v13  ;;  %v7554_v54 = vld [vmem:[#allocation90_spill] sm:$0xff] }
 0x2ac   : > { %v5161_v18 = vpop.eup %5160  ;;  %5180 = vpow2.f32 %v4350_v38  ;;  %v2923_v20 = vpop.f32.mrf.mxu0  ;;  %v3574_v12 = vpack.c.bf16 %v3525_v22, %v3524_v21 }
 0x2ad   : > { %v5163_v2 = vpop.eup %5162  ;;  %v3338_v35 = vadd.f32 1.0, %v5161_v18  ;;  %v4351_v10 = vmul.f32 -1.442695, %v2922_v33  ;;  %5182 = vtanh.f32 %v6867_v63  ;;  %v6918_v53 = vadd.f32 %v2923_v20, %v6593_v34 }
 0x2ae   : > { %v2925_v57 = vpop.f32.mrf.mxu0  ;;  %v3526_v46 = vmul.f32 %v5163_v2, %v5159_v51  ;;  %v5165_v28 = vpop.eup %5164 }
 0x2af   : > { %5184 = vrcp.f32 %v3338_v35  ;;  %v2926_v43 = vadd.f32 %v2925_v57, %v7553_v7 }
 0x2b0   : > { %v5167_v24 = vpop.eup %5166  ;;  %5186 = vpow2.f32 %v4351_v10  ;;  %v2929_v13 = vpop.f32.mrf.mxu0 }
 0x2b1   : > { %v5169_v26 = vpop.eup %5168  ;;  %v3339_v38 = vadd.f32 1.0, %v5167_v24  ;;  %v4352_v21 = vmul.f32 -1.442695, %v2926_v43  ;;  %5188 = vtanh.f32 %v6883_v56  ;;  %v6923_v22 = vadd.f32 %v2929_v13, %v7554_v54 }
 0x2b2   : > { %v2931_v63 = vpop.f32.mrf.mxu0  ;;  %v3527_v34 = vmul.f32 %v5169_v26, %v5165_v28  ;;  %v5171_v33 = vpop.eup %5170  ;;  %v7555_v24 = vpack.c.bf16 %v6687_v11, %v6670_v0 }
 0x2b3   : > { %5190 = vrcp.f32 %v3339_v38  ;;  %v2932_v51 = vadd.f32 %v2931_v63, %v6618_v39 }
 0x2b4   : > { %v5173_v18 = vpop.eup %5172  ;;  %5192 = vpow2.f32 %v4352_v21  ;;  %v2933_v20 = vpop.f32.mrf.mxu0  ;;  %v3575_v2 = vpack.c.bf16 %v3527_v34, %v3526_v46 }
 0x2b5   : > { %v5175_v35 = vpop.eup %5174  ;;  %v4353_v10 = vmul.f32 -1.442695, %v2932_v51  ;;  %v6927_v57 = vadd.f32 %v2933_v20, %v6625_v60  ;;  %5194 = vtanh.f32 %v6896_v58  ;;  %v6930_v43 = vmul.f32 %v5173_v18, %v5171_v33  ;;  %v7556_v58 = vld [vmem:[#allocation93_spill] sm:$0xff] }
 0x2b6   : > { %v3340_v56 = vadd.f32 1.0, %v5175_v35  ;;  %4383 = vmatprep.subr.bf16.mxu1 %v3575_v2  ;;  %v2935_v7 = vpop.f32.mrf.mxu0  ;;  %v5177_v28 = vpop.eup %5176 }
 0x2b7   : > { %5196 = vpow2.f32 %v4353_v10  ;;  %v2936_v39 = vadd.f32 %v2935_v7, %v6637_v9  ;;  %4384 = vmatpush3.bf16.xpose.msra.mxu1 %v7555_v24  ;;  %v7557_v10 = vld [vmem:[#allocation92_spill] sm:$0xff] }
 0x2b8   : > { %v5179_v46 = vpop.eup %5178  ;;  %5198 = vrcp.f32 %v3340_v56  ;;  %4385 = vmatprep.subr.bf16.mxu1 %v3574_v12  ;;  %v2939_v60 = vpop.f32.mrf.mxu0  ;;  %v7558_v56 = vpack.c.bf16 %v6651_v52, %v7557_v10 }
 0x2b9   : > { %v5181_v13 = vpop.eup %5180  ;;  %v4354_v26 = vmul.f32 -1.442695, %v2936_v39  ;;  %v6937_v38 = vadd.f32 %v2939_v60, %v7556_v58  ;;  %5200 = vtanh.f32 %v6908_v3  ;;  %v6940_v63 = vmul.f32 %v5179_v46, %v5177_v28  ;;  %v7559_v39 = vld [vmem:[#allocation94_spill] sm:$0xff] }
 0x2ba   : > { %v3341_v21 = vadd.f32 1.0, %v5181_v13  ;;  %v2941_v54 = vpop.f32.mrf.mxu0  ;;  %v5183_v9 = vpop.eup %5182  ;;  %v7560_v13 = vld [vmem:[#allocation95_spill] sm:$0xff] }
 0x2bb   : > { %5202 = vpow2.f32 %v4354_v26  ;;  %v2942_v0 = vadd.f32 %v2941_v54, %v6655_v32 }
 0x2bc   : > { %v5185_v11 = vpop.eup %5184  ;;  %5204 = vrcp.f32 %v3341_v21  ;;  %v2943_v34 = vpop.f32.mrf.mxu0 }
 0x2bd   : > { %v5187_v33 = vpop.eup %5186  ;;  %v4355_v51 = vmul.f32 -1.442695, %v2942_v0  ;;  %v6946_v18 = vadd.f32 %v2943_v34, %v6662_v14  ;;  %5206 = vtanh.f32 %v6913_v36  ;;  %v6949_v2 = vmul.f32 %v5185_v11, %v5183_v9  ;;  %v7561_v9 = vld [vmem:[#allocation96_spill] sm:$0xff] }
 0x2be   : > { %v3342_v3 = vadd.f32 1.0, %v5187_v33  ;;  %v2945_v20 = vpop.f32.mrf.mxu0  ;;  %v5189_v35 = vpop.eup %5188  ;;  %v7562_v33 = vld [vmem:[#allocation101_spill] sm:$0xff] }
 0x2bf   : > { %5208 = vpow2.f32 %v4355_v51  ;;  %v2946_v32 = vadd.f32 %v2945_v20, %v6674_v4  ;;  %4386 = vmatpush3.bf16.xpose.msra.mxu1 %v7558_v56  ;;  %v7564_v20 = vld [vmem:[#allocation88_spill] sm:$0xff] }
 0x2c0   : > { %v5191_v7 = vpop.eup %5190  ;;  %5210 = vrcp.f32 %v3342_v3  ;;  %4387 = vmatprep.subr.bf16.mxu1 %v3573_v19  ;;  %v2949_v14 = vpop.f32.mrf.mxu0  ;;  %v7563_v3 = vld [vmem:[#allocation91_spill] sm:$0xff] }
 0x2c1   : > { %v5193_v36 = vpop.eup %5192  ;;  %v4356_v28 = vmul.f32 -1.442695, %v2946_v32  ;;  %v6959_v24 = vadd.f32 %v2949_v14, %v7559_v39  ;;  %v6961_v46 = vmul.f32 %v5191_v7, %v5189_v35  ;;  %5212 = vtanh.f32 %v6918_v53  ;;  %v7566_v14 = vld [vmem:[#allocation98_spill] sm:$0xff] }
 0x2c2   : > { %v3343_v4 = vadd.f32 1.0, %v5193_v36  ;;  %v2951_v60 = vpop.f32.mrf.mxu0  ;;  %v5195_v52 = vpop.eup %5194  ;;  %v7565_v35 = vpack.c.bf16 %v7563_v3, %v7564_v20  ;;  %v7573_v20 = vpack.c.bf16 %v6834_v29, %v6817_v48 }
 0x2c3   : > { %5214 = vpow2.f32 %v4356_v28  ;;  %v2952_v26 = vadd.f32 %v2951_v60, %v7560_v13  ;;  %v3577_v30 = vpack.c.bf16 %v6961_v46, %v6949_v2  ;;  %v7567_v60 = vld [vmem:[#allocation99_spill] sm:$0xff] }
 0x2c4   : > { %v5197_v40 = vpop.eup %5196  ;;  %5216 = vrcp.f32 %v3343_v4  ;;  %v2953_v19 = vpop.f32.mrf.mxu0 }
 0x2c5   : > { %v5199_v58 = vpop.eup %5198  ;;  %v3344_v21 = vadd.f32 1.0, %v5197_v40  ;;  %v4357_v54 = vmul.f32 -1.442695, %v2952_v26  ;;  %v6968_v0 = vadd.f32 %v2953_v19, %v7561_v9  ;;  %5218 = vtanh.f32 %v6923_v22  ;;  %v7568_v19 = vld [vmem:[#allocation100_spill] sm:$0xff] }
 0x2c6   : > { %v2955_v53 = vpop.f32.mrf.mxu0  ;;  %v6971_v11 = vmul.f32 %v5199_v58, %v5195_v52  ;;  %v5201_v34 = vpop.eup %5200  ;;  %v7569_v9 = vld [vmem:[#allocation64_spill] sm:$0xff] }
 0x2c7   : > { %5220 = vrcp.f32 %v3344_v21  ;;  %v2956_v51 = vadd.f32 %v2955_v53, %v7562_v33  ;;  %4388 = vmatpush3.bf16.xpose.msra.mxu1 %v7565_v35  ;;  %v7571_v33 = vld [vmem:[#allocation86_spill] sm:$0xff] }
 0x2c8   : > { %v5203_v32 = vpop.eup %5202  ;;  %5222 = vpow2.f32 %v4357_v54  ;;  %4389 = vmatprep.subr.bf16.mxu1 %v3572_v59  ;;  %v2959_v10 = vpop.f32.mrf.mxu0 }
 0x2c9   : > { %v5205_v56 = vpop.eup %5204  ;;  %v3345_v22 = vadd.f32 1.0, %v5203_v32  ;;  %v4358_v7 = vmul.f32 -1.442695, %v2956_v51  ;;  %v6981_v36 = vadd.f32 %v2959_v10, %v7566_v14  ;;  %5224 = vtanh.f32 %v6927_v57 }
 0x2ca   : > { %v2961_v28 = vpop.f32.mrf.mxu0  ;;  %v6984_v39 = vmul.f32 %v5205_v56, %v5201_v34  ;;  %v5207_v4 = vpop.eup %5206  ;;  %v7570_v34 = vld [vmem:[#allocation87_spill] sm:$0xff] }
 0x2cb   : > { %5226 = vrcp.f32 %v3345_v22  ;;  %v2962_v52 = vadd.f32 %v2961_v28, %v7567_v60  ;;  %v7572_v51 = vpack.c.bf16 %v7570_v34, %v7571_v33  ;;  %v7005_v22 = vpop.f32.mrf.mxu1 }
 0x2cc   : > { %v5209_v13 = vpop.eup %5208  ;;  %5228 = vpow2.f32 %v4358_v7  ;;  %v2963_v50 = vpop.f32.mrf.mxu0  ;;  %v3578_v15 = vpack.c.bf16 %v6984_v39, %v6971_v11 }
 0x2cd   : > { %v5211_v59 = vpop.eup %5210  ;;  %v3346_v26 = vadd.f32 1.0, %v5209_v13  ;;  %v4359_v40 = vmul.f32 -1.442695, %v2962_v52  ;;  %v6990_v58 = vadd.f32 %v2963_v50, %v7568_v19  ;;  %5230 = vtanh.f32 %v6937_v38  ;;  %v7574_v19 = vld [vmem:[#allocation85_spill] sm:$0xff] }
 0x2ce   : > { %v2965_v57 = vpop.f32.mrf.mxu0  ;;  %v6993_v21 = vmul.f32 %v5211_v59, %v5207_v4  ;;  %v5213_v54 = vpop.eup %5212 }
 0x2cf   : > { %5232 = vrcp.f32 %v3346_v26  ;;  %v2966_v53 = vadd.f32 %v2965_v57, %v7569_v9  ;;  %4390 = vmatpush3.bf16.xpose.msra.mxu1 %v7572_v51  ;;  %v7575_v57 = vld [vmem:[#allocation84_spill] sm:$0xff] }
 0x2d0   : > { %v5215_v3 = vpop.eup %5214  ;;  %5234 = vpow2.f32 %v4359_v40  ;;  %4391 = vmatprep.subr.bf16.mxu1 %v7573_v20  ;;  %v2969_v35 = vpop.f32.mrf.mxu0 }
 0x2d1   : > { %v5217_v32 = vpop.eup %5216  ;;  %v3347_v38 = vadd.f32 1.0, %v5215_v3  ;;  %v4360_v10 = vmul.f32 -1.442695, %v2966_v53  ;;  %v7003_v56 = vadd.f32 %v2969_v35, %v6754_v5  ;;  %5236 = vtanh.f32 %v6946_v18  ;;  %v7018_v18 = vpop.f32.mrf.mxu1 }
 0x2d2   : > { %v2971_v7 = vpop.f32.mrf.mxu0  ;;  %v7008_v14 = vmul.f32 %v5217_v32, %v5213_v54  ;;  %v5219_v28 = vpop.eup %5218  ;;  %v7576_v54 = vpack.c.bf16 %v7574_v19, %v7575_v57  ;;  %v7578_v32 = vld [vmem:[#allocation19_spill] sm:$0xff]  ;;  %v7583_v57 = vld [vmem:[#allocation18_spill] sm:$0xff] }
 0x2d3   : > { %5238 = vrcp.f32 %v3347_v38  ;;  %v2972_v4 = vadd.f32 %v2971_v7, %v6763_v31  ;;  %v7033_v3 = vpop.f32.mrf.mxu1 }
 0x2d4   : > { %v5221_v48 = vpop.eup %5220  ;;  %5240 = vpow2.f32 %v4360_v10  ;;  %v2973_v29 = vpop.f32.mrf.mxu0  ;;  %v3579_v60 = vpack.c.bf16 %v7008_v14, %v6993_v21  ;;  %v7613_v14 = vpack.c.bf16 %v6940_v63, %v6930_v43 }
 0x2d5   : > { %v5223_v52 = vpop.eup %5222  ;;  %v4361_v5 = vmul.f32 -1.442695, %v2972_v4  ;;  %v7014_v13 = vadd.f32 %v2973_v29, %v6773_v44  ;;  %v7016_v50 = vmul.f32 %v5221_v48, %v5219_v28  ;;  %5242 = vtanh.f32 %v6959_v24  ;;  %v7579_v28 = vld [vmem:[#allocation65_spill] sm:$0xff] }
 0x2d6   : > { %v3348_v59 = vadd.f32 1.0, %v5223_v52  ;;  %v2975_v26 = vpop.f32.mrf.mxu0  ;;  %v5225_v31 = vpop.eup %5224  ;;  %v7577_v44 = vpack.c.bf16 %v6798_v8, %v6779_v42 }
 0x2d7   : > { %5244 = vpow2.f32 %v4361_v5  ;;  %v2976_v40 = vadd.f32 %v2975_v26, %v6783_v45  ;;  %4392 = vmatpush3.bf16.xpose.msra.mxu1 %v7576_v54  ;;  %v7580_v26 = vld [vmem:[#allocation83_spill] sm:$0xff]  ;;  %v7584_v54 = vld [vmem:[#allocation17_spill] sm:$0xff] }
 0x2d8   : > { %v5227_v9 = vpop.eup %5226  ;;  %5246 = vrcp.f32 %v3348_v59  ;;  %4393 = vmatprep.subr.bf16.mxu1 %v7577_v44  ;;  %v2979_v53 = vpop.f32.mrf.mxu0 }
 0x2d9   : > { %v5229_v34 = vpop.eup %5228  ;;  %v4362_v33 = vmul.f32 -1.442695, %v2976_v40  ;;  %v7029_v24 = vadd.f32 %v2979_v53, %v6793_v55  ;;  %v7031_v51 = vmul.f32 %v5227_v9, %v5225_v31  ;;  %5248 = vtanh.f32 %v6968_v0  ;;  %v7044_v0 = vpop.f32.mrf.mxu1  ;;  %v7581_v31 = vld [vmem:[#allocation82_spill] sm:$0xff] }
 0x2da   : > { %v3349_v45 = vadd.f32 1.0, %v5229_v34  ;;  %v2981_v20 = vpop.f32.mrf.mxu0  ;;  %v5231_v35 = vpop.eup %5230  ;;  %v7582_v40 = vpack.c.bf16 %v7580_v26, %v7581_v31  ;;  %v7585_v9 = vpack.c.bf16 %v7583_v57, %v7584_v54  ;;  %v7587_v31 = vld [vmem:[#allocation81_spill] sm:$0xff]  ;;  %v7590_v57 = vld [vmem:[#allocation102_spill] sm:$0xff] }
 0x2db   : > { %5250 = vpow2.f32 %v4362_v33  ;;  %v2982_v38 = vadd.f32 %v2981_v20, %v7578_v32  ;;  %v3580_v42 = vpack.c.bf16 %v7031_v51, %v7016_v50  ;;  %v7591_v54 = vld [vmem:[#allocation97_spill] sm:$0xff]  ;;  %v5558_v51 = vmov 1966171168  }
 0x2dc   : > { %v5233_v8 = vpop.eup %5232  ;;  %5252 = vrcp.f32 %v3349_v45  ;;  %v2983_v10 = vpop.f32.mrf.mxu0 }
 0x2dd   : > { %v5235_v55 = vpop.eup %5234  ;;  %v4363_v7 = vmul.f32 -1.442695, %v2982_v38  ;;  %v7040_v4 = vadd.f32 %v2983_v10, %v7579_v28  ;;  %v7042_v48 = vmul.f32 %v5233_v8, %v5231_v35  ;;  %5254 = vtanh.f32 %v6981_v36  ;;  %v7059_v45 = vpop.f32.mrf.mxu1 }
 0x2de   : > { %v3350_v29 = vadd.f32 1.0, %v5235_v55  ;;  %v2985_v52 = vpop.f32.mrf.mxu0  ;;  %v5237_v5 = vpop.eup %5236 }
 0x2df   : > { %5256 = vpow2.f32 %v4363_v7  ;;  %v2986_v59 = vadd.f32 %v2985_v52, %v6821_v1  ;;  %4394 = vmatpush3.bf16.xpose.msra.mxu1 %v7582_v40  ;;  %v7588_v40 = vld [vmem:[#allocation108_spill] sm:$0xff] }
 0x2e0   : > { %v5239_v19 = vpop.eup %5238  ;;  %5258 = vrcp.f32 %v3350_v29  ;;  %4395 = vmatprep.subr.bf16.mxu1 %v7585_v9  ;;  %v2989_v44 = vpop.f32.mrf.mxu0  ;;  %v7592_v9 = vpack.c.bf16 %v7590_v57, %v7591_v54 }
 0x2e1   : > { %v5241_v53 = vpop.eup %5240  ;;  %v4364_v34 = vmul.f32 -1.442695, %v2986_v59  ;;  %v7055_v36 = vadd.f32 %v2989_v44, %v6828_v61  ;;  %v7057_v33 = vmul.f32 %v5239_v19, %v5237_v5  ;;  %5260 = vtanh.f32 %v6990_v58  ;;  %v7068_v29 = vpop.f32.mrf.mxu1  ;;  %v7586_v5 = vld [vmem:[#allocation42_spill] sm:$0xff] }
 0x2e2   : > { %v3351_v1 = vadd.f32 1.0, %v5241_v53  ;;  %v2991_v20 = vpop.f32.mrf.mxu0  ;;  %v5243_v35 = vpop.eup %5242  ;;  %v2296_v59 = vadd.f32 %v7586_v5, %v6057_v47  ;;  %v7589_v19 = vpack.c.bf16 %v7587_v31, %v7588_v40 }
 0x2e3   : > { %5262 = vpow2.f32 %v4364_v34  ;;  %v2992_v32 = vadd.f32 %v2991_v20, %v6838_v37  ;;  %v3581_v38 = vpack.c.bf16 %v7057_v33, %v7042_v48 }
 0x2e4   : > { %v5245_v8 = vpop.eup %5244  ;;  %5264 = vrcp.f32 %v3351_v1  ;;  %v2993_v10 = vpop.f32.mrf.mxu0  ;;  %v2649_v53 = vadd.f32 %v6870_v27, %v2296_v59 }
 0x2e5   : > { %v5247_v61 = vpop.eup %5246  ;;  %v3352_v55 = vadd.f32 1.0, %v5245_v8  ;;  %v4365_v7 = vmul.f32 -1.442695, %v2992_v32  ;;  %v7066_v28 = vadd.f32 %v2993_v10, %v6848_v49  ;;  %5266 = vtanh.f32 %v7003_v56  ;;  %v7593_v10 = vld [vmem:[#allocation44_spill] sm:$0xff] }
 0x2e6   : > { %v2995_v58 = vpop.f32.mrf.mxu0  ;;  %v7071_v52 = vmul.f32 %v5247_v61, %v5243_v35  ;;  %v5249_v37 = vpop.eup %5248  ;;  %v2300_v61 = vadd.f32 %v7593_v10, %v6057_v47 }
 0x2e7   : > { %5268 = vrcp.f32 %v3352_v55  ;;  %v2996_v26 = vadd.f32 %v2995_v58, %v6858_v25  ;;  %4396 = vmatpush3.bf16.xpose.msra.mxu1 %v7589_v19  ;;  %v7086_v25 = vpop.f32.mrf.mxu1 }
 0x2e8   : > { %v5251_v49 = vpop.eup %5250  ;;  %5270 = vpow2.f32 %v4365_v7  ;;  %4397 = vmatprep.subr.bf16.mxu1 %v7592_v9  ;;  %v2999_v56 = vpop.f32.mrf.mxu0  ;;  %v2653_v5 = vadd.f32 %v6886_v6, %v2300_v61  ;;  %v7595_v9 = vld [vmem:[#allocation106_spill] sm:$0xff]  ;;  %v7596_v6 = vld [vmem:[#allocation105_spill] sm:$0xff] }
 0x2e9   : > { %v5253_v44 = vpop.eup %5252  ;;  %v3353_v34 = vadd.f32 1.0, %v5251_v49  ;;  %v4366_v1 = vmul.f32 -1.442695, %v2996_v26  ;;  %v7084_v20 = vadd.f32 %v2999_v56, %v6864_v17  ;;  %5272 = vtanh.f32 %v7014_v13  ;;  %v7099_v26 = vpop.f32.mrf.mxu1  ;;  %v7594_v49 = vld [vmem:[#allocation46_spill] sm:$0xff] }
 0x2ea   : > { %v3001_v35 = vpop.f32.mrf.mxu0  ;;  %v7089_v32 = vmul.f32 %v5253_v44, %v5249_v37  ;;  %v5255_v8 = vpop.eup %5254  ;;  %v2306_v57 = vadd.f32 %v7594_v49, %v6057_v47  ;;  %v7597_v56 = vpack.c.bf16 %v7595_v9, %v7596_v6  ;;  %v7599_v9 = vld [vmem:[#allocation50_spill] sm:$0xff] }
 0x2eb   : > { %5274 = vrcp.f32 %v3353_v34  ;;  %v3002_v55 = vadd.f32 %v3001_v35, %v2649_v53  ;;  %v2316_v6 = vadd.f32 %v7599_v9, %v6057_v47 }
 0x2ec   : > { %v5257_v7 = vpop.eup %5256  ;;  %5276 = vpow2.f32 %v4366_v1  ;;  %v3003_v27 = vpop.f32.mrf.mxu0  ;;  %v3582_v17 = vpack.c.bf16 %v7089_v32, %v7071_v52  ;;  %v2659_v34 = vadd.f32 %v7005_v22, %v2306_v57 }
 0x2ed   : > { %v5259_v58 = vpop.eup %5258  ;;  %v3354_v59 = vadd.f32 1.0, %v5257_v7  ;;  %v4367_v13 = vmul.f32 -1.442695, %v3002_v55  ;;  %v7097_v37 = vadd.f32 %v3003_v27, %v6880_v16  ;;  %5278 = vtanh.f32 %v7029_v24  ;;  %v7598_v7 = vld [vmem:[#allocation48_spill] sm:$0xff] }
 0x2ee   : > { %v3005_v31 = vpop.f32.mrf.mxu0  ;;  %v7102_v40 = vmul.f32 %v5259_v58, %v5255_v8  ;;  %v5261_v19 = vpop.eup %5260  ;;  %v2310_v27 = vadd.f32 %v7598_v7, %v6057_v47  ;;  %v7600_v7 = vld [vmem:[#allocation52_spill] sm:$0xff] }
 0x2ef   : > { %5280 = vrcp.f32 %v3354_v59  ;;  %v3006_v54 = vadd.f32 %v3005_v31, %v2653_v5  ;;  %4398 = vmatpush3.bf16.xpose.msra.mxu1 %v7597_v56  ;;  %v2678_v8 = vpop.f32.mrf.mxu1 }
 0x2f0   : > { %v5263_v44 = vpop.eup %5262  ;;  %5282 = vpow2.f32 %v4367_v13  ;;  %v3009_v16 = vpop.f32.mrf.mxu0  ;;  %v2663_v13 = vadd.f32 %v7033_v3, %v2310_v27  ;;  %v2320_v27 = vadd.f32 %v7600_v7, %v6057_v47  ;;  %v7602_v7 = vld [vmem:[#allocation47_spill] sm:$0xff] }
 0x2f1   : > { %v5265_v53 = vpop.eup %5264  ;;  %v3355_v24 = vadd.f32 1.0, %v5263_v44  ;;  %v4368_v1 = vmul.f32 -1.442695, %v3006_v54  ;;  %v7111_v35 = vadd.f32 %v3009_v16, %v6893_v23  ;;  %5284 = vtanh.f32 %v7040_v4 }
 0x2f2   : > { %v3011_v10 = vpop.f32.mrf.mxu0  ;;  %v7114_v61 = vmul.f32 %v5265_v53, %v5261_v19  ;;  %v5267_v55 = vpop.eup %5266  ;;  %v2669_v53 = vadd.f32 %v7059_v45, %v2316_v6 }
 0x2f3   : > { %5286 = vrcp.f32 %v3355_v24  ;;  %v3012_v58 = vadd.f32 %v3011_v10, %v2659_v34  ;;  %v7125_v19 = vpop.f32.mrf.mxu1 }
 0x2f4   : > { %v5269_v5 = vpop.eup %5268  ;;  %5288 = vpow2.f32 %v4368_v1  ;;  %v7118_v22 = vpop.f32.mrf.mxu0  ;;  %v3583_v23 = vpack.c.bf16 %v7114_v61, %v7102_v40 }
 0x2f5   : > { %v5271_v59 = vpop.eup %5270  ;;  %v4369_v4 = vmul.f32 -1.442695, %v3012_v58  ;;  %v7123_v31 = vmul.f32 %v5269_v5, %v5267_v55  ;;  %5290 = vtanh.f32 %v7055_v36  ;;  %v2682_v24 = vpop.f32.mrf.mxu1 }
 0x2f6   : > { %v3356_v49 = vadd.f32 1.0, %v5271_v59  ;;  %v3015_v57 = vpop.f32.mrf.mxu0  ;;  %4400 = vmatmul.mubr.bf16.vlgmr.msra.gmra.mxu1 %v6903_v62  ;;  %v5273_v54 = vpop.eup %5272 }
 0x2f7   : > { %5292 = vpow2.f32 %v4369_v4  ;;  %v3016_v56 = vadd.f32 %v3015_v57, %v2663_v13  ;;  %4417 = vmatprep.mubr.bf16.mxu1 %v6903_v62  ;;  %v2673_v4 = vadd.f32 %v7086_v25, %v2320_v27  ;;  %v7147_v57 = vpop.f32.mrf.mxu1 }
 0x2f8   : > { %v5275_v3 = vpop.eup %5274  ;;  %5294 = vrcp.f32 %v3356_v49  ;;  %v7132_v44 = vpop.f32.mrf.mxu0 }
 0x2f9   : > { %v5277_v16 = vpop.eup %5276  ;;  %v4370_v36 = vmul.f32 -1.442695, %v3016_v56  ;;  %v7135_v34 = vmul.f32 %v5275_v3, %v5273_v54  ;;  %5296 = vtanh.f32 %v7066_v28  ;;  %v7601_v56 = vld [vmem:[#allocation54_spill] sm:$0xff]  ;;  %v2688_v27 = vpop.f32.mrf.mxu1 }
 0x2fa   : > { %v3357_v1 = vadd.f32 1.0, %v5277_v16  ;;  %v3021_v10 = vpop.f32.mrf.mxu0  ;;  %v5279_v55 = vpop.eup %5278  ;;  %v2326_v3 = vadd.f32 %v7601_v56, %v6057_v47 }
 0x2fb   : > { %5298 = vpow2.f32 %v4370_v36  ;;  %v3022_v58 = vadd.f32 %v3021_v10, %v2669_v53  ;;  %v7168_v12 = vpop.f32.mrf.mxu1  ;;  %v7612_v21 = vpack.c.bf16 %v7135_v34, %v7123_v31 }
 0x2fc   : > { %v5281_v59 = vpop.eup %5280  ;;  %5300 = vrcp.f32 %v3357_v1  ;;  %v7142_v45 = vpop.f32.mrf.mxu0  ;;  %v2679_v1 = vadd.f32 %v2678_v8, %v2326_v3 }
 0x2fd   : > { %v5283_v13 = vpop.eup %5282  ;;  %v4371_v49 = vmul.f32 -1.442695, %v3022_v58  ;;  %v7145_v28 = vmul.f32 %v5281_v59, %v5279_v55  ;;  %5302 = vtanh.f32 %v7084_v20  ;;  %v2308_v20 = vadd.f32 %v7602_v7, %v6048_v41 }
 0x2fe   : > { %v3358_v54 = vadd.f32 1.0, %v5283_v13  ;;  %v3025_v9 = vpop.f32.mrf.mxu0  ;;  %v5285_v6 = vpop.eup %5284 }
 0x2ff   : > { %5304 = vpow2.f32 %v4371_v49  ;;  %v3026_v16 = vadd.f32 %v3025_v9, %v2673_v4  ;;  %v7603_v4 = vld [vmem:[#allocation57_spill] sm:$0xff] }
 0x300   : > { %v5287_v53 = vpop.eup %5286  ;;  %5306 = vrcp.f32 %v3358_v54  ;;  %v7152_v36 = vpop.f32.mrf.mxu0  ;;  %v2330_v49 = vadd.f32 %v7603_v4, %v6057_v47 }
 0x301   : > { %v5289_v25 = vpop.eup %5288  ;;  %v4372_v10 = vmul.f32 -1.442695, %v3026_v16  ;;  %v7154_v55 = vmul.f32 %v5287_v53, %v5285_v6  ;;  %5308 = vtanh.f32 %v7097_v37  ;;  %v2661_v6 = vadd.f32 %v7018_v18, %v2308_v20  ;;  %v7605_v20 = vld [vmem:[#allocation61_spill] sm:$0xff] }
 0x302   : > { %v3359_v58 = vadd.f32 1.0, %v5289_v25  ;;  %v3031_v59 = vpop.f32.mrf.mxu0  ;;  %v5291_v13 = vpop.eup %5290  ;;  %v2683_v16 = vadd.f32 %v2682_v24, %v2330_v49  ;;  %v7604_v25 = vld [vmem:[#allocation49_spill] sm:$0xff] }
 0x303   : > { %5310 = vpow2.f32 %v4372_v10  ;;  %v3032_v54 = vadd.f32 %v3031_v59, %v2679_v1  ;;  %v3585_v8 = vpack.c.bf16 %v7154_v55, %v7145_v28  ;;  %v2314_v7 = vadd.f32 %v7604_v25, %v6048_v41 }
 0x304   : > { %v5293_v9 = vpop.eup %5292  ;;  %5312 = vrcp.f32 %v3359_v58  ;;  %v7164_v56 = vpop.f32.mrf.mxu0  ;;  %v3014_v1 = vadd.f32 %v7118_v22, %v2661_v6  ;;  %v2336_v58 = vadd.f32 %v7605_v20, %v6057_v47  ;;  %v7606_v22 = vld [vmem:[#allocation51_spill] sm:$0xff] }
 0x305   : > { %v5295_v3 = vpop.eup %5294  ;;  %v3360_v37 = vadd.f32 1.0, %v5293_v9  ;;  %v4373_v53 = vmul.f32 -1.442695, %v3032_v54  ;;  %5314 = vtanh.f32 %v7111_v35  ;;  %v2667_v49 = vadd.f32 %v7044_v0, %v2314_v7  ;;  %v2692_v6 = vpop.f32.mrf.mxu1  ;;  %v7607_v0 = vld [vmem:[#allocation63_spill] sm:$0xff] }
 0x306   : > { %v3035_v10 = vpop.f32.mrf.mxu0  ;;  %v7172_v59 = vmul.f32 %v5295_v3, %v5291_v13  ;;  %v5297_v18 = vpop.eup %5296  ;;  %v2689_v25 = vadd.f32 %v2688_v27, %v2336_v58  ;;  %v2318_v13 = vadd.f32 %v7606_v22, %v6048_v41 }
 0x307   : > { %5316 = vrcp.f32 %v3360_v37  ;;  %v3036_v24 = vadd.f32 %v3035_v10, %v2683_v16  ;;  %v3020_v3 = vadd.f32 %v7132_v44, %v2667_v49 }
 0x308   : > { %v5299_v4 = vpop.eup %5298  ;;  %5318 = vpow2.f32 %v4373_v53  ;;  %v7177_v54 = vpop.f32.mrf.mxu0  ;;  %v2340_v53 = vadd.f32 %v7607_v0, %v6057_v47  ;;  %v2671_v27 = vadd.f32 %v7068_v29, %v2318_v13 }
 0x309   : > { %v5301_v9 = vpop.eup %5300  ;;  %v3361_v35 = vadd.f32 1.0, %v5299_v4  ;;  %v4374_v5 = vmul.f32 -1.442695, %v3036_v24  ;;  %5320 = vtanh.f32 %v3014_v1 }
 0x30a   : > { %v3041_v20 = vpop.f32.mrf.mxu0  ;;  %v7182_v37 = vmul.f32 %v5301_v9, %v5297_v18  ;;  %v5303_v16 = vpop.eup %5302  ;;  %v2693_v4 = vadd.f32 %v2692_v6, %v2340_v53  ;;  %v3024_v18 = vadd.f32 %v7142_v45, %v2671_v27 }
 0x30b   : > { %5322 = vrcp.f32 %v3361_v35  ;;  %v3042_v7 = vadd.f32 %v3041_v20, %v2689_v25  ;;  %v7608_v25 = vld [vmem:[#allocation53_spill] sm:$0xff] }
 0x30c   : > { %v5305_v10 = vpop.eup %5304  ;;  %5324 = vpow2.f32 %v4374_v5  ;;  %v3043_v58 = vpop.f32.mrf.mxu0  ;;  %v3586_v24 = vpack.c.bf16 %v7182_v37, %v7172_v59  ;;  %v2324_v35 = vadd.f32 %v7608_v25, %v6048_v41 }
 0x30d   : > { %v5307_v1 = vpop.eup %5306  ;;  %v3362_v44 = vadd.f32 1.0, %v5305_v10  ;;  %v4375_v49 = vmul.f32 -1.442695, %v3042_v7  ;;  %5326 = vtanh.f32 %v3020_v3 }
 0x30e   : > { %v3045_v9 = vpop.f32.mrf.mxu0  ;;  %v7190_v22 = vmul.f32 %v5307_v1, %v5303_v16  ;;  %v5309_v47 = vpop.eup %5308  ;;  %v2677_v20 = vadd.f32 %v7099_v26, %v2324_v35  ;;  %v7609_v16 = vld [vmem:[#allocation56_spill] sm:$0xff] }
 0x30f   : > { %5328 = vrcp.f32 %v3362_v44  ;;  %v3046_v29 = vadd.f32 %v3045_v9, %v2693_v4  ;;  %v2328_v53 = vadd.f32 %v7609_v16, %v6048_v41 }
 0x310   : > { %v5311_v5 = vpop.eup %5310  ;;  %5330 = vpow2.f32 %v4375_v49  ;;  %v3030_v7 = vadd.f32 %v7152_v36, %v2677_v20 }
 0x311   : > { %v5313_v13 = vpop.eup %5312  ;;  %v3363_v6 = vadd.f32 1.0, %v5311_v5  ;;  %v4376_v0 = vmul.f32 -1.442695, %v3046_v29  ;;  %5332 = vtanh.f32 %v3024_v18  ;;  %v2681_v26 = vadd.f32 %v7125_v19, %v2328_v53  ;;  %v7610_v18 = vld [vmem:[#allocation59_spill] sm:$0xff] }
 0x312   : > { %v7195_v3 = vmul.f32 %v5313_v13, %v5309_v47  ;;  %v5315_v45 = vpop.eup %5314  ;;  %v2334_v9 = vadd.f32 %v7610_v18, %v6048_v41  ;;  %v7611_v13 = vld [vmem:[#allocation62_spill] sm:$0xff] }
 0x313   : > { %5334 = vrcp.f32 %v3363_v6  ;;  %v3034_v47 = vadd.f32 %v7164_v56, %v2681_v26  ;;  %v2338_v19 = vadd.f32 %v7611_v13, %v6048_v41 }
 0x314   : > { %v5317_v10 = vpop.eup %5316  ;;  %5336 = vpow2.f32 %v4376_v0  ;;  %v3587_v27 = vpack.c.bf16 %v7195_v3, %v7190_v22  ;;  %v2687_v35 = vadd.f32 %v7147_v57, %v2334_v9 }
 0x315   : > { %v5319_v1 = vpop.eup %5318  ;;  %v3552_v4 = vmul.f32 %v5317_v10, %v5315_v45  ;;  %5338 = vtanh.f32 %v3030_v7  ;;  %v2691_v56 = vadd.f32 %v7168_v12, %v2338_v19 }
 0x316   : > { %v3364_v44 = vadd.f32 1.0, %v5319_v1  ;;  %v5321_v49 = vpop.eup %5320  ;;  %v3040_v20 = vadd.f32 %v7177_v54, %v2687_v35 }
 0x317   : > { %v3044_v57 = vadd.f32 %v3043_v58, %v2691_v56 }
 0x318   : > { %v5323_v25 = vpop.eup %5322  ;;  %5340 = vrcp.f32 %v3364_v44 }
 0x319   : > { %v5325_v36 = vpop.eup %5324  ;;  %v3553_v29 = vmul.f32 %v5323_v25, %v5321_v49  ;;  %5342 = vtanh.f32 %v3034_v47 }
 0x31a   : > { %v3365_v5 = vadd.f32 1.0, %v5325_v36  ;;  %v5327_v22 = vpop.eup %5326 }
 0x31b   : > { %v3588_v6 = vpack.c.bf16 %v3553_v29, %v3552_v4 }
 0x31c   : > { %v5329_v0 = vpop.eup %5328  ;;  %5344 = vrcp.f32 %v3365_v5 }
 0x31d   : > { %v5331_v3 = vpop.eup %5330  ;;  %v3554_v45 = vmul.f32 %v5329_v0, %v5327_v22  ;;  %5346 = vtanh.f32 %v3040_v20 }
 0x31e   : > { %v3366_v16 = vadd.f32 1.0, %v5331_v3  ;;  %v5333_v53 = vpop.eup %5332 }
 0x320   : > { %v5335_v7 = vpop.eup %5334  ;;  %5348 = vrcp.f32 %v3366_v16 }
 0x321   : > { %v5337_v10 = vpop.eup %5336  ;;  %v3555_v1 = vmul.f32 %v5335_v7, %v5333_v53  ;;  %5350 = vtanh.f32 %v3044_v57 }
 0x322   : > { %v3367_v26 = vadd.f32 1.0, %v5337_v10  ;;  %v5339_v44 = vpop.eup %5338 }
 0x323   : > { %v3589_v41 = vpack.c.bf16 %v3555_v1, %v3554_v45 }
 0x324   : > { %5352 = vrcp.f32 %v3367_v26 }
 0x325   : > { %v5341_v54 = vpop.eup %5340 }
 0x326   : > { %v3556_v4 = vmul.f32 %v5341_v54, %v5339_v44  ;;  %v5343_v49 = vpop.eup %5342 }
 0x329   : > { %v5345_v18 = vpop.eup %5344 }
 0x32a   : > { %v3557_v9 = vmul.f32 %v5345_v18, %v5343_v49  ;;  %v5347_v12 = vpop.eup %5346 }
 0x32c   : > { %v3590_v47 = vpack.c.bf16 %v3557_v9, %v3556_v4 }
 0x32d   : > { %v5349_v25 = vpop.eup %5348 }
 0x32e   : > { %v3558_v36 = vmul.f32 %v5349_v25, %v5347_v12  ;;  %v5351_v35 = vpop.eup %5350 }
 0x331   : > { %v5353_v58 = vpop.eup %5352 }
 0x332   : > { %v3559_v29 = vmul.f32 %v5353_v58, %v5351_v35 }
 0x334   : > { %v3591_v5 = vpack.c.bf16 %v3559_v29, %v3558_v36 }
 0x336   : > { %4401 = vmatprep.subr.bf16.mxu1 %v3591_v5 }
 0x337   : > { %4402 = vmatpush3.bf16.xpose.msra.mxu1 %v3583_v23 }
 0x338   : > { %4403 = vmatprep.subr.bf16.mxu1 %v3590_v47 }
 0x33f   : > { %4404 = vmatpush3.bf16.xpose.msra.mxu1 %v3582_v17  ;;  %v7615_v17 = vlaneseq }
 0x340   : > { %4405 = vmatprep.subr.bf16.mxu1 %v3589_v41 }
 0x341   : > { %vm7252_vm0 = vcmp.lt.s32.totalorder %v7615_v17, 512 }
 0x347   : > { %4406 = vmatpush3.bf16.xpose.msra.mxu1 %v3581_v38 }
 0x348   : > { %4407 = vmatprep.subr.bf16.mxu1 %v3588_v6 }
 0x34f   : > { %4408 = vmatpush3.bf16.xpose.msra.mxu1 %v3580_v42  ;;  %v3682_v42 = vunpack.c.l.s4 %v5558_v51 }
 0x350   : > { %4409 = vmatprep.subr.bf16.mxu1 %v3587_v27 }
 0x351   : > { %v3683_v2 = vunpack.c.0.s8 %v3682_v42 }
 0x357   : > { %4410 = vmatpush3.bf16.xpose.msra.mxu1 %v3579_v60 }
 0x358   : > { %4411 = vmatprep.subr.bf16.mxu1 %v3586_v24 }
 0x35f   : > { %4412 = vmatpush3.bf16.xpose.msra.mxu1 %v3578_v15 }
 0x360   : > { %4413 = vmatprep.subr.bf16.mxu1 %v3585_v8 }
 0x367   : > { %4414 = vmatpush3.bf16.xpose.msra.mxu1 %v3577_v30  ;;  %v7614_v30 = vld [vmem:[#allocation55_spill] sm:$0xff] }
 0x368   : > { %4415 = vmatprep.subr.bf16.mxu1 %v7612_v21  ;;  %v7246_v48 = vsub.s32 %v3683_v2, %v7614_v30 }
 0x36f   : > { %4416 = vmatpush3.bf16.xpose.msra.mxu1 %v7613_v14 }
 0x376   : > { %4418 = vmatmul.mubr.bf16.vlgmr.msra.gmra.mxu1 %v6903_v62 }
 0x3b6   : > { %v3627_v11 = vpop.f32.mrf.mxu1 }
 0x3b8   : > { %v3629_v39 = vpop.f32.mrf.mxu1 }
 0x3b9   : > { %v3679_v15 = vcombine.low %v3627_v11, %v3629_v39 }
 0x3ba   : > { %v3631_v60 = vpop.f32.mrf.mxu1 }
 0x3bb   : > { %v3687_v43 = vrot.slane %v3679_v15, %v7246_v48 }
 0x3bc   : > { %v3632_v50 = vpop.f32.mrf.mxu1 }
 0x436   : > { %v3668_v46 = vpop.f32.mrf.mxu1 }
 0x438   : > { %v3670_v33 = vpop.f32.mrf.mxu1 }
 0x439   : > { %v3680_v38 = vcombine.low %v3668_v46, %v3670_v33 }
 0x43a   : > { %v3672_v52 = vpop.f32.mrf.mxu1 }
 0x43b   : > { %v3694_v62 = vrot.slane %v3680_v38, %v7246_v48 }
 0x43c   : > { %v3673_v63 = vpop.f32.mrf.mxu1 }
 0x43d   : > { %v3695_v32 = vcombine.low %v3687_v43, %v3694_v62  ;;  %3714 = sbr.rel (%p4378_p9) target bundleno = 1448 (0x5a8), region = 56 }
 0x43f   : > { %v3702_v61 = vrot.slane %v3695_v32, %v7246_v48 }
 0x441   : > { %3710 = vst.msk [vmem:[%s3705_s25] sm:$0xf] %vm7252_vm0, %v3702_v61 }
 0x442   : > { %v7618_v31 = vlaneseq  ;;  %v7619_v28 = vld [vmem:[#allocation55_spill] sm:$0xff]  ;;  %v7620_v59 = vld [vmem:[#allocation58_spill] sm:$0xff]  ;;  %v7621_v19 = vld [vmem:[#allocation60_spill] sm:$0xff]  ;;  %vm3786_vm1 = vcmask 1040384   ;;  %v3727_v57 = vstv %s3726_s8 }
 0x443   : > { %v3748_v55 = vsub.s32 2, %v7619_v28  ;;  %v3752_v8 = vsub.s32 3, %v7619_v28 }
 0x444   : > { %v3718_v34 = vand.u32 127, %v7618_v31 }
 0x446   : > { %v3719_v27 = vadd.s32 128, %v3718_v34  ;;  %v3720_v22 = vadd.s32 256, %v3718_v34  ;;  %v3721_v13 = vadd.s32 384, %v3718_v34  ;;  %v3722_v3 = vadd.s32 512, %v3718_v34 }
 0x447   : > { %vm3728_vm2 = vcmp.lt.s32.totalorder %v3718_v34, %v3727_v57 }
 0x448   : > { %v3715_v23 = vld [vmem:[#allocation12] sm:$0xf]  ;;  %v3716_v24 = vld [vmem:[#allocation12 + $0x4] sm:$0xf]  ;;  %v3723_v56 = vadd.s32 512, %v3719_v27  ;;  %v3724_v45 = vadd.s32 512, %v3720_v22  ;;  %vm3729_vm3 = vcmp.lt.s32.totalorder %v3719_v27, %v3727_v57  ;;  %vm3730_vm4 = vcmp.lt.s32.totalorder %v3720_v22, %v3727_v57 }
 0x449   : > { %v3741_v37 = vrot.slane %v3715_v23, %v7620_v59  ;;  %v3745_v20 = vrot.slane %v3715_v23, %v7621_v19  ;;  %v3749_v6 = vrot.slane %v3715_v23, %v3748_v55  ;;  %v3753_v0 = vrot.slane %v3715_v23, %v3752_v8 }
 0x44a   : > { %v3757_v16 = vrot.slane %v3716_v24, %v7620_v59  ;;  %v3761_v53 = vrot.slane %v3716_v24, %v7621_v19  ;;  %v3725_v7 = vadd.s32 512, %v3721_v13  ;;  %v3765_v10 = vrot.slane %v3716_v24, %v3748_v55 }
 0x44b   : > { %v3769_v1 = vrot.slane %v3716_v24, %v3752_v8  ;;  %vm3731_vm5 = vcmp.lt.s32.totalorder %v3721_v13, %v3727_v57  ;;  %v3778_v26 = vsel %vm3728_vm2, %v3741_v37, -inf  ;;  %v3779_v41 = vsel %vm3729_vm3, %v3745_v20, -inf }
 0x44c   : > { %v3780_v44 = vsel %vm3730_vm4, %v3749_v6, -inf  ;;  %v3781_v54 = vsel %vm3731_vm5, %v3753_v0, -inf  ;;  %v3787_v4 = vsel %vm3786_vm1, %v3778_v26, -inf  ;;  %v3788_v49 = vsel %vm3786_vm1, %v3779_v41, -inf }
 0x44d   : > { %v3789_v18 = vsel %vm3786_vm1, %v3780_v44, -inf  ;;  %v3791_v9 = vsel %vm3786_vm1, %v3781_v54, -inf  ;;  %vm3732_vm6 = vcmp.lt.s32.totalorder %v3722_v3, %v3727_v57  ;;  %vm3733_vm7 = vcmp.lt.s32.totalorder %v3723_v56, %v3727_v57 }
 0x44e   : > { %v3790_v12 = vmax.f32 %v3787_v4, %v3789_v18  ;;  %v3792_v47 = vmax.f32 %v3788_v49, %v3791_v9  ;;  %vm3734_vm8 = vcmp.lt.s32.totalorder %v3724_v45, %v3727_v57  ;;  %vm3735_vm9 = vcmp.lt.s32.totalorder %v3725_v7, %v3727_v57 }
 0x44f   : > { %v3782_v25 = vsel %vm3732_vm6, %v3757_v16, -inf  ;;  %v3783_v36 = vsel %vm3733_vm7, %v3761_v53, -inf  ;;  %v3784_v58 = vsel %vm3734_vm8, %v3765_v10, -inf  ;;  %v3785_v29 = vsel %vm3735_vm9, %v3769_v1, -inf }
 0x450   : > { %v3793_v35 = vmax.f32 %v3790_v12, %v3792_v47  ;;  %v3796_v5 = vsel %vm3786_vm1, %v3782_v25, -inf  ;;  %v3797_v21 = vsel %vm3786_vm1, %v3783_v36, -inf  ;;  %v3798_v14 = vsel %vm3786_vm1, %v3784_v58, -inf }
 0x451   : > { %v3800_v11 = vsel %vm3786_vm1, %v3785_v29, -inf  ;;  %v3799_v39 = vmax.f32 %v3796_v5, %v3798_v14 }
 0x452   : > { %3794 = vmax.xlane.f32.xlu0 %v3793_v35  ;;  %v3801_v15 = vmax.f32 %v3797_v21, %v3800_v11 }
 0x454   : > { %v3802_v60 = vmax.f32 %v3799_v39, %v3801_v15 }
 0x456   : > { %3803 = vmax.xlane.f32.xlu0 %v3802_v60 }
 0x4db   : > { %v3795_v50 = vpop.xlane.xlu0 %3794 }
 0x4dc   : > { %v3805_v42 = vsel %vm3786_vm1, %v3795_v50, -inf }
 0x4df   : > { %v3804_v51 = vpop.xlane.xlu0 %3803 }
 0x4e0   : > { %v3806_v2 = vsel %vm3786_vm1, %v3804_v51, -inf }
 0x4e1   : > { %v3807_v46 = vmax.f32 %v3805_v42, %v3806_v2 }
 0x4e3   : > { %v3808_v30 = vsub.f32 %v3778_v26, %v3807_v46  ;;  %v3809_v33 = vsub.f32 %v3779_v41, %v3807_v46  ;;  %v3810_v38 = vsub.f32 %v3780_v44, %v3807_v46  ;;  %v3811_v52 = vsub.f32 %v3781_v54, %v3807_v46 }
 0x4e4   : > { %v3812_v43 = vsub.f32 %v3782_v25, %v3807_v46  ;;  %v3813_v62 = vsub.f32 %v3783_v36, %v3807_v46  ;;  %v3814_v61 = vsub.f32 %v3784_v58, %v3807_v46  ;;  %v3815_v31 = vsub.f32 %v3785_v29, %v3807_v46 }
 0x4e5   : > { %v3816_v63 = vmul.f32 1.442695, %v3808_v30  ;;  %v3818_v32 = vmul.f32 1.442695, %v3809_v33  ;;  %v3820_v17 = vmul.f32 1.442695, %v3810_v38 }
 0x4e6   : > { %v3822_v23 = vmul.f32 1.442695, %v3811_v52  ;;  %v3824_v34 = vmul.f32 1.442695, %v3812_v43  ;;  %v3826_v28 = vmul.f32 1.442695, %v3813_v62 }
 0x4e7   : > { %5354 = vpow2.f32 %v3816_v63  ;;  %v3828_v55 = vmul.f32 1.442695, %v3814_v61  ;;  %v3830_v8 = vmul.f32 1.442695, %v3815_v31 }
 0x4e8   : > { %5356 = vpow2.f32 %v3818_v32 }
 0x4e9   : > { %5358 = vpow2.f32 %v3820_v17 }
 0x4ea   : > { %5360 = vpow2.f32 %v3822_v23 }
 0x4eb   : > { %5362 = vpow2.f32 %v3824_v34 }
 0x4ec   : > { %5364 = vpow2.f32 %v3826_v28 }
 0x4ed   : > { %5366 = vpow2.f32 %v3828_v55 }
 0x4ee   : > { %5368 = vpow2.f32 %v3830_v8 }
 0x4f4   : > { %v5355_v59 = vpop.eup %5354 }
 0x4f5   : > { %v5357_v37 = vpop.eup %5356  ;;  %v3832_v24 = vsel %vm3786_vm1, %v5355_v59, 0.0 }
 0x4f6   : > { %v5359_v27 = vpop.eup %5358  ;;  %v3833_v22 = vsel %vm3786_vm1, %v5357_v37, 0.0 }
 0x4f7   : > { %v5361_v13 = vpop.eup %5360  ;;  %v3834_v19 = vadd.f32 %v3833_v22, %v3832_v24  ;;  %v3835_v6 = vsel %vm3786_vm1, %v5359_v27, 0.0 }
 0x4f8   : > { %v5363_v20 = vpop.eup %5362  ;;  %v3837_v16 = vsel %vm3786_vm1, %v5361_v13, 0.0 }
 0x4f9   : > { %v5365_v0 = vpop.eup %5364  ;;  %v3836_v3 = vadd.f32 %v3835_v6, %v3834_v19  ;;  %v3841_v56 = vsel %vm3786_vm1, %v5363_v20, 0.0 }
 0x4fa   : > { %v5367_v45 = vpop.eup %5366  ;;  %v3842_v53 = vsel %vm3786_vm1, %v5365_v0, 0.0 }
 0x4fb   : > { %v5369_v57 = vpop.eup %5368  ;;  %v3838_v7 = vadd.f32 %v3837_v16, %v3836_v3  ;;  %v3843_v10 = vadd.f32 %v3842_v53, %v3841_v56  ;;  %v3844_v1 = vsel %vm3786_vm1, %v5367_v45, 0.0 }
 0x4fc   : > { %v3846_v41 = vsel %vm3786_vm1, %v5369_v57, 0.0 }
 0x4fd   : > { %3839 = vadd.xlane.f32.xlu1 %v3838_v7  ;;  %v3845_v26 = vadd.f32 %v3844_v1, %v3843_v10 }
 0x4ff   : > { %v3847_v44 = vadd.f32 %v3846_v41, %v3845_v26 }
 0x501   : > { %3848 = vadd.xlane.f32.xlu1 %v3847_v44 }
 0x586   : > { %v3840_v54 = vpop.xlane.xlu1 %3839 }
 0x587   : > { %v3850_v49 = vsel %vm3786_vm1, %v3840_v54, 0.0 }
 0x58a   : > { %v3849_v4 = vpop.xlane.xlu1 %3848 }
 0x58b   : > { %v3851_v18 = vsel %vm3786_vm1, %v3849_v4, 0.0 }
 0x58c   : > { %v3852_v9 = vadd.f32 %v3851_v18, %v3850_v49 }
 0x58e   : > { %5370 = vrcp.f32 %v3852_v9 }
 0x59b   : > { %v5371_v12 = vpop.eup %5370 }
 0x59c   : > { %v3854_v47 = vmul.f32 %v5371_v12, %v5355_v59  ;;  %v3855_v25 = vmul.f32 %v5371_v12, %v5357_v37  ;;  %v3856_v36 = vmul.f32 %v5371_v12, %v5359_v27  ;;  %v3857_v35 = vmul.f32 %v5371_v12, %v5361_v13 }
 0x59d   : > { %v3858_v58 = vmul.f32 %v5371_v12, %v5363_v20  ;;  %v3859_v29 = vmul.f32 %v5371_v12, %v5365_v0  ;;  %v3860_v5 = vmul.f32 %v5371_v12, %v5367_v45  ;;  %v3861_v21 = vmul.f32 %v5371_v12, %v5369_v57 }
 0x59e   : > { %v3870_v14 = vcombine.low %v3854_v47, %v3855_v25  ;;  %v3871_v11 = vcombine.low %v3856_v36, %v3857_v35 }
 0x59f   : > { %v3894_v39 = vcombine.low %v3858_v58, %v3859_v29  ;;  %v3895_v15 = vcombine.low %v3860_v5, %v3861_v21 }
 0x5a0   : > { %v3878_v60 = vrot.slane %v3870_v14, %v7246_v48  ;;  %v3885_v50 = vrot.slane %v3871_v11, %v7246_v48 }
 0x5a1   : > { %v3902_v51 = vrot.slane %v3894_v39, %v7246_v48  ;;  %v3909_v42 = vrot.slane %v3895_v15, %v7246_v48 }
 0x5a2   : > { %v3886_v2 = vcombine.low %v3878_v60, %v3885_v50 }
 0x5a3   : > { %v3910_v46 = vcombine.low %v3902_v51, %v3909_v42 }
 0x5a4   : > { %v3893_v30 = vrot.slane %v3886_v2, %v7246_v48 }
 0x5a5   : > { %v3917_v33 = vrot.slane %v3910_v46, %v7246_v48 }
 0x5a6   : > { %3920 = vst.msk [vmem:[#allocation12] sm:$0xf] %vm7252_vm0, %v3893_v30 }
 0x5a7   : > { %3921 = vst.msk [vmem:[#allocation12 + $0x4] sm:$0xf] %vm7252_vm0, %v3917_v33 }
 0x5a8 PF: > { %p4493_p8 = scmp.eq.s32.totalorder %s5614_s0, 1  ;;  %s5559_s10 = smov [#allocation12]  }
 0x5a9   : > { %s3928_s12 = sshll.u32 %s5559_s10, 4  ;;  %s3929_s12 = int_to_ptr.vmem [resolvable:$true] %s3928_s12 }
 0x5aa   : > { %s5478_s13 = scalar_lea.vmem %s3929_s12, 128  ;;  %p5485_p13 = scmp.lt.s32.totalorder %s3929_s12, %s3929_s12 }
 0x5ab   : > { %p5479_p10 = scmp.ne.s32.totalorder %s3929_s12, %s5478_s13  ;;  %p5486_p7 = scmp.lt.s32.totalorder %s5478_s13, %s5478_s13 }
 0x5ad   : > { %p5480_p12 = pnand %p5479_p10, %p4493_p8  ;;  %p5487_p3 = por %p5486_p7, %p5485_p13 }
 0x5af   : > { %p5481_p11 = pneg %p5480_p12 }
 0x5b1   : > { %p5488_p2 = pnand %p5487_p3, %p5481_p11 }
 0x5b3   : > { %5491 = shalt.err (!%p5488_p2)
}
 0x5b4   : > { %s5560_s14 = smov 64   ;;  %s5561_s15 = smov 4  }
 0x5b5   : > { %4469 = dma.vmem_to_hbm [thread:$0]  (%p4493_p8), %s3929_s12, 128, %s7327_s5, [#allocation6], %s5560_s14, %s5560_s14, %s5561_s15  }
 0x5b6   : > { %5531 = dma.done.wait (%p4493_p8), [#allocation6], 128  }
 0x5b7   : > { %5533 = vsyncadd (%p4493_p8), [#allocation6], 4294967168 }
 0x5b8 PF: > { %s7622_s18 = smov %s5665_s20  ;;  %p19_p4 = scmp.ge.s32.totalorder %s5665_s20, 4  }
 0x5b9   : > { %s7623_s20 = smov %s5540_s21  ;;  %s7624_s21 = smov %s5544_s22 }
 0x5ba   : > { %s7625_s22 = smov %s5675_s28  ;;  %s7626_s23 = smov %s7622_s18 }
 0x5bb   :  { %21 = sbr.rel (!%p19_p4) target bundleno = 8 (0x8), region = 90 }
 0x5c0   :  { %3944 = vsyncpa [#allocation5], 1 }
 0x5c1   :  { %3946 = vsyncpa [#allocation5 + $0x1], 1 }
 0x5c2   :  { %3947 = vsyncpa [#allocation8], 1 }
 0x5c3   :  { %3948 = vsyncpa [#allocation11], 1 }
 0x5c4   :  { %3949 = vsyncpa [#allocation6], 1 }
 0x5c5   :  { %3951 = vsyncpa [#allocation6 + $0x1], 1 }

</bundles_post_ra>
